<compile_context>
chip_gen: v6e
topology: v6e:2x2x1
jax: 0.10.0
libtpu: 0.0.40
codegen_flags: <defaults>
</compile_context>

<pallas_src>
import functools

import jax
import jax.numpy as jnp
from jax import lax
from jax.experimental import pallas as pl
from jax.experimental.pallas import tpu as pltpu

EPS = 1e-5
LANE = 128


def _round_up(x, m):
    return (x + m - 1) // m * m


def _bottleneck_kernel(x_ref, w1_ref, w2_ref, w3_ref,
                       g1_ref, b1_ref, g2_ref, b2_ref, g3_ref, b3_ref,
                       out_ref, pad_ref, *, B, H, W):
    N, Cp = x_ref.shape            # N = B*H*W, Cp = padded inplanes (lane-dense)
    Pp = w1_ref.shape[1]           # padded planes (lane-dense)
    inv_n = 1.0 / N

    def bn(h, g_ref, b_ref):
        # Training-mode BatchNorm forward (biased variance), per-channel over all rows.
        # Sublane reductions (XLU/VPU) keep the MXU free; rsqrt goes to the EUP.
        mu = jnp.sum(h, axis=0, keepdims=True) * inv_n
        c = h - mu
        var = jnp.sum(c * c, axis=0, keepdims=True) * inv_n
        scale = g_ref[...] * lax.rsqrt(var + EPS)
        return c * scale + b_ref[...]

    # ---- conv1 (1x1) -> bn1 -> relu ----
    h1 = jnp.dot(x_ref[...].astype(jnp.bfloat16), w1_ref[...],
                 preferred_element_type=jnp.float32)
    h1 = jnp.maximum(bn(h1, g1_ref, b1_ref), 0.0)

    # ---- conv2 (3x3, stride=1, pad=1): bf16 halo scratch + 9 per-tap accumulating matmuls ----
    h1r = h1.astype(jnp.bfloat16).reshape(B, H, W, Pp)
    zrow = jnp.zeros((B, 1, W + 2, Pp), pad_ref.dtype)
    zcol = jnp.zeros((B, H, 1, Pp), pad_ref.dtype)
    pad_ref[:, 1:H + 1, 1:W + 1, :] = h1r                         # interior slab (single convert)
    pad_ref[:, 0:1, :, :] = zrow                                  # top halo row
    pad_ref[:, H + 1:H + 2, :, :] = zrow                          # bottom halo row
    pad_ref[:, 1:H + 1, 0:1, :] = zcol                            # left halo column
    pad_ref[:, 1:H + 1, W + 1:W + 2, :] = zcol                    # right halo column

    h2 = jnp.zeros((N, Pp), jnp.float32)
    for k in range(9):
        ky, kx = k // 3, k % 3
        patch = pad_ref[:, ky:ky + H, kx:kx + W, :].reshape(N, Pp)   # bf16 tap window
        h2 = h2 + jnp.dot(patch, w2_ref[k], preferred_element_type=jnp.float32)
    h2 = jnp.maximum(bn(h2, g2_ref, b2_ref), 0.0)

    # ---- conv3 (1x1) -> bn3 ----
    h3 = jnp.dot(h2.astype(jnp.bfloat16), w3_ref[...],
                 preferred_element_type=jnp.float32)
    h3 = bn(h3, g3_ref, b3_ref)

    # ---- residual add + relu; load x late (already VMEM-resident) to shrink live ranges ----
    out_ref[...] = jnp.maximum(h3 + x_ref[...], 0.0)


def _pad_to(a, shape):
    pads = [(0, t - s) for s, t in zip(a.shape, shape)]
    return jnp.pad(a, pads)


def _estimate_vmem_bytes(B, H, W, N, Cp, Pp):
    f32, bf16 = 4, 2
    act = 2 * N * Cp * f32                                            # x in + out
    weights = (Cp * Pp + 9 * Pp * Pp + Pp * Cp) * bf16 + 6 * max(Cp, Pp) * f32
    halo = B * (H + 2) * _round_up(W + 2, 16) * Pp * bf16             # bf16 halo (tile-rounded)
    # h1/h2/h3/centered f32 temps, h1r bf16 copy + one tap patch, plus a Cp-wide f32 temp.
    live = N * Pp * (4 * f32 + 2 * bf16) + N * Cp * f32
    return act + weights + halo + live


def _vmem_limit_bytes():
    # Per-generation scoped-VMEM limit: ~3/4 of physical (96 MiB on v5e/v6e, 48 MiB on v7x),
    # with a conservative fallback if the hardware query is unavailable.
    phys = None
    try:
        info = pltpu.get_tpu_info()
        phys = getattr(info, "vmem_capacity_bytes", None)
    except Exception:
        phys = None
    if not phys or phys <= 0:
        phys = 64 * 1024 * 1024
    return min(int(phys) * 3 // 4, 100 * 1024 * 1024)


def bottleneck_pallas(x_nchw, params):
    """x_nchw: (B, Cin, H, W) float32.  Returns (B, Cin, H, W) float32."""
    B, Cin, H, W = x_nchw.shape
    P = params["w1"].shape[1]
    Cout = params["w3"].shape[1]
    assert Cout == Cin, "residual add requires inplanes == planes * expansion (downsample=None)"

    Cp = _round_up(Cin, LANE)
    Pp = _round_up(P, LANE)
    N = B * H * W

    # Layout plumbing in the wrapper: NCHW -> lane-dense (N, Cp) slab.
    x2d = jnp.transpose(x_nchw, (0, 2, 3, 1)).reshape(N, Cin)
    x2d = _pad_to(x2d, (N, Cp)).astype(jnp.float32)

    # Pad weights to lane-dense shapes; MXU operands are bf16 (f32 accumulation in-kernel).
    # w2 is kept as (9, Pp, Pp): each tap weight slice is a contiguous lane-dense tile.
    w1 = _pad_to(params["w1"], (Cp, Pp)).astype(jnp.bfloat16)
    w2 = _pad_to(params["w2"], (3, 3, Pp, Pp)).astype(jnp.bfloat16).reshape(9, Pp, Pp)
    w3 = _pad_to(params["w3"], (Pp, Cp)).astype(jnp.bfloat16)
    g1 = _pad_to(params["g1"], (1, Pp)).astype(jnp.float32)
    b1 = _pad_to(params["b1"], (1, Pp)).astype(jnp.float32)
    g2 = _pad_to(params["g2"], (1, Pp)).astype(jnp.float32)
    b2 = _pad_to(params["b2"], (1, Pp)).astype(jnp.float32)
    g3 = _pad_to(params["g3"], (1, Cp)).astype(jnp.float32)
    b3 = _pad_to(params["b3"], (1, Cp)).astype(jnp.float32)

    vmem_limit = _vmem_limit_bytes()
    est = _estimate_vmem_bytes(B, H, W, N, Cp, Pp)
    assert est <= (3 * vmem_limit) // 4, (
        f"activations too large for single fully-resident invocation "
        f"(~{est} bytes vs limit {vmem_limit}); add a grid over batch/rows")

    vmem_spec = pl.BlockSpec(memory_space=pltpu.MemorySpace.VMEM)
    kernel = functools.partial(_bottleneck_kernel, B=B, H=H, W=W)

    out2d = pl.pallas_call(
        kernel,
        out_shape=jax.ShapeDtypeStruct((N, Cp), jnp.float32),
        in_specs=[vmem_spec] * 10,
        out_specs=vmem_spec,
        scratch_shapes=[pltpu.VMEM((B, H + 2, W + 2, Pp), jnp.bfloat16)],
        compiler_params=pltpu.CompilerParams(vmem_limit_bytes=vmem_limit),
    )(x2d, w1, w2, w3, g1, b1, g2, b2, g3, b3)

    out = out2d[:, :Cin].reshape(B, H, W, Cin)
    return jnp.transpose(out, (0, 3, 1, 2))


def bottleneck_reference(x_nchw, params, *, matmul_dtype=jnp.float32):
    """Pure-JAX reference of the PyTorch forward (training-mode BN).

    `matmul_dtype=jnp.bfloat16` mirrors the kernel's MXU operand dtype (f32 accumulation)."""
    x = jnp.transpose(x_nchw, (0, 2, 3, 1)).astype(jnp.float32)

    def bn(h, g, b):
        mu = jnp.mean(h, axis=(0, 1, 2), keepdims=True)
        var = jnp.mean((h - mu) ** 2, axis=(0, 1, 2), keepdims=True)
        return (h - mu) * lax.rsqrt(var + EPS) * g.reshape(1, 1, 1, -1) + b.reshape(1, 1, 1, -1)

    def mm(a, w):
        return jnp.einsum("bhwc,cd->bhwd", a.astype(matmul_dtype), w.astype(matmul_dtype),
                          preferred_element_type=jnp.float32)

    h = jax.nn.relu(bn(mm(x, params["w1"]), params["g1"], params["b1"]))
    h = lax.conv_general_dilated(h.astype(matmul_dtype), params["w2"].astype(matmul_dtype),
                                 window_strides=(1, 1), padding="SAME",
                                 dimension_numbers=("NHWC", "HWIO", "NHWC"),
                                 preferred_element_type=jnp.float32)
    h = jax.nn.relu(bn(h, params["g2"], params["b2"]))
    h = bn(mm(h, params["w3"]), params["g3"], params["b3"])
    out = jax.nn.relu(h + x)
    return jnp.transpose(out, (0, 3, 1, 2))


def make_params(key, inplanes, planes):
    ks = jax.random.split(key, 9)
    expansion = 4
    out_planes = planes * expansion
    w1 = jax.random.normal(ks[0], (inplanes, planes), jnp.float32) * 0.1
    w2 = jax.random.normal(ks[1], (3, 3, planes, planes), jnp.float32) * 0.1
    w3 = jax.random.normal(ks[2], (planes, out_planes), jnp.float32) * 0.1
    g1 = 1.0 + 0.1 * jax.random.normal(ks[3], (1, planes), jnp.float32)
    b1 = 0.1 * jax.random.normal(ks[4], (1, planes), jnp.float32)
    g2 = 1.0 + 0.1 * jax.random.normal(ks[5], (1, planes), jnp.float32)
    b2 = 0.1 * jax.random.normal(ks[6], (1, planes), jnp.float32)
    g3 = 1.0 + 0.1 * jax.random.normal(ks[7], (1, out_planes), jnp.float32)
    b3 = 0.1 * jax.random.normal(ks[8], (1, out_planes), jnp.float32)
    return dict(w1=w1, w2=w2, w3=w3, g1=g1, b1=b1, g2=g2, b2=b2, g3=g3, b3=b3)


if __name__ == "__main__":
    key = jax.random.PRNGKey(0)
    k_x, k_p = jax.random.split(key)

    B, inplanes, H, W = 2, 16, 8, 8
    planes = 4  # expansion 4 -> out channels 16 == inplanes, so residual add is valid

    x = jax.random.normal(k_x, (B, inplanes, H, W), jnp.float32)
    params = make_params(k_p, inplanes, planes)

    out = jax.block_until_ready(bottleneck_pallas(x, params))
    assert out.shape == (B, inplanes, H, W)

    # Tight structural check vs a reference that uses the same bf16 MXU operand dtype.
    ref_bf16 = jax.block_until_ready(bottleneck_reference(x, params, matmul_dtype=jnp.bfloat16))
    if not jnp.allclose(out, ref_bf16, atol=3e-3, rtol=3e-3):
        err = float(jnp.max(jnp.abs(out - ref_bf16)))
        raise AssertionError(f"Pallas kernel mismatch vs bf16-matmul reference (max abs err {err})")

    # Semantics check vs the pure-f32 PyTorch-style forward; gap is bf16 operand rounding only.
    ref_f32 = jax.block_until_ready(bottleneck_reference(x, params, matmul_dtype=jnp.float32))
    if not jnp.allclose(out, ref_f32, atol=1e-1, rtol=1e-1):
        err = float(jnp.max(jnp.abs(out - ref_f32)))
        raise AssertionError(f"Pallas kernel mismatch vs f32 reference (max abs err {err})")

    print("KERNEL_OK")
</pallas_src>

<mosaic_0001>
module attributes {stable_mosaic.version = 11 : i64} {
  func.func @_bottleneck_kernel(%arg0: memref<128x128xf32, #tpu.memory_space<vmem>>, %arg1: memref<128x128xbf16, #tpu.memory_space<vmem>>, %arg2: memref<9x128x128xbf16, #tpu.memory_space<vmem>>, %arg3: memref<128x128xbf16, #tpu.memory_space<vmem>>, %arg4: memref<1x128xf32, #tpu.memory_space<vmem>>, %arg5: memref<1x128xf32, #tpu.memory_space<vmem>>, %arg6: memref<1x128xf32, #tpu.memory_space<vmem>>, %arg7: memref<1x128xf32, #tpu.memory_space<vmem>>, %arg8: memref<1x128xf32, #tpu.memory_space<vmem>>, %arg9: memref<1x128xf32, #tpu.memory_space<vmem>>, %arg10: memref<128x128xf32, #tpu.memory_space<vmem>>, %arg11: memref<2x10x10x128xbf16, #tpu.memory_space<vmem>>) attributes {dimension_semantics = [], scalar_prefetch = 0 : i64, scratch_operands = 1 : i64, tpu.core_type = #tpu.core_type<tc>} {
    %c0 = arith.constant 0 : index
    %c0_0 = arith.constant 0 : index
    %0 = vector.load %arg0[%c0, %c0_0] : memref<128x128xf32, #tpu.memory_space<vmem>>, vector<128x128xf32>
    %1 = arith.truncf %0 : vector<128x128xf32> to vector<128x128xbf16>
    %c0_1 = arith.constant 0 : index
    %c0_2 = arith.constant 0 : index
    %2 = vector.load %arg1[%c0_1, %c0_2] : memref<128x128xbf16, #tpu.memory_space<vmem>>, vector<128x128xbf16>
    %cst = arith.constant dense<0.000000e+00> : vector<128x128xf32>
    %3 = tpu.matmul %1, %2, %cst {dimension_numbers = #tpu.dot_dimension_numbers<[1], [0], [0], [1], [0, 0, 1, 1], [], []>} : vector<128x128xbf16>, vector<128x128xbf16>, vector<128x128xf32> -> vector<128x128xf32>
    %cst_3 = arith.constant dense<0.000000e+00> : vector<128xf32>
    %4 = vector.multi_reduction <add>, %3, %cst_3 [0] : vector<128x128xf32> to vector<128xf32>
    %5 = vector.shape_cast %4 : vector<128xf32> to vector<1x128xf32>
    %cst_4 = arith.constant 7.812500e-03 : f32
    %6 = vector.broadcast %cst_4 : f32 to vector<1x128xf32>
    %7 = arith.mulf %5, %6 : vector<1x128xf32>
    %8 = vector.broadcast %7 : vector<1x128xf32> to vector<128x128xf32>
    %9 = arith.subf %3, %8 : vector<128x128xf32>
    %10 = arith.mulf %9, %9 : vector<128x128xf32>
    %cst_5 = arith.constant dense<0.000000e+00> : vector<128xf32>
    %11 = vector.multi_reduction <add>, %10, %cst_5 [0] : vector<128x128xf32> to vector<128xf32>
    %12 = vector.shape_cast %11 : vector<128xf32> to vector<1x128xf32>
    %cst_6 = arith.constant 7.812500e-03 : f32
    %13 = vector.broadcast %cst_6 : f32 to vector<1x128xf32>
    %14 = arith.mulf %12, %13 : vector<1x128xf32>
    %c0_7 = arith.constant 0 : index
    %c0_8 = arith.constant 0 : index
    %15 = vector.load %arg4[%c0_7, %c0_8] : memref<1x128xf32, #tpu.memory_space<vmem>>, vector<1x128xf32>
    %cst_9 = arith.constant 9.99999974E-6 : f32
    %16 = vector.broadcast %cst_9 : f32 to vector<1x128xf32>
    %17 = arith.addf %14, %16 : vector<1x128xf32>
    %18 = math.rsqrt %17 : vector<1x128xf32>
    %19 = arith.mulf %15, %18 : vector<1x128xf32>
    %20 = vector.broadcast %19 : vector<1x128xf32> to vector<128x128xf32>
    %21 = arith.mulf %9, %20 : vector<128x128xf32>
    %c0_10 = arith.constant 0 : index
    %c0_11 = arith.constant 0 : index
    %22 = vector.load %arg5[%c0_10, %c0_11] : memref<1x128xf32, #tpu.memory_space<vmem>>, vector<1x128xf32>
    %23 = vector.broadcast %22 : vector<1x128xf32> to vector<128x128xf32>
    %24 = arith.addf %21, %23 : vector<128x128xf32>
    %cst_12 = arith.constant 0.000000e+00 : f32
    %25 = vector.broadcast %cst_12 : f32 to vector<128x128xf32>
    %26 = arith.maximumf %24, %25 : vector<128x128xf32>
    %27 = arith.truncf %26 : vector<128x128xf32> to vector<128x128xbf16>
    %28 = vector.shape_cast %27 : vector<128x128xbf16> to vector<2x8x8x128xbf16>
    %cst_13 = arith.constant 0.000000e+00 : bf16
    %29 = vector.broadcast %cst_13 : bf16 to vector<2x1x10x128xbf16>
    %cst_14 = arith.constant 0.000000e+00 : bf16
    %30 = vector.broadcast %cst_14 : bf16 to vector<2x8x1x128xbf16>
    %c0_15 = arith.constant 0 : index
    %c1 = arith.constant 1 : index
    %c1_16 = arith.constant 1 : index
    %c0_17 = arith.constant 0 : index
    %31 = vector.load %arg11[%c0_15, %c1, %c1_16, %c0_17] : memref<2x10x10x128xbf16, #tpu.memory_space<vmem>>, vector<2x8x8x128xbf16>
    tpu.vector_store %arg11[%c0_15, %c1, %c1_16, %c0_17], %28 {strides = array<i32>} : memref<2x10x10x128xbf16, #tpu.memory_space<vmem>>, vector<2x8x8x128xbf16>,
    %c0_18 = arith.constant 0 : index
    %c0_19 = arith.constant 0 : index
    %c0_20 = arith.constant 0 : index
    %c0_21 = arith.constant 0 : index
    %32 = vector.load %arg11[%c0_18, %c0_19, %c0_20, %c0_21] : memref<2x10x10x128xbf16, #tpu.memory_space<vmem>>, vector<2x1x10x128xbf16>
    tpu.vector_store %arg11[%c0_18, %c0_19, %c0_20, %c0_21], %29 {strides = array<i32>} : memref<2x10x10x128xbf16, #tpu.memory_space<vmem>>, vector<2x1x10x128xbf16>,
    %c0_22 = arith.constant 0 : index
    %c9 = arith.constant 9 : index
    %c0_23 = arith.constant 0 : index
    %c0_24 = arith.constant 0 : index
    %33 = vector.load %arg11[%c0_22, %c9, %c0_23, %c0_24] : memref<2x10x10x128xbf16, #tpu.memory_space<vmem>>, vector<2x1x10x128xbf16>
    tpu.vector_store %arg11[%c0_22, %c9, %c0_23, %c0_24], %29 {strides = array<i32>} : memref<2x10x10x128xbf16, #tpu.memory_space<vmem>>, vector<2x1x10x128xbf16>,
    %c0_25 = arith.constant 0 : index
    %c1_26 = arith.constant 1 : index
    %c0_27 = arith.constant 0 : index
    %c0_28 = arith.constant 0 : index
    %34 = vector.load %arg11[%c0_25, %c1_26, %c0_27, %c0_28] : memref<2x10x10x128xbf16, #tpu.memory_space<vmem>>, vector<2x8x1x128xbf16>
    tpu.vector_store %arg11[%c0_25, %c1_26, %c0_27, %c0_28], %30 {strides = array<i32>} : memref<2x10x10x128xbf16, #tpu.memory_space<vmem>>, vector<2x8x1x128xbf16>,
    %c0_29 = arith.constant 0 : index
    %c1_30 = arith.constant 1 : index
    %c9_31 = arith.constant 9 : index
    %c0_32 = arith.constant 0 : index
    %35 = vector.load %arg11[%c0_29, %c1_30, %c9_31, %c0_32] : memref<2x10x10x128xbf16, #tpu.memory_space<vmem>>, vector<2x8x1x128xbf16>
    tpu.vector_store %arg11[%c0_29, %c1_30, %c9_31, %c0_32], %30 {strides = array<i32>} : memref<2x10x10x128xbf16, #tpu.memory_space<vmem>>, vector<2x8x1x128xbf16>,
    %cst_33 = arith.constant 0.000000e+00 : f32
    %36 = vector.broadcast %cst_33 : f32 to vector<128x128xf32>
    %c0_34 = arith.constant 0 : index
    %c0_35 = arith.constant 0 : index
    %c0_36 = arith.constant 0 : index
    %c0_37 = arith.constant 0 : index
    %37 = vector.load %arg11[%c0_34, %c0_35, %c0_36, %c0_37] : memref<2x10x10x128xbf16, #tpu.memory_space<vmem>>, vector<2x8x8x128xbf16>
    %38 = vector.shape_cast %37 : vector<2x8x8x128xbf16> to vector<128x128xbf16>
    %c0_38 = arith.constant 0 : index
    %c0_39 = arith.constant 0 : index
    %c0_40 = arith.constant 0 : index
    %39 = vector.load %arg2[%c0_38, %c0_39, %c0_40] : memref<9x128x128xbf16, #tpu.memory_space<vmem>>, vector<1x128x128xbf16>
    %40 = vector.shape_cast %39 : vector<1x128x128xbf16> to vector<128x128xbf16>
    %cst_41 = arith.constant dense<0.000000e+00> : vector<128x128xf32>
    %41 = tpu.matmul %38, %40, %cst_41 {dimension_numbers = #tpu.dot_dimension_numbers<[1], [0], [0], [1], [0, 0, 1, 1], [], []>} : vector<128x128xbf16>, vector<128x128xbf16>, vector<128x128xf32> -> vector<128x128xf32>
    %42 = arith.addf %36, %41 : vector<128x128xf32>
    %c0_42 = arith.constant 0 : index
    %c0_43 = arith.constant 0 : index
    %c1_44 = arith.constant 1 : index
    %c0_45 = arith.constant 0 : index
    %43 = vector.load %arg11[%c0_42, %c0_43, %c1_44, %c0_45] : memref<2x10x10x128xbf16, #tpu.memory_space<vmem>>, vector<2x8x8x128xbf16>
    %44 = vector.shape_cast %43 : vector<2x8x8x128xbf16> to vector<128x128xbf16>
    %c1_46 = arith.constant 1 : index
    %c0_47 = arith.constant 0 : index
    %c0_48 = arith.constant 0 : index
    %45 = vector.load %arg2[%c1_46, %c0_47, %c0_48] : memref<9x128x128xbf16, #tpu.memory_space<vmem>>, vector<1x128x128xbf16>
    %46 = vector.shape_cast %45 : vector<1x128x128xbf16> to vector<128x128xbf16>
    %cst_49 = arith.constant dense<0.000000e+00> : vector<128x128xf32>
    %47 = tpu.matmul %44, %46, %cst_49 {dimension_numbers = #tpu.dot_dimension_numbers<[1], [0], [0], [1], [0, 0, 1, 1], [], []>} : vector<128x128xbf16>, vector<128x128xbf16>, vector<128x128xf32> -> vector<128x128xf32>
    %48 = arith.addf %42, %47 : vector<128x128xf32>
    %c0_50 = arith.constant 0 : index
    %c0_51 = arith.constant 0 : index
    %c2 = arith.constant 2 : index
    %c0_52 = arith.constant 0 : index
    %49 = vector.load %arg11[%c0_50, %c0_51, %c2, %c0_52] : memref<2x10x10x128xbf16, #tpu.memory_space<vmem>>, vector<2x8x8x128xbf16>
    %50 = vector.shape_cast %49 : vector<2x8x8x128xbf16> to vector<128x128xbf16>
    %c2_53 = arith.constant 2 : index
    %c0_54 = arith.constant 0 : index
    %c0_55 = arith.constant 0 : index
    %51 = vector.load %arg2[%c2_53, %c0_54, %c0_55] : memref<9x128x128xbf16, #tpu.memory_space<vmem>>, vector<1x128x128xbf16>
    %52 = vector.shape_cast %51 : vector<1x128x128xbf16> to vector<128x128xbf16>
    %cst_56 = arith.constant dense<0.000000e+00> : vector<128x128xf32>
    %53 = tpu.matmul %50, %52, %cst_56 {dimension_numbers = #tpu.dot_dimension_numbers<[1], [0], [0], [1], [0, 0, 1, 1], [], []>} : vector<128x128xbf16>, vector<128x128xbf16>, vector<128x128xf32> -> vector<128x128xf32>
    %54 = arith.addf %48, %53 : vector<128x128xf32>
    %c0_57 = arith.constant 0 : index
    %c1_58 = arith.constant 1 : index
    %c0_59 = arith.constant 0 : index
    %c0_60 = arith.constant 0 : index
    %55 = vector.load %arg11[%c0_57, %c1_58, %c0_59, %c0_60] : memref<2x10x10x128xbf16, #tpu.memory_space<vmem>>, vector<2x8x8x128xbf16>
    %56 = vector.shape_cast %55 : vector<2x8x8x128xbf16> to vector<128x128xbf16>
    %c3 = arith.constant 3 : index
    %c0_61 = arith.constant 0 : index
    %c0_62 = arith.constant 0 : index
    %57 = vector.load %arg2[%c3, %c0_61, %c0_62] : memref<9x128x128xbf16, #tpu.memory_space<vmem>>, vector<1x128x128xbf16>
    %58 = vector.shape_cast %57 : vector<1x128x128xbf16> to vector<128x128xbf16>
    %cst_63 = arith.constant dense<0.000000e+00> : vector<128x128xf32>
    %59 = tpu.matmul %56, %58, %cst_63 {dimension_numbers = #tpu.dot_dimension_numbers<[1], [0], [0], [1], [0, 0, 1, 1], [], []>} : vector<128x128xbf16>, vector<128x128xbf16>, vector<128x128xf32> -> vector<128x128xf32>
    %60 = arith.addf %54, %59 : vector<128x128xf32>
    %c0_64 = arith.constant 0 : index
    %c1_65 = arith.constant 1 : index
    %c1_66 = arith.constant 1 : index
    %c0_67 = arith.constant 0 : index
    %61 = vector.load %arg11[%c0_64, %c1_65, %c1_66, %c0_67] : memref<2x10x10x128xbf16, #tpu.memory_space<vmem>>, vector<2x8x8x128xbf16>
    %62 = vector.shape_cast %61 : vector<2x8x8x128xbf16> to vector<128x128xbf16>
    %c4 = arith.constant 4 : index
    %c0_68 = arith.constant 0 : index
    %c0_69 = arith.constant 0 : index
    %63 = vector.load %arg2[%c4, %c0_68, %c0_69] : memref<9x128x128xbf16, #tpu.memory_space<vmem>>, vector<1x128x128xbf16>
    %64 = vector.shape_cast %63 : vector<1x128x128xbf16> to vector<128x128xbf16>
    %cst_70 = arith.constant dense<0.000000e+00> : vector<128x128xf32>
    %65 = tpu.matmul %62, %64, %cst_70 {dimension_numbers = #tpu.dot_dimension_numbers<[1], [0], [0], [1], [0, 0, 1, 1], [], []>} : vector<128x128xbf16>, vector<128x128xbf16>, vector<128x128xf32> -> vector<128x128xf32>
    %66 = arith.addf %60, %65 : vector<128x128xf32>
    %c0_71 = arith.constant 0 : index
    %c1_72 = arith.constant 1 : index
    %c2_73 = arith.constant 2 : index
    %c0_74 = arith.constant 0 : index
    %67 = vector.load %arg11[%c0_71, %c1_72, %c2_73, %c0_74] : memref<2x10x10x128xbf16, #tpu.memory_space<vmem>>, vector<2x8x8x128xbf16>
    %68 = vector.shape_cast %67 : vector<2x8x8x128xbf16> to vector<128x128xbf16>
    %c5 = arith.constant 5 : index
    %c0_75 = arith.constant 0 : index
    %c0_76 = arith.constant 0 : index
    %69 = vector.load %arg2[%c5, %c0_75, %c0_76] : memref<9x128x128xbf16, #tpu.memory_space<vmem>>, vector<1x128x128xbf16>
    %70 = vector.shape_cast %69 : vector<1x128x128xbf16> to vector<128x128xbf16>
    %cst_77 = arith.constant dense<0.000000e+00> : vector<128x128xf32>
    %71 = tpu.matmul %68, %70, %cst_77 {dimension_numbers = #tpu.dot_dimension_numbers<[1], [0], [0], [1], [0, 0, 1, 1], [], []>} : vector<128x128xbf16>, vector<128x128xbf16>, vector<128x128xf32> -> vector<128x128xf32>
    %72 = arith.addf %66, %71 : vector<128x128xf32>
    %c0_78 = arith.constant 0 : index
    %c2_79 = arith.constant 2 : index
    %c0_80 = arith.constant 0 : index
    %c0_81 = arith.constant 0 : index
    %73 = vector.load %arg11[%c0_78, %c2_79, %c0_80, %c0_81] : memref<2x10x10x128xbf16, #tpu.memory_space<vmem>>, vector<2x8x8x128xbf16>
    %74 = vector.shape_cast %73 : vector<2x8x8x128xbf16> to vector<128x128xbf16>
    %c6 = arith.constant 6 : index
    %c0_82 = arith.constant 0 : index
    %c0_83 = arith.constant 0 : index
    %75 = vector.load %arg2[%c6, %c0_82, %c0_83] : memref<9x128x128xbf16, #tpu.memory_space<vmem>>, vector<1x128x128xbf16>
    %76 = vector.shape_cast %75 : vector<1x128x128xbf16> to vector<128x128xbf16>
    %cst_84 = arith.constant dense<0.000000e+00> : vector<128x128xf32>
    %77 = tpu.matmul %74, %76, %cst_84 {dimension_numbers = #tpu.dot_dimension_numbers<[1], [0], [0], [1], [0, 0, 1, 1], [], []>} : vector<128x128xbf16>, vector<128x128xbf16>, vector<128x128xf32> -> vector<128x128xf32>
    %78 = arith.addf %72, %77 : vector<128x128xf32>
    %c0_85 = arith.constant 0 : index
    %c2_86 = arith.constant 2 : index
    %c1_87 = arith.constant 1 : index
    %c0_88 = arith.constant 0 : index
    %79 = vector.load %arg11[%c0_85, %c2_86, %c1_87, %c0_88] : memref<2x10x10x128xbf16, #tpu.memory_space<vmem>>, vector<2x8x8x128xbf16>
    %80 = vector.shape_cast %79 : vector<2x8x8x128xbf16> to vector<128x128xbf16>
    %c7 = arith.constant 7 : index
    %c0_89 = arith.constant 0 : index
    %c0_90 = arith.constant 0 : index
    %81 = vector.load %arg2[%c7, %c0_89, %c0_90] : memref<9x128x128xbf16, #tpu.memory_space<vmem>>, vector<1x128x128xbf16>
    %82 = vector.shape_cast %81 : vector<1x128x128xbf16> to vector<128x128xbf16>
    %cst_91 = arith.constant dense<0.000000e+00> : vector<128x128xf32>
    %83 = tpu.matmul %80, %82, %cst_91 {dimension_numbers = #tpu.dot_dimension_numbers<[1], [0], [0], [1], [0, 0, 1, 1], [], []>} : vector<128x128xbf16>, vector<128x128xbf16>, vector<128x128xf32> -> vector<128x128xf32>
    %84 = arith.addf %78, %83 : vector<128x128xf32>
    %c0_92 = arith.constant 0 : index
    %c2_93 = arith.constant 2 : index
    %c2_94 = arith.constant 2 : index
    %c0_95 = arith.constant 0 : index
    %85 = vector.load %arg11[%c0_92, %c2_93, %c2_94, %c0_95] : memref<2x10x10x128xbf16, #tpu.memory_space<vmem>>, vector<2x8x8x128xbf16>
    %86 = vector.shape_cast %85 : vector<2x8x8x128xbf16> to vector<128x128xbf16>
    %c8 = arith.constant 8 : index
    %c0_96 = arith.constant 0 : index
    %c0_97 = arith.constant 0 : index
    %87 = vector.load %arg2[%c8, %c0_96, %c0_97] : memref<9x128x128xbf16, #tpu.memory_space<vmem>>, vector<1x128x128xbf16>
    %88 = vector.shape_cast %87 : vector<1x128x128xbf16> to vector<128x128xbf16>
    %cst_98 = arith.constant dense<0.000000e+00> : vector<128x128xf32>
    %89 = tpu.matmul %86, %88, %cst_98 {dimension_numbers = #tpu.dot_dimension_numbers<[1], [0], [0], [1], [0, 0, 1, 1], [], []>} : vector<128x128xbf16>, vector<128x128xbf16>, vector<128x128xf32> -> vector<128x128xf32>
    %90 = arith.addf %84, %89 : vector<128x128xf32>
    %cst_99 = arith.constant dense<0.000000e+00> : vector<128xf32>
    %91 = vector.multi_reduction <add>, %90, %cst_99 [0] : vector<128x128xf32> to vector<128xf32>
    %92 = vector.shape_cast %91 : vector<128xf32> to vector<1x128xf32>
    %cst_100 = arith.constant 7.812500e-03 : f32
    %93 = vector.broadcast %cst_100 : f32 to vector<1x128xf32>
    %94 = arith.mulf %92, %93 : vector<1x128xf32>
    %95 = vector.broadcast %94 : vector<1x128xf32> to vector<128x128xf32>
    %96 = arith.subf %90, %95 : vector<128x128xf32>
    %97 = arith.mulf %96, %96 : vector<128x128xf32>
    %cst_101 = arith.constant dense<0.000000e+00> : vector<128xf32>
    %98 = vector.multi_reduction <add>, %97, %cst_101 [0] : vector<128x128xf32> to vector<128xf32>
    %99 = vector.shape_cast %98 : vector<128xf32> to vector<1x128xf32>
    %cst_102 = arith.constant 7.812500e-03 : f32
    %100 = vector.broadcast %cst_102 : f32 to vector<1x128xf32>
    %101 = arith.mulf %99, %100 : vector<1x128xf32>
    %c0_103 = arith.constant 0 : index
    %c0_104 = arith.constant 0 : index
    %102 = vector.load %arg6[%c0_103, %c0_104] : memref<1x128xf32, #tpu.memory_space<vmem>>, vector<1x128xf32>
    %cst_105 = arith.constant 9.99999974E-6 : f32
    %103 = vector.broadcast %cst_105 : f32 to vector<1x128xf32>
    %104 = arith.addf %101, %103 : vector<1x128xf32>
    %105 = math.rsqrt %104 : vector<1x128xf32>
    %106 = arith.mulf %102, %105 : vector<1x128xf32>
    %107 = vector.broadcast %106 : vector<1x128xf32> to vector<128x128xf32>
    %108 = arith.mulf %96, %107 : vector<128x128xf32>
    %c0_106 = arith.constant 0 : index
    %c0_107 = arith.constant 0 : index
    %109 = vector.load %arg7[%c0_106, %c0_107] : memref<1x128xf32, #tpu.memory_space<vmem>>, vector<1x128xf32>
    %110 = vector.broadcast %109 : vector<1x128xf32> to vector<128x128xf32>
    %111 = arith.addf %108, %110 : vector<128x128xf32>
    %cst_108 = arith.constant 0.000000e+00 : f32
    %112 = vector.broadcast %cst_108 : f32 to vector<128x128xf32>
    %113 = arith.maximumf %111, %112 : vector<128x128xf32>
    %114 = arith.truncf %113 : vector<128x128xf32> to vector<128x128xbf16>
    %c0_109 = arith.constant 0 : index
    %c0_110 = arith.constant 0 : index
    %115 = vector.load %arg3[%c0_109, %c0_110] : memref<128x128xbf16, #tpu.memory_space<vmem>>, vector<128x128xbf16>
    %cst_111 = arith.constant dense<0.000000e+00> : vector<128x128xf32>
    %116 = tpu.matmul %114, %115, %cst_111 {dimension_numbers = #tpu.dot_dimension_numbers<[1], [0], [0], [1], [0, 0, 1, 1], [], []>} : vector<128x128xbf16>, vector<128x128xbf16>, vector<128x128xf32> -> vector<128x128xf32>
    %cst_112 = arith.constant dense<0.000000e+00> : vector<128xf32>
    %117 = vector.multi_reduction <add>, %116, %cst_112 [0] : vector<128x128xf32> to vector<128xf32>
    %118 = vector.shape_cast %117 : vector<128xf32> to vector<1x128xf32>
    %cst_113 = arith.constant 7.812500e-03 : f32
    %119 = vector.broadcast %cst_113 : f32 to vector<1x128xf32>
    %120 = arith.mulf %118, %119 : vector<1x128xf32>
    %121 = vector.broadcast %120 : vector<1x128xf32> to vector<128x128xf32>
    %122 = arith.subf %116, %121 : vector<128x128xf32>
    %123 = arith.mulf %122, %122 : vector<128x128xf32>
    %cst_114 = arith.constant dense<0.000000e+00> : vector<128xf32>
    %124 = vector.multi_reduction <add>, %123, %cst_114 [0] : vector<128x128xf32> to vector<128xf32>
    %125 = vector.shape_cast %124 : vector<128xf32> to vector<1x128xf32>
    %cst_115 = arith.constant 7.812500e-03 : f32
    %126 = vector.broadcast %cst_115 : f32 to vector<1x128xf32>
    %127 = arith.mulf %125, %126 : vector<1x128xf32>
    %c0_116 = arith.constant 0 : index
    %c0_117 = arith.constant 0 : index
    %128 = vector.load %arg8[%c0_116, %c0_117] : memref<1x128xf32, #tpu.memory_space<vmem>>, vector<1x128xf32>
    %cst_118 = arith.constant 9.99999974E-6 : f32
    %129 = vector.broadcast %cst_118 : f32 to vector<1x128xf32>
    %130 = arith.addf %127, %129 : vector<1x128xf32>
    %131 = math.rsqrt %130 : vector<1x128xf32>
    %132 = arith.mulf %128, %131 : vector<1x128xf32>
    %133 = vector.broadcast %132 : vector<1x128xf32> to vector<128x128xf32>
    %134 = arith.mulf %122, %133 : vector<128x128xf32>
    %c0_119 = arith.constant 0 : index
    %c0_120 = arith.constant 0 : index
    %135 = vector.load %arg9[%c0_119, %c0_120] : memref<1x128xf32, #tpu.memory_space<vmem>>, vector<1x128xf32>
    %136 = vector.broadcast %135 : vector<1x128xf32> to vector<128x128xf32>
    %137 = arith.addf %134, %136 : vector<128x128xf32>
    %c0_121 = arith.constant 0 : index
    %c0_122 = arith.constant 0 : index
    %138 = vector.load %arg0[%c0_121, %c0_122] : memref<128x128xf32, #tpu.memory_space<vmem>>, vector<128x128xf32>
    %139 = arith.addf %137, %138 : vector<128x128xf32>
    %cst_123 = arith.constant 0.000000e+00 : f32
    %140 = vector.broadcast %cst_123 : f32 to vector<128x128xf32>
    %141 = arith.maximumf %139, %140 : vector<128x128xf32>
    %c0_124 = arith.constant 0 : index
    %c0_125 = arith.constant 0 : index
    %142 = vector.load %arg10[%c0_124, %c0_125] : memref<128x128xf32, #tpu.memory_space<vmem>>, vector<128x128xf32>
    tpu.vector_store %arg10[%c0_124, %c0_125], %141 {strides = array<i32>} : memref<128x128xf32, #tpu.memory_space<vmem>>, vector<128x128xf32>,
    return
  }
}

</mosaic_0001>

<bundles_post_ra>
// kernel: tpu_custom_call.1
= control target key start
LH: loop header
LB: loop body
LE: loop exit
PB: predicated region body
PF: predicated region fallthrough
CT: control target
= control target key end

     0   :  { %15 = vsyncpa [#allocation4], 0  ;;  %s7075_s0 = inlined_call_operand.hbm [shape: f32[128,128], index: 0, kind: input, shape index: {}]   ;;  %s7076_s1 = inlined_call_operand.hbm [shape: bf16[128,128], index: 1, kind: input, shape index: {}]   ;;  %s7077_s2 = inlined_call_operand.hbm [shape: bf16[9,128,128], index: 2, kind: input, shape index: {}]   ;;  %s7078_s3 = inlined_call_operand.hbm [shape: bf16[128,128], index: 3, kind: input, shape index: {}]   ;;  %s7079_s4 = inlined_call_operand.vmem [shape: f32[1,128], index: 4, kind: input, shape index: {}]   ;;  %s7080_s5 = inlined_call_operand.vmem [shape: f32[1,128], index: 5, kind: input, shape index: {}]   ;;  %s7081_s6 = inlined_call_operand.vmem [shape: f32[1,128], index: 6, kind: input, shape index: {}]   ;;  %s7082_s7 = inlined_call_operand.vmem [shape: f32[1,128], index: 7, kind: input, shape index: {}]   ;;  %s7083_s8 = inlined_call_operand.vmem [shape: f32[1,128], index: 8, kind: input, shape index: {}]   ;;  %s7084_s9 = inlined_call_operand.vmem [shape: f32[1,128], index: 9, kind: input, shape index: {}]   ;;  %s7085_s10 = inlined_call_operand.hbm [shape: f32[128,128], index: 10, kind: output, shape index: {}]  }
   0x1   :  { %16 = vsyncpa [#allocation7], 0 }
   0x2   :  { %17 = vsyncpa [#allocation10], 0 }
   0x3   :  { %18 = vsyncpa [#allocation5], 0  ;;  %s5425_s13 = smov [#allocation6]  }
   0x4   :  { %s36_s14 = sshll.u32 %s5425_s13, 4  ;;  %s37_s14 = int_to_ptr.vmem [resolvable:$true] %s36_s14 }
   0x5   :  { %s5325_s15 = scalar_lea.vmem %s37_s14, 1024  ;;  %p5330_p1 = scmp.lt.s32.totalorder %s37_s14, %s37_s14 }
   0x6   :  { %p5326_p0 = scmp.ne.s32.totalorder %s37_s14, %s5325_s15  ;;  %p5331_p2 = scmp.lt.s32.totalorder %s5325_s15, %s5325_s15 }
   0x8   :  { %p5332_p3 = por %p5331_p2, %p5330_p1 }
   0xa   :  { %p5333_p4 = pnand %p5332_p3, %p5326_p0 }
   0xc   :  { %5336 = shalt.err (!%p5333_p4)
}
   0xd   :  { %s5426_s16 = smov 64   ;;  %s5427_s17 = smov 4  }
   0xe   :  { %42 = dma.hbm_to_vmem [thread:$0]  %s7076_s1, 1024, %s37_s14, [#allocation7], %s5426_s16, %s5426_s16, %s5427_s17  }
   0xf   :  { %s5428_s20 = smov [#allocation3]  }
  0x10   :  { %s24_s21 = sshll.u32 %s5428_s20, 4  ;;  %s25_s21 = int_to_ptr.vmem [resolvable:$true] %s24_s21 }
  0x11   :  { %s5345_s22 = scalar_lea.vmem %s25_s21, 2048  ;;  %p5350_p6 = scmp.lt.s32.totalorder %s25_s21, %s25_s21 }
  0x12   :  { %p5346_p5 = scmp.ne.s32.totalorder %s25_s21, %s5345_s22  ;;  %p5351_p7 = scmp.lt.s32.totalorder %s5345_s22, %s5345_s22 }
  0x14   :  { %p5352_p8 = por %p5351_p7, %p5350_p6 }
  0x16   :  { %p5353_p9 = pnand %p5352_p8, %p5346_p5 }
  0x18   :  { %5356 = shalt.err (!%p5353_p9)
}
  0x19   :  { %s5429_s23 = smov 128   ;;  %s5430_s24 = smov 8  }
  0x1a   :  { %30 = dma.hbm_to_vmem [thread:$0]  %s7075_s0, 2048, %s25_s21, [#allocation4], %s5429_s23, %s5429_s23, %s5430_s24  }
  0x1b   :  { %s5431_s1 = smov [#allocation8]   ;;  %s5432_s28 = smov [#allocation9]  }
  0x1c   :  { %s48_s27 = sshll.u32 %s5431_s1, 4  ;;  %s60_s29 = sshll.u32 %s5432_s28, 4  ;;  %s49_s27 = int_to_ptr.vmem [resolvable:$true] %s48_s27  ;;  %s61_s29 = int_to_ptr.vmem [resolvable:$true] %s60_s29 }
  0x1d   :  { %s5365_s30 = scalar_lea.vmem %s49_s27, 9216  ;;  %p5370_p11 = scmp.lt.s32.totalorder %s49_s27, %s49_s27 }
  0x1e   :  { %p5366_p10 = scmp.ne.s32.totalorder %s49_s27, %s5365_s30  ;;  %p5371_p12 = scmp.lt.s32.totalorder %s5365_s30, %s5365_s30 }
  0x20   :  { %p5372_p13 = por %p5371_p12, %p5370_p11 }
  0x22   :  { %p5373_p0 = pnand %p5372_p13, %p5366_p10 }
  0x24   :  { %5376 = shalt.err (!%p5373_p0)
}
  0x25   :  { %54 = dma.hbm_to_vmem [thread:$0]  %s7077_s2, 9216, %s49_s27, [#allocation7], %s5426_s16, %s5426_s16, %s5427_s17  }
  0x26   :  { %s5385_s0 = scalar_lea.vmem %s61_s29, 1024  ;;  %p5390_p2 = scmp.lt.s32.totalorder %s61_s29, %s61_s29 }
  0x27   :  { %p5386_p1 = scmp.ne.s32.totalorder %s61_s29, %s5385_s0  ;;  %p5391_p3 = scmp.lt.s32.totalorder %s5385_s0, %s5385_s0 }
  0x29   :  { %p5392_p4 = por %p5391_p3, %p5390_p2 }
  0x2b   :  { %p5393_p5 = pnand %p5392_p4, %p5386_p1 }
  0x2d   :  { %5396 = shalt.err (!%p5393_p5)
}
  0x2e   :  { %66 = dma.hbm_to_vmem [thread:$0]  %s7078_s3, 1024, %s61_s29, [#allocation10], %s5426_s16, %s5426_s16, %s5427_s17  }
  0x2f   :  { %5417 = dma.done.wait [#allocation4], 2048  }
  0x30   :  { %5418 = vsyncadd [#allocation4], 4294965248 }
  0x31   :  { %5419 = dma.done.wait [#allocation7], 10240  }
  0x32   :  { %5420 = vsyncadd [#allocation7], 4294957056 }
  0x33   :  { %5421 = dma.done.wait [#allocation10], 1024  }
  0x34   :  { %5422 = vsyncadd [#allocation10], 4294966272  ;;  %v5198_v0 = vld [vmem:[#allocation6 + $0x38] sm:$0xff]   ;;  %v5199_v1 = vld [vmem:[#allocation6 + $0x30] sm:$0xff]   ;;  %vm627_vm0 = vcmask 1043456   ;;  %vm633_vm2 = vcmask 1040384  }
  0x35   :  { %4820 = vmatprep.subr.bf16.mxu0 %v5198_v0  ;;  %v5200_v2 = vld [vmem:[#allocation6 + $0x28] sm:$0xff]   ;;  %v5201_v3 = vld [vmem:[#allocation6 + $0x20] sm:$0xff]   ;;  %v5202_v7 = vld [vmem:[#allocation6 + $0x18] sm:$0xff]   ;;  %vm628_vm1 = vsmask.f32 7938  ;;  %vm1545_vm10 = vcmask 1042432  }
  0x36   :  { %4821 = vmatpush3.bf16.msra.mxu0 %v5198_v0  ;;  %v92_v4 = vld [vmem:[#allocation3] sm:$0xff]  ;;  %v93_v5 = vld [vmem:[#allocation3 + $0x8] sm:$0xff]  ;;  %v5203_v8 = vld [vmem:[#allocation6 + $0x10] sm:$0xff]   ;;  %vm634_vm3 = vsmask.f32 256  ;;  %vm1546_vm11 = vcmask 1046532  }
  0x37   :  { %4822 = vmatprep.subr.bf16.mxu0 %v5199_v1  ;;  %v108_v6 = vpack.c.bf16 %v93_v5, %v92_v4  ;;  %v5204_v9 = vld [vmem:[#allocation6 + $0x8] sm:$0xff]   ;;  %v5205_v10 = vld [vmem:[#allocation6] sm:$0xff]   ;;  %v94_v11 = vld [vmem:[#allocation3 + $0x10] sm:$0xff]  ;;  %vm883_vm7 = vsmask.f32 3328 }
  0x38   :  { %v95_v12 = vld [vmem:[#allocation3 + $0x18] sm:$0xff]  ;;  %v96_v13 = vld [vmem:[#allocation3 + $0x20] sm:$0xff]  ;;  %v97_v14 = vld [vmem:[#allocation3 + $0x28] sm:$0xff]  ;;  %vm884_vm8 = vsmask.f32 7440 }
  0x39   :  { %4836 = vmatprep.mubr.bf16.mxu0 %v108_v6  ;;  %v109_v15 = vpack.c.bf16 %v95_v12, %v94_v11  ;;  %v110_v16 = vpack.c.bf16 %v97_v14, %v96_v13  ;;  %v98_v17 = vld [vmem:[#allocation3 + $0x30] sm:$0xff]  ;;  %v99_v18 = vld [vmem:[#allocation3 + $0x38] sm:$0xff]  ;;  %v100_v19 = vld [vmem:[#allocation3 + $0x40] sm:$0xff] }
  0x3a   :  { %4823 = vmatpush3.bf16.msra.mxu0 %v5199_v1  ;;  %v101_v20 = vld [vmem:[#allocation3 + $0x48] sm:$0xff]  ;;  %v111_v21 = vpack.c.bf16 %v99_v18, %v98_v17  ;;  %v102_v23 = vld [vmem:[#allocation3 + $0x50] sm:$0xff]  ;;  %v103_v24 = vld [vmem:[#allocation3 + $0x58] sm:$0xff] }
  0x3b   :  { %4824 = vmatprep.subr.bf16.mxu0 %v5200_v2  ;;  %v112_v22 = vpack.c.bf16 %v101_v20, %v100_v19  ;;  %v104_v25 = vld [vmem:[#allocation3 + $0x60] sm:$0xff]  ;;  %v105_v26 = vld [vmem:[#allocation3 + $0x68] sm:$0xff]  ;;  %v113_v27 = vpack.c.bf16 %v103_v24, %v102_v23  ;;  %v106_v29 = vld [vmem:[#allocation3 + $0x70] sm:$0xff] }
  0x3c   :  { %v114_v28 = vpack.c.bf16 %v105_v26, %v104_v25  ;;  %v107_v30 = vld [vmem:[#allocation3 + $0x78] sm:$0xff]  ;;  %v5207_v1 = vld [vmem:[#allocation8 + $0x30] sm:$0xff]   ;;  %v5209_v5 = vld [vmem:[#allocation8 + $0x28] sm:$0xff]  }
  0x3d   :  { %v115_v31 = vpack.c.bf16 %v107_v30, %v106_v29  ;;  %v5206_v57 = vld [vmem:[#allocation8 + $0x38] sm:$0xff]   ;;  %v5210_v6 = vld [vmem:[#allocation8 + $0x70] sm:$0xff]   ;;  %v5214_v14 = vld [vmem:[#allocation8 + $0x60] sm:$0xff]  }
  0x3e   :  { %4825 = vmatpush3.bf16.msra.mxu0 %v5200_v2  ;;  %v5208_v4 = vld [vmem:[#allocation8 + $0x78] sm:$0xff]   ;;  %v5215_v18 = vld [vmem:[#allocation8 + $0x10] sm:$0xff]   ;;  %v5217_v23 = vld [vmem:[#allocation8 + $0x8] sm:$0xff]  }
  0x3f   :  { %4826 = vmatprep.subr.bf16.mxu0 %v5201_v3  ;;  %4852 = vmatprep.subr.bf16.mxu1 %v5208_v4  ;;  %v5213_v11 = vld [vmem:[#allocation8 + $0x18] sm:$0xff]   ;;  %v5218_v25 = vld [vmem:[#allocation8 + $0x50] sm:$0xff]   ;;  %v5219_v26 = vld [vmem:[#allocation8] sm:$0xff]  }
  0x40   :  { %4853 = vmatpush3.bf16.msra.mxu1 %v5208_v4  ;;  %v5216_v19 = vld [vmem:[#allocation8 + $0x58] sm:$0xff]   ;;  %vm5809_vm4 = vmand %vm627_vm0, %vm628_vm1 }
  0x41   :  { %4854 = vmatprep.subr.bf16.mxu1 %v5210_v6  ;;  %vm5822_vm5 = vmand %vm633_vm2, %vm634_vm3 }
  0x42   :  { %4827 = vmatpush3.bf16.msra.mxu0 %v5201_v3  ;;  %vm5940_vm6 = vmand %vm633_vm2, %vm628_vm1 }
  0x43   :  { %4828 = vmatprep.subr.bf16.mxu0 %v5202_v7  ;;  %vm6023_vm9 = vmor %vm883_vm7, %vm884_vm8 }
  0x44   :  { %4855 = vmatpush3.bf16.msra.mxu1 %v5210_v6  ;;  %vm6211_vm12 = vmor %vm1545_vm10, %vm1546_vm11 }
  0x46   :  { %4829 = vmatpush3.bf16.msra.mxu0 %v5202_v7 }
  0x47   :  { %4830 = vmatprep.subr.bf16.mxu0 %v5203_v8 }
  0x4a   :  { %4831 = vmatpush3.bf16.msra.mxu0 %v5203_v8  ;;  %v5211_v8 = vld [vmem:[#allocation8 + $0x20] sm:$0xff]  }
  0x4b   :  { %4832 = vmatprep.subr.bf16.mxu0 %v5204_v9 }
  0x4e   :  { %4833 = vmatpush3.bf16.msra.mxu0 %v5204_v9 }
  0x4f   :  { %4834 = vmatprep.subr.bf16.mxu0 %v5205_v10 }
  0x52   :  { %4835 = vmatpush3.bf16.msra.mxu0 %v5205_v10  ;;  %v5212_v10 = vld [vmem:[#allocation8 + $0x68] sm:$0xff]  }
  0x53   :  { %4884 = vmatprep.subr.bf16.mxu0 %v5206_v57  ;;  %4856 = vmatprep.subr.bf16.mxu1 %v5212_v10 }
  0x54   :  { %4857 = vmatpush3.bf16.msra.mxu1 %v5212_v10 }
  0x55   :  { %4837 = vmatmul.mubr.bf16.vlgmr.msra.gmra.mxu0 %v109_v15  ;;  %v5433_v15 = vmov 0   ;;  %4858 = vmatprep.subr.bf16.mxu1 %v5214_v14 }
  0x56   :  { %4840 = vmatprep.mubr.bf16.mxu0 %v110_v16  ;;  %4885 = vmatpush3.bf16.msra.mxu0 %v5206_v57  ;;  %729 = vst [vmem:[#allocation2] sm:$0xf] %v5433_v15  ;;  %730 = vst [vmem:[#allocation2 + $0x4] sm:$0x1] %v5433_v15 }
  0x57   :  { %4886 = vmatprep.subr.bf16.mxu0 %v5207_v1  ;;  %731 = vst [vmem:[#allocation2 + $0x50] sm:$0xf] %v5433_v15  ;;  %732 = vst [vmem:[#allocation2 + $0x54] sm:$0x1] %v5433_v15 }
  0x58   :  { %734 = vst [vmem:[#allocation2 + $0x48] sm:$0xf] %v5433_v15  ;;  %735 = vst [vmem:[#allocation2 + $0x4c] sm:$0x1] %v5433_v15  ;;  %4859 = vmatpush3.bf16.msra.mxu1 %v5214_v14 }
  0x59   :  { %736 = vst [vmem:[#allocation2 + $0x98] sm:$0xf] %v5433_v15  ;;  %737 = vst [vmem:[#allocation2 + $0x9c] sm:$0x1] %v5433_v15  ;;  %4860 = vmatprep.subr.bf16.mxu1 %v5216_v19 }
  0x5a   :  { %4887 = vmatpush3.bf16.msra.mxu0 %v5207_v1 }
  0x5b   :  { %4888 = vmatprep.subr.bf16.mxu0 %v5209_v5 }
  0x5c   :  { %4861 = vmatpush3.bf16.msra.mxu1 %v5216_v19 }
  0x5d   :  { %4841 = vmatmul.mubr.bf16.gmra.mxu0 %v111_v21  ;;  %4862 = vmatprep.subr.bf16.mxu1 %v5218_v25 }
  0x5e   :  { %4844 = vmatprep.mubr.bf16.mxu0 %v112_v22  ;;  %4889 = vmatpush3.bf16.msra.mxu0 %v5209_v5  ;;  %v5665_v19 = vld [vmem:[#allocation2 + $0x50] sm:$0xf] }
  0x5f   :  { %4890 = vmatprep.subr.bf16.mxu0 %v5211_v8 }
  0x60   :  { %4863 = vmatpush3.bf16.msra.mxu1 %v5218_v25  ;;  %v999_v25 = vshrl.u32 %v5665_v19, 16 }
  0x62   :  { %4891 = vmatpush3.bf16.msra.mxu0 %v5211_v8 }
  0x63   :  { %4892 = vmatprep.subr.bf16.mxu0 %v5213_v11 }
  0x65   :  { %4845 = vmatmul.mubr.bf16.gmra.mxu0 %v113_v27 }
  0x66   :  { %4848 = vmatprep.mubr.bf16.mxu0 %v114_v28  ;;  %4893 = vmatpush3.bf16.msra.mxu0 %v5213_v11 }
  0x67   :  { %4894 = vmatprep.subr.bf16.mxu0 %v5215_v18 }
  0x6a   :  { %4895 = vmatpush3.bf16.msra.mxu0 %v5215_v18  ;;  %v5663_v18 = vld [vmem:[#allocation2] sm:$0xf] }
  0x6b   :  { %4896 = vmatprep.subr.bf16.mxu0 %v5217_v23 }
  0x6d   :  { %4849 = vmatmul.mubr.bf16.gmra.mxu0 %v115_v31 }
  0x6e   :  { %4897 = vmatpush3.bf16.msra.mxu0 %v5217_v23  ;;  %v890_v23 = vshll.u32 %v5663_v18, 16 }
  0x6f   :  { %4898 = vmatprep.subr.bf16.mxu0 %v5219_v26 }
  0x72   :  { %4899 = vmatpush3.bf16.msra.mxu0 %v5219_v26  ;;  %v1002_v26 = vshll.u32 %v5665_v19, 16 }
 0x115   :  { %v5514_v32 = vpop.f32.mrf.mxu0 }
 0x117   :  { %v5516_v33 = vpop.f32.mrf.mxu0 }
 0x119   :  { %v5518_v34 = vpop.f32.mrf.mxu0 }
 0x11b   :  { %v5520_v35 = vpop.f32.mrf.mxu0 }
 0x11c   :  { %v277_v36 = vadd.f32 %v5520_v35, %v5516_v33 }
 0x11d   :  { %v5524_v37 = vpop.f32.mrf.mxu0 }
 0x11e   :  { %v278_v38 = vadd.f32 %v5514_v32, %v277_v36 }
 0x11f   :  { %v5527_v39 = vpop.f32.mrf.mxu0 }
 0x120   :  { %v279_v40 = vadd.f32 %v5518_v34, %v278_v38 }
 0x121   :  { %v5530_v41 = vpop.f32.mrf.mxu0 }
 0x122   :  { %v280_v42 = vadd.f32 %v279_v40, %v5527_v39 }
 0x123   :  { %v5533_v43 = vpop.f32.mrf.mxu0 }
 0x124   :  { %v281_v44 = vadd.f32 %v280_v42, %v5533_v43 }
 0x125   :  { %v5536_v45 = vpop.f32.mrf.mxu0 }
 0x126   :  { %v282_v46 = vadd.f32 %v5524_v37, %v281_v44 }
 0x127   :  { %v5539_v47 = vpop.f32.mrf.mxu0 }
 0x128   :  { %v283_v48 = vadd.f32 %v5530_v41, %v282_v46 }
 0x129   :  { %v5542_v49 = vpop.f32.mrf.mxu0 }
 0x12a   :  { %v284_v50 = vadd.f32 %v283_v48, %v5539_v47 }
 0x12b   :  { %v5545_v51 = vpop.f32.mrf.mxu0 }
 0x12c   :  { %v285_v52 = vadd.f32 %v284_v50, %v5545_v51 }
 0x12d   :  { %v5548_v53 = vpop.f32.mrf.mxu0 }
 0x12e   :  { %v286_v54 = vadd.f32 %v5536_v45, %v285_v52 }
 0x12f   :  { %v5551_v55 = vpop.f32.mrf.mxu0 }
 0x130   :  { %v287_v56 = vadd.f32 %v5542_v49, %v286_v54 }
 0x131   :  { %v5554_v58 = vpop.f32.mrf.mxu0 }
 0x132   :  { %v288_v59 = vadd.f32 %v287_v56, %v5551_v55  ;;  %v5228_v56 = vld [vmem:[#allocation8 + $0xb8] sm:$0xff]  }
 0x133   :  { %v5557_v60 = vpop.f32.mrf.mxu0 }
 0x134   :  { %v289_v61 = vadd.f32 %v288_v59, %v5557_v60 }
 0x136   :  { %v290_v62 = vadd.f32 %v5548_v53, %v289_v61 }
 0x138   :  { %v291_v63 = vadd.f32 %v5554_v58, %v290_v62 }
 0x13a   :  { %v292_v0 = vrot.slane %v291_v63, 4 }
 0x13c   :  { %v293_v2 = vadd.f32 %v292_v0, %v291_v63 }
 0x13e   :  { %v294_v3 = vrot.slane %v293_v2, 2 }
 0x140   :  { %v295_v7 = vadd.f32 %v294_v3, %v293_v2 }
 0x142   :  { %v296_v9 = vrot.slane %v295_v7, 1 }
 0x144   :  { %v297_v12 = vadd.f32 %v296_v9, %v295_v7 }
 0x146   :  { %v5562_v13 = vmul.f32 0.0078125, %v297_v12 }
 0x148   :  { %v5566_v16 = vsub.f32 %v5516_v33, %v5562_v13  ;;  %v5570_v17 = vsub.f32 %v5520_v35, %v5562_v13  ;;  %v5574_v20 = vsub.f32 %v5514_v32, %v5562_v13  ;;  %v5582_v24 = vsub.f32 %v5518_v34, %v5562_v13  ;;  %v5221_v33 = vld [vmem:[#allocation8 + $0x48] sm:$0xff]   ;;  %v5596_v34 = vld [vmem:[#allocation8 + $0xf8] sm:$0xff]  }
 0x149   :  { %v5586_v27 = vsub.f32 %v5527_v39, %v5562_v13  ;;  %v5592_v30 = vsub.f32 %v5533_v43, %v5562_v13  ;;  %v5600_v35 = vsub.f32 %v5524_v37, %v5562_v13  ;;  %v5606_v39 = vsub.f32 %v5530_v41, %v5562_v13  ;;  %4864 = vmatprep.subr.bf16.mxu1 %v5221_v33  ;;  %v5225_v43 = vld [vmem:[#allocation8 + $0x40] sm:$0xff]  }
 0x14a   :  { %v315_v21 = vmul.f32 %v5566_v16, %v5566_v16  ;;  %v316_v22 = vmul.f32 %v5570_v17, %v5570_v17  ;;  %v317_v28 = vmul.f32 %v5574_v20, %v5574_v20  ;;  %v318_v31 = vmul.f32 %v5582_v24, %v5582_v24  ;;  %4948 = vmatprep.subr.bf16.mxu0 %v5596_v34 }
 0x14b   :  { %v319_v36 = vmul.f32 %v5586_v27, %v5586_v27  ;;  %v320_v40 = vmul.f32 %v5592_v30, %v5592_v30  ;;  %v5613_v37 = vsub.f32 %v5539_v47, %v5562_v13  ;;  %v321_v44 = vmul.f32 %v5600_v35, %v5600_v35  ;;  %4865 = vmatpush3.bf16.msra.mxu1 %v5221_v33 }
 0x14c   :  { %v331_v29 = vadd.f32 %v316_v22, %v315_v21  ;;  %v5619_v41 = vsub.f32 %v5545_v51, %v5562_v13  ;;  %v322_v48 = vmul.f32 %v5606_v39, %v5606_v39  ;;  %4866 = vmatprep.subr.bf16.mxu1 %v5225_v43  ;;  %v5625_v52 = vsub.f32 %v5536_v45, %v5562_v13 }
 0x14d   :  { %v323_v47 = vmul.f32 %v5613_v37, %v5613_v37  ;;  %v5631_v57 = vsub.f32 %v5542_v49, %v5562_v13  ;;  %v5637_v61 = vsub.f32 %v5551_v55, %v5562_v13  ;;  %v5643_v63 = vsub.f32 %v5557_v60, %v5562_v13 }
 0x14e   :  { %v332_v32 = vadd.f32 %v331_v29, %v317_v28  ;;  %v324_v51 = vmul.f32 %v5619_v41, %v5619_v41  ;;  %v325_v45 = vmul.f32 %v5625_v52, %v5625_v52  ;;  %v5649_v1 = vsub.f32 %v5548_v53, %v5562_v13 }
 0x14f   :  { %4867 = vmatpush3.bf16.msra.mxu1 %v5225_v43  ;;  %v326_v49 = vmul.f32 %v5631_v57, %v5631_v57  ;;  %v327_v55 = vmul.f32 %v5637_v61, %v5637_v61  ;;  %v5655_v3 = vsub.f32 %v5554_v58, %v5562_v13  ;;  %v328_v60 = vmul.f32 %v5643_v63, %v5643_v63 }
 0x150   :  { %v333_v38 = vadd.f32 %v332_v32, %v318_v31  ;;  %4916 = vmatprep.subr.bf16.mxu1 %v5228_v56  ;;  %v329_v5 = vmul.f32 %v5649_v1, %v5649_v1  ;;  %v358_v21 = vlaneseq  ;;  %v887_v22 = vshrl.u32 %v5663_v18, 16  ;;  %v5684_v56 = vld [vmem:[#allocation2 + $0x50] sm:$0xe] }
 0x151   :  { %v330_v53 = vmul.f32 %v5655_v3, %v5655_v3  ;;  %v892_v31 = vrot.slane %v890_v23, 5  ;;  %v1001_v32 = vrot.slane %v999_v25, 4  ;;  %v1004_v33 = vrot.slane %v1002_v26, 5  ;;  %7094 = vst [vmem:[#allocation19_spill] sm:$0xff] %v5684_v56  ;;  %v684_v56 = vld [vmem:[#allocation2 + $0x5c] sm:$0x1] }
 0x152   :  { %v334_v42 = vadd.f32 %v333_v38, %v319_v36  ;;  %v359_v28 = vshrl.u32 %v358_v21, 7  ;;  %v889_v29 = vrot.slane %v887_v22, 4  ;;  %v353_v36 = vld [vmem:[%s7079_s4] sm:$0x1]  ;;  %v5674_v38 = vld [vmem:[#allocation2 + $0x4] sm:$0x1] }
 0x153   :  { %7091 = vst [vmem:[#allocation16_spill] sm:$0xff] %v5674_v38  ;;  %v896_v43 = vshll.u32 %v5674_v38, 16 }
 0x154   :  { %v335_v46 = vadd.f32 %v334_v42, %v320_v40  ;;  %v5676_v40 = vsub.s32 0, %v359_v28  ;;  %v893_v42 = vor.u32 %v892_v31, %v889_v29 }
 0x156   :  { %v336_v50 = vadd.f32 %v335_v46, %v321_v44  ;;  %7092 = vst [vmem:[#allocation17_spill] sm:$0xff] %v5676_v40  ;;  %v5679_v44 = vld [vmem:[#allocation2 + $0x54] sm:$0x1] }
 0x158   :  { %v337_v54 = vadd.f32 %v336_v50, %v322_v48  ;;  %v1005_v48 = vor.u32 %v1004_v33, %v1001_v32  ;;  %v1008_v50 = vshll.u32 %v5679_v44, 16 }
 0x15a   :  { %v338_v59 = vadd.f32 %v337_v54, %v323_v47  ;;  %v5682_v54 = vld [vmem:[#allocation2] sm:$0xe] }
 0x15b   :  { %7093 = vst [vmem:[#allocation18_spill] sm:$0xff] %v5682_v54 }
 0x15c   :  { %v339_v62 = vadd.f32 %v338_v59, %v324_v51  ;;  %v5687_v59 = vrot.slane %v893_v42, 4 }
 0x15e   :  { %v340_v0 = vadd.f32 %v339_v62, %v325_v45  ;;  %v5689_v45 = vrot.slane %v896_v43, 5 }
 0x160   :  { %v341_v2 = vadd.f32 %v340_v0, %v326_v49  ;;  %v5692_v49 = vrot.slane %v1005_v48, 4  ;;  %v5694_v0 = vrot.slane %v1008_v50, 5 }
 0x162   :  { %v342_v4 = vadd.f32 %v341_v2, %v327_v55  ;;  %v648_v2 = vld [vmem:[#allocation2 + $0x1c] sm:$0x1] }
 0x164   :  { %v343_v6 = vadd.f32 %v342_v4, %v328_v60 }
 0x166   :  { %v344_v7 = vadd.f32 %v343_v6, %v329_v5 }
 0x168   :  { %v345_v8 = vadd.f32 %v344_v7, %v330_v53 }
 0x16a   :  { %v346_v9 = vrot.slane %v345_v8, 4 }
 0x16c   :  { %v347_v10 = vadd.f32 %v346_v9, %v345_v8 }
 0x16e   :  { %v348_v11 = vrot.slane %v347_v10, 2 }
 0x170   :  { %v349_v12 = vadd.f32 %v348_v11, %v347_v10  ;;  %v4409_v10 = vld [vmem:[%s7080_s5] ss:$0 sm:$0xff] }
 0x172   :  { %v350_v14 = vrot.slane %v349_v12, 1 }
 0x174   :  { %v351_v58 = vadd.f32 %v350_v14, %v349_v12 }
 0x176   :  { %v352_v13 = vmul.f32 0.0078125, %v351_v58 }
 0x178   :  { %v354_v15 = vadd.f32 1e-05, %v352_v13 }
 0x17a   :  { %5310 = vrsqrt.f32 %v354_v15 }
 0x187   :  { %v5311_v46 = vpop.eup %5310 }
 0x188   :  { %v356_v47 = vmul.f32 %v5311_v46, %v353_v36 }
 0x18a   :  { %v361_v51 = vrot.slane %v356_v47, %v5676_v40 }
 0x18c   :  { %v363_v60 = vmul.f32 %v361_v51, %v5566_v16  ;;  %v364_v4 = vmul.f32 %v361_v51, %v5570_v17  ;;  %v365_v5 = vmul.f32 %v361_v51, %v5574_v20  ;;  %v366_v6 = vmul.f32 %v361_v51, %v5582_v24 }
 0x18d   :  { %v367_v53 = vmul.f32 %v361_v51, %v5586_v27  ;;  %v368_v7 = vmul.f32 %v361_v51, %v5592_v30  ;;  %v369_v8 = vmul.f32 %v361_v51, %v5600_v35  ;;  %v370_v9 = vmul.f32 %v361_v51, %v5606_v39 }
 0x18e   :  { %v371_v16 = vmul.f32 %v361_v51, %v5613_v37  ;;  %v372_v17 = vmul.f32 %v361_v51, %v5619_v41  ;;  %v373_v20 = vmul.f32 %v361_v51, %v5625_v52  ;;  %v374_v24 = vmul.f32 %v361_v51, %v5631_v57 }
 0x18f   :  { %v375_v27 = vmul.f32 %v361_v51, %v5637_v61  ;;  %v376_v30 = vmul.f32 %v361_v51, %v5643_v63  ;;  %v377_v35 = vmul.f32 %v361_v51, %v5649_v1  ;;  %v378_v39 = vmul.f32 %v361_v51, %v5655_v3 }
 0x190   :  { %v386_v11 = vadd.f32 %v4409_v10, %v363_v60  ;;  %v387_v12 = vadd.f32 %v4409_v10, %v364_v4  ;;  %v388_v14 = vadd.f32 %v4409_v10, %v365_v5  ;;  %v389_v58 = vadd.f32 %v4409_v10, %v366_v6 }
 0x191   :  { %v390_v13 = vadd.f32 %v4409_v10, %v367_v53  ;;  %v391_v37 = vadd.f32 %v4409_v10, %v368_v7  ;;  %v392_v15 = vadd.f32 %v4409_v10, %v369_v8  ;;  %v393_v41 = vadd.f32 %v4409_v10, %v370_v9 }
 0x192   :  { %v394_v21 = vadd.f32 %v4409_v10, %v371_v16  ;;  %v395_v52 = vadd.f32 %v4409_v10, %v372_v17  ;;  %v396_v22 = vadd.f32 %v4409_v10, %v373_v20  ;;  %v397_v57 = vadd.f32 %v4409_v10, %v374_v24 }
 0x193   :  { %v398_v23 = vadd.f32 %v4409_v10, %v375_v27  ;;  %v399_v61 = vadd.f32 %v4409_v10, %v376_v30  ;;  %v400_v25 = vadd.f32 %v4409_v10, %v377_v35  ;;  %v401_v63 = vadd.f32 %v4409_v10, %v378_v39 }
 0x194   :  { %v402_v26 = vmax.f32 %v386_v11, 0.0  ;;  %v403_v1 = vmax.f32 %v387_v12, 0.0  ;;  %v404_v28 = vmax.f32 %v388_v14, 0.0  ;;  %v405_v3 = vmax.f32 %v389_v58, 0.0 }
 0x195   :  { %v406_v29 = vmax.f32 %v390_v13, 0.0  ;;  %v407_v31 = vmax.f32 %v391_v37, 0.0  ;;  %v408_v32 = vmax.f32 %v392_v15, 0.0  ;;  %v409_v33 = vmax.f32 %v393_v41, 0.0 }
 0x196   :  { %v410_v36 = vmax.f32 %v394_v21, 0.0  ;;  %v411_v42 = vmax.f32 %v395_v52, 0.0  ;;  %v412_v43 = vmax.f32 %v396_v22, 0.0  ;;  %v413_v46 = vmax.f32 %v397_v57, 0.0 }
 0x197   :  { %v414_v48 = vmax.f32 %v398_v23, 0.0  ;;  %v415_v50 = vmax.f32 %v399_v61, 0.0  ;;  %v416_v47 = vmax.f32 %v400_v25, 0.0  ;;  %v417_v51 = vmax.f32 %v401_v63, 0.0 }
 0x198   :  { %v4628_v60 = vpack.c.bf16 %v402_v26, %v402_v26  ;;  %v4629_v4 = vpack.c.bf16 %v403_v1, %v403_v1  ;;  %v4630_v5 = vpack.c.bf16 %v404_v28, %v404_v28  ;;  %v4631_v6 = vpack.c.bf16 %v405_v3, %v405_v3 }
 0x199   :  { %v4632_v53 = vpack.c.bf16 %v406_v29, %v406_v29  ;;  %v4633_v7 = vpack.c.bf16 %v407_v31, %v407_v31  ;;  %v4634_v8 = vpack.c.bf16 %v408_v32, %v408_v32  ;;  %v4635_v9 = vpack.c.bf16 %v409_v33, %v409_v33  ;;  %v675_v32 = vld [vmem:[#allocation2 + $0x40] sm:$0xf]  ;;  %v678_v29 = vld [vmem:[#allocation2 + $0x44] sm:$0x1] }
 0x19a   :  { %v4636_v10 = vpack.c.bf16 %v410_v36, %v410_v36  ;;  %v5717_v16 = vpack.c.bf16 %v411_v42, %v411_v42  ;;  %v5719_v17 = vpack.c.bf16 %v412_v43, %v412_v43  ;;  %v5721_v20 = vpack.c.bf16 %v413_v46, %v413_v46 }
 0x19b   :  { %v5723_v24 = vpack.c.bf16 %v414_v48, %v414_v48  ;;  %v5725_v27 = vpack.c.bf16 %v415_v50, %v415_v50  ;;  %v5727_v30 = vpack.c.bf16 %v416_v47, %v416_v47  ;;  %v5729_v35 = vpack.c.bf16 %v417_v51, %v417_v51 }
 0x19c   :  { %v467_v39 = vshrl.u32 %v4628_v60, 16  ;;  %v470_v11 = vshll.u32 %v4628_v60, 16  ;;  %v475_v12 = vshrl.u32 %v4629_v4, 16  ;;  %v478_v14 = vshll.u32 %v4629_v4, 16  ;;  %v672_v60 = vld [vmem:[#allocation2 + $0x3c] sm:$0x1] }
 0x19d   :  { %v483_v58 = vshrl.u32 %v4630_v5, 16  ;;  %v486_v13 = vshll.u32 %v4630_v5, 16  ;;  %v491_v37 = vshrl.u32 %v4631_v6, 16  ;;  %v494_v15 = vshll.u32 %v4631_v6, 16 }
 0x19e   :  { %v5731_v41 = vrot.slane %v467_v39, 7  ;;  %v5733_v21 = vrot.slane %v475_v12, 7  ;;  %v499_v52 = vshrl.u32 %v4632_v53, 16  ;;  %v502_v22 = vshll.u32 %v4632_v53, 16 }
 0x19f   :  { %v5735_v57 = vrot.slane %v483_v58, 7  ;;  %v5737_v23 = vrot.slane %v491_v37, 7  ;;  %v507_v61 = vshrl.u32 %v4633_v7, 16  ;;  %v510_v25 = vshll.u32 %v4633_v7, 16 }
 0x1a0   :  { %v5740_v63 = vor.u32 %v470_v11, %v5731_v41  ;;  %v5744_v1 = vor.u32 %v478_v14, %v5733_v21  ;;  %v5755_v33 = vrot.slane %v499_v52, 7  ;;  %v515_v42 = vshrl.u32 %v4634_v8, 16 }
 0x1a1   :  { %v5748_v3 = vor.u32 %v486_v13, %v5735_v57  ;;  %v5752_v31 = vor.u32 %v494_v15, %v5737_v23  ;;  %v5757_v36 = vrot.slane %v507_v61, 7  ;;  %v518_v43 = vshll.u32 %v4634_v8, 16  ;;  %v681_v13 = vld [vmem:[#allocation2 + $0x58] sm:$0xf] }
 0x1a2   :  { %v523_v46 = vshrl.u32 %v4635_v9, 16  ;;  %v526_v48 = vshll.u32 %v4635_v9, 16  ;;  %v531_v50 = vshrl.u32 %v4636_v10, 16  ;;  %v534_v47 = vshll.u32 %v4636_v10, 16 }
 0x1a3   :  { %v5760_v51 = vor.u32 %v502_v22, %v5755_v33  ;;  %v5764_v4 = vor.u32 %v510_v25, %v5757_v36  ;;  %v5767_v6 = vrot.slane %v515_v42, 7  ;;  %v539_v8 = vshrl.u32 %v5717_v16, 16  ;;  %v639_v42 = vld [vmem:[#allocation2 + $0x10] sm:$0xf] }
 0x1a4   :  { %v5769_v53 = vrot.slane %v523_v46, 7  ;;  %v5771_v7 = vrot.slane %v531_v50, 7  ;;  %v542_v9 = vshll.u32 %v5717_v16, 16  ;;  %v547_v10 = vshrl.u32 %v5719_v17, 16  ;;  %v663_v50 = vld [vmem:[#allocation2 + $0x30] sm:$0xf] }
 0x1a5   :  { %v550_v39 = vshll.u32 %v5719_v17, 16  ;;  %v555_v11 = vshrl.u32 %v5721_v20, 16  ;;  %v5779_v12 = vor.u32 %v518_v43, %v5767_v6  ;;  %v5790_v15 = vrot.slane %v539_v8, 7  ;;  %v645_v8 = vld [vmem:[#allocation2 + $0x18] sm:$0xf] }
 0x1a6   :  { %v5783_v58 = vor.u32 %v526_v48, %v5769_v53  ;;  %v5787_v37 = vor.u32 %v534_v47, %v5771_v7  ;;  %v5792_v17 = vrot.slane %v547_v10, 7  ;;  %v558_v22 = vshll.u32 %v5721_v20, 16  ;;  %v642_v20 = vld [vmem:[#allocation2 + $0x14] sm:$0x1] }
 0x1a7   :  { %v5794_v52 = vrot.slane %v555_v11, 7  ;;  %v563_v61 = vshrl.u32 %v5723_v24, 16  ;;  %v566_v25 = vshll.u32 %v5723_v24, 16  ;;  %v5800_v43 = vor.u32 %v542_v9, %v5790_v15  ;;  %v654_v9 = vld [vmem:[#allocation2 + $0x24] sm:$0x1]  ;;  %v5245_v11 = vld [vmem:[#allocation8 + $0x88] sm:$0xff]  }
 0x1a8   :  { %v5804_v48 = vor.u32 %v550_v39, %v5792_v17  ;;  %v571_v39 = vshrl.u32 %v5725_v27, 16  ;;  %v574_v55 = vshll.u32 %v5725_v27, 16  ;;  %v579_v62 = vshrl.u32 %v5727_v30, 16  ;;  %v666_v46 = vld [vmem:[#allocation2 + $0x34] sm:$0x1] }
 0x1a9   :  { %v5814_v24 = vor.u32 %v558_v22, %v5794_v52  ;;  %v5817_v10 = vrot.slane %v563_v61, 7  ;;  %v582_v22 = vshll.u32 %v5727_v30, 16  ;;  %v587_v26 = vshrl.u32 %v5729_v35, 16  ;;  %v660_v61 = vld [vmem:[#allocation2 + $0x2c] sm:$0x1] }
 0x1aa   :  { %v5834_v14 = vrot.slane %v571_v39, 7  ;;  %v590_v5 = vshll.u32 %v5729_v35, 16  ;;  %v669_v27 = vld [vmem:[#allocation2 + $0x38] sm:$0xf]  ;;  %v5837_v30 = vrot.slane %v579_v62, 7  ;;  %v640_v40 = vsel %vm5809_vm4, %v5744_v1, %v639_v42 }
 0x1ab   :  { %v5831_v16 = vor.u32 %v566_v25, %v5817_v10  ;;  %v5839_v28 = vrot.slane %v587_v26, 7  ;;  %v7099_v25 = vrot.slane %v5733_v21, 4  ;;  %v687_v35 = vld [vmem:[#allocation2 + $0x60] sm:$0xf]  ;;  %v646_v26 = vsel %vm5809_vm4, %v5748_v3, %v645_v8  ;;  %v690_v1 = vld [vmem:[#allocation2 + $0x64] sm:$0x1] }
 0x1ac   :  { %v5849_v54 = vor.u32 %v574_v55, %v5834_v14  ;;  %v7100_v38 = vrot.slane %v5735_v57, 4  ;;  %v693_v42 = vld [vmem:[#allocation2 + $0x68] sm:$0xf]  ;;  %641 = vst [vmem:[#allocation2 + $0x10] sm:$0xf] %v640_v40  ;;  %v585_v55 = vrot.slane %v5837_v30, 4 }
 0x1ad   :  { %v643_v39 = vsel %vm5822_vm5, %v7099_v25, %v642_v20  ;;  %v5860_v20 = vor.u32 %v582_v22, %v5837_v30  ;;  %v5864_v25 = vor.u32 %v590_v5, %v5839_v28  ;;  %v593_v62 = vrot.slane %v5839_v28, 4  ;;  %v696_v3 = vld [vmem:[#allocation2 + $0x6c] sm:$0x1]  ;;  %v699_v57 = vld [vmem:[#allocation2 + $0x70] sm:$0xf] }
 0x1ae   :  { %v649_v21 = vsel %vm5822_vm5, %v7100_v38, %v648_v2  ;;  %644 = vst [vmem:[#allocation2 + $0x14] sm:$0x1] %v643_v39  ;;  %647 = vst [vmem:[#allocation2 + $0x18] sm:$0xf] %v646_v26  ;;  %v7101_v38 = vrot.slane %v5737_v23, 4  ;;  %v7102_v2 = vrot.slane %v5755_v33, 4  ;;  %v664_v5 = vsel %vm5809_vm4, %v5764_v4, %v663_v50 }
 0x1af   :  { %650 = vst [vmem:[#allocation2 + $0x1c] sm:$0x1] %v649_v21  ;;  %v7103_v22 = vrot.slane %v5757_v36, 4  ;;  %v702_v26 = vld [vmem:[#allocation2 + $0x74] sm:$0x1]  ;;  %v670_v33 = vsel %vm5809_vm4, %v5779_v12, %v669_v27  ;;  %v676_v36 = vsel %vm5809_vm4, %v5783_v58, %v675_v32 }
 0x1b0   :  { %v655_v40 = vsel %vm5822_vm5, %v7101_v38, %v654_v9  ;;  %v661_v8 = vsel %vm5822_vm5, %v7102_v2, %v660_v61  ;;  %v705_v21 = vld [vmem:[#allocation2 + $0x78] sm:$0xf]  ;;  %v708_v23 = vld [vmem:[#allocation2 + $0x7c] sm:$0x1]  ;;  %v7104_v9 = vrot.slane %v5767_v6, 4  ;;  %v682_v6 = vsel %vm5809_vm4, %v5787_v37, %v681_v13 }
 0x1b1   :  { %v667_v39 = vsel %vm5822_vm5, %v7103_v22, %v666_v46  ;;  %656 = vst [vmem:[#allocation2 + $0x24] sm:$0x1] %v655_v40  ;;  %662 = vst [vmem:[#allocation2 + $0x2c] sm:$0x1] %v661_v8  ;;  %v7105_v46 = vrot.slane %v5769_v53, 4  ;;  %v688_v53 = vsel %vm5809_vm4, %v5800_v43, %v687_v35  ;;  %v700_v37 = vsel %vm5809_vm4, %v5814_v24, %v699_v57  ;;  %v5258_v57 = vld [vmem:[#allocation8 + $0x128] sm:$0xff]  }
 0x1b2   :  { %668 = vst [vmem:[#allocation2 + $0x34] sm:$0x1] %v667_v39  ;;  %v673_v4 = vsel %vm5822_vm5, %v7104_v9, %v672_v60  ;;  %v711_v61 = vld [vmem:[#allocation2 + $0x80] sm:$0xf]  ;;  %v714_v38 = vld [vmem:[#allocation2 + $0x84] sm:$0x1] }
 0x1b3   :  { %v679_v50 = vsel %vm5822_vm5, %v7105_v46, %v678_v29  ;;  %v717_v40 = vld [vmem:[#allocation2 + $0x88] sm:$0xf]  ;;  %665 = vst [vmem:[#allocation2 + $0x30] sm:$0xf] %v664_v5  ;;  %674 = vst [vmem:[#allocation2 + $0x3c] sm:$0x1] %v673_v4 }
 0x1b4   :  { %680 = vst [vmem:[#allocation2 + $0x44] sm:$0x1] %v679_v50  ;;  %v7106_v60 = vrot.slane %v5771_v7, 4  ;;  %v7107_v29 = vrot.slane %v5790_v15, 4  ;;  %v720_v58 = vld [vmem:[#allocation2 + $0x8c] sm:$0x1] }
 0x1b5   :  { %v723_v27 = vld [vmem:[#allocation2 + $0x90] sm:$0xf]  ;;  %v726_v2 = vld [vmem:[#allocation2 + $0x94] sm:$0x1]  ;;  %671 = vst [vmem:[#allocation2 + $0x38] sm:$0xf] %v670_v33 }
 0x1b6   :  { %v685_v32 = vsel %vm5822_vm5, %v7106_v60, %v684_v56  ;;  %v691_v12 = vsel %vm5822_vm5, %v7107_v29, %v690_v1  ;;  %677 = vst [vmem:[#allocation2 + $0x40] sm:$0xf] %v676_v36  ;;  %683 = vst [vmem:[#allocation2 + $0x58] sm:$0xf] %v682_v6  ;;  %v694_v56 = vsel %vm5809_vm4, %v5804_v48, %v693_v42  ;;  %v7108_v7 = vrot.slane %v5792_v17, 4 }
 0x1b7   :  { %686 = vst [vmem:[#allocation2 + $0x5c] sm:$0x1] %v685_v32  ;;  %689 = vst [vmem:[#allocation2 + $0x60] sm:$0xf] %v688_v53  ;;  %v7109_v15 = vrot.slane %v5794_v52, 4  ;;  %v706_v17 = vsel %vm5809_vm4, %v5831_v16, %v705_v21  ;;  %v7110_v48 = vrot.slane %v5817_v10, 4  ;;  %v712_v52 = vsel %vm5809_vm4, %v5849_v54, %v711_v61 }
 0x1b8   :  { %692 = vst [vmem:[#allocation2 + $0x64] sm:$0x1] %v691_v12  ;;  %v697_v13 = vsel %vm5822_vm5, %v7108_v7, %v696_v3  ;;  %v630_v35 = vld [vmem:[#allocation2 + $0x8] sm:$0xf]  ;;  %v651_v1 = vld [vmem:[#allocation2 + $0x20] sm:$0xf]  ;;  %v718_v54 = vsel %vm5809_vm4, %v5860_v20, %v717_v40  ;;  %v724_v10 = vsel %vm5809_vm4, %v5864_v25, %v723_v27  ;;  %v727_v5 = vsel %vm5822_vm5, %v593_v62, %v726_v2 }
 0x1b9   :  { %v703_v43 = vsel %vm5822_vm5, %v7109_v15, %v702_v26  ;;  %v657_v8 = vld [vmem:[#allocation2 + $0x28] sm:$0xf]  ;;  %695 = vst [vmem:[#allocation2 + $0x68] sm:$0xf] %v694_v56  ;;  %698 = vst [vmem:[#allocation2 + $0x6c] sm:$0x1] %v697_v13  ;;  %v709_v24 = vsel %vm5822_vm5, %v7110_v48, %v708_v23  ;;  %v631_v30 = vsel %vm5809_vm4, %v5740_v63, %v630_v35 }
 0x1ba   :  { %701 = vst [vmem:[#allocation2 + $0x70] sm:$0xf] %v700_v37  ;;  %704 = vst [vmem:[#allocation2 + $0x74] sm:$0x1] %v703_v43  ;;  %v7111_v42 = vrot.slane %v5834_v14, 4  ;;  %v721_v14 = vsel %vm5822_vm5, %v585_v55, %v720_v58  ;;  %v652_v28 = vsel %vm5809_vm4, %v5752_v31, %v651_v1  ;;  %v658_v62 = vsel %vm5809_vm4, %v5760_v51, %v657_v8 }
 0x1bb   :  { %v636_v16 = vld [vmem:[#allocation2 + $0xc] sm:$0x1]  ;;  %707 = vst [vmem:[#allocation2 + $0x78] sm:$0xf] %v706_v17  ;;  %710 = vst [vmem:[#allocation2 + $0x7c] sm:$0x1] %v709_v24 }
 0x1bc   :  { %v715_v3 = vsel %vm5822_vm5, %v7111_v42, %v714_v38  ;;  %713 = vst [vmem:[#allocation2 + $0x80] sm:$0xf] %v712_v52  ;;  %v741_v22 = vld [vmem:[#allocation2 + $0x10] sm:$0x1]  ;;  %v790_v39 = vld [vmem:[#allocation2 + $0x14] sm:$0x1] }
 0x1bd   :  { %716 = vst [vmem:[#allocation2 + $0x84] sm:$0x1] %v715_v3  ;;  %719 = vst [vmem:[#allocation2 + $0x88] sm:$0xf] %v718_v54  ;;  %v742_v20 = vsel %vm5822_vm5, 0, %v741_v22  ;;  %v7114_v26 = vrot.slane %v5731_v41, 4 }
 0x1be   :  { %722 = vst [vmem:[#allocation2 + $0x8c] sm:$0x1] %v721_v14  ;;  %725 = vst [vmem:[#allocation2 + $0x90] sm:$0xf] %v724_v10  ;;  %v744_v55 = vld [vmem:[#allocation2 + $0x18] sm:$0x1] }
 0x1bf   :  { %728 = vst [vmem:[#allocation2 + $0x94] sm:$0x1] %v727_v5  ;;  %v793_v25 = vld [vmem:[#allocation2 + $0x1c] sm:$0x1]  ;;  %632 = vst [vmem:[#allocation2 + $0x8] sm:$0xf] %v631_v30  ;;  %v637_v21 = vsel %vm5822_vm5, %v7114_v26, %v636_v16 }
 0x1c0   :  { %743 = vst [vmem:[#allocation2 + $0x10] sm:$0x1] %v742_v20  ;;  %v745_v63 = vsel %vm5822_vm5, 0, %v744_v55  ;;  %653 = vst [vmem:[#allocation2 + $0x20] sm:$0xf] %v652_v28  ;;  %v791_v31 = vsel %vm5940_vm6, 0, %v790_v39 }
 0x1c1   :  { %659 = vst [vmem:[#allocation2 + $0x28] sm:$0xf] %v658_v62  ;;  %v794_v51 = vsel %vm5940_vm6, 0, %v793_v25  ;;  %v5979_v47 = vld [vmem:[#allocation2 + $0x10] sm:$0xe]  ;;  %v1582_v50 = vrot.slane %v5679_v44, 5 }
 0x1c2   :  { %746 = vst [vmem:[#allocation2 + $0x18] sm:$0x1] %v745_v63  ;;  %638 = vst [vmem:[#allocation2 + $0xc] sm:$0x1] %v637_v21  ;;  %v753_v23 = vld [vmem:[#allocation2 + $0x30] sm:$0x1] }
 0x1c3   :  { %792 = vst [vmem:[#allocation2 + $0x14] sm:$0x1] %v791_v31  ;;  %795 = vst [vmem:[#allocation2 + $0x1c] sm:$0x1] %v794_v51  ;;  %v796_v33 = vld [vmem:[#allocation2 + $0x24] sm:$0x1]  ;;  %v899_v51 = vsel %vm6023_vm9, %v5687_v59, %v5689_v45 }
 0x1c4   :  { %v799_v9 = vld [vmem:[#allocation2 + $0x2c] sm:$0x1]  ;;  %v754_v41 = vsel %vm5822_vm5, 0, %v753_v23  ;;  %v756_v4 = vld [vmem:[#allocation2 + $0x38] sm:$0x1]  ;;  %v797_v36 = vsel %vm5940_vm6, 0, %v796_v33 }
 0x1c5   :  { %v800_v46 = vsel %vm5940_vm6, 0, %v799_v9  ;;  %v811_v61 = vld [vmem:[#allocation2 + $0x5c] sm:$0x1]  ;;  %v814_v38 = vld [vmem:[#allocation2 + $0x64] sm:$0x1]  ;;  %v757_v40 = vsel %vm5822_vm5, 0, %v756_v4  ;;  %v1011_v9 = vsel %vm6023_vm9, %v5692_v49, %v5694_v0 }
 0x1c6   :  { %755 = vst [vmem:[#allocation2 + $0x30] sm:$0x1] %v754_v41  ;;  %798 = vst [vmem:[#allocation2 + $0x24] sm:$0x1] %v797_v36  ;;  %v4460_v6 = vrot.slane %v5979_v47, 9  ;;  %v812_v53 = vsel %vm5940_vm6, 0, %v811_v61 }
 0x1c7   :  { %801 = vst [vmem:[#allocation2 + $0x2c] sm:$0x1] %v800_v46  ;;  %v768_v60 = vld [vmem:[#allocation2 + $0x68] sm:$0x1]  ;;  %v771_v32 = vld [vmem:[#allocation2 + $0x70] sm:$0x1] }
 0x1c8   :  { %v815_v29 = vsel %vm5940_vm6, 0, %v814_v38  ;;  %758 = vst [vmem:[#allocation2 + $0x38] sm:$0x1] %v757_v40  ;;  %v769_v12 = vsel %vm5822_vm5, 0, %v768_v60  ;;  %v772_v58 = vsel %vm5822_vm5, 0, %v771_v32 }
 0x1c9   :  { %v774_v27 = vld [vmem:[#allocation2 + $0x78] sm:$0x1]  ;;  %v777_v2 = vld [vmem:[#allocation2 + $0x80] sm:$0x1]  ;;  %813 = vst [vmem:[#allocation2 + $0x5c] sm:$0x1] %v812_v53 }
 0x1ca   :  { %816 = vst [vmem:[#allocation2 + $0x64] sm:$0x1] %v815_v29  ;;  %770 = vst [vmem:[#allocation2 + $0x68] sm:$0x1] %v769_v12  ;;  %v775_v56 = vsel %vm5822_vm5, 0, %v774_v27  ;;  %v778_v7 = vsel %vm5822_vm5, 0, %v777_v2 }
 0x1cb   :  { %773 = vst [vmem:[#allocation2 + $0x70] sm:$0x1] %v772_v58  ;;  %v780_v13 = vld [vmem:[#allocation2 + $0x88] sm:$0x1]  ;;  %v783_v37 = vld [vmem:[#allocation2 + $0x90] sm:$0x1] }
 0x1cc   :  { %776 = vst [vmem:[#allocation2 + $0x78] sm:$0x1] %v775_v56  ;;  %779 = vst [vmem:[#allocation2 + $0x80] sm:$0x1] %v778_v7  ;;  %v781_v15 = vsel %vm5822_vm5, 0, %v780_v13  ;;  %v784_v43 = vsel %vm5822_vm5, 0, %v783_v37 }
 0x1cd   :  { %v817_v35 = vld [vmem:[#allocation2 + $0x6c] sm:$0x1]  ;;  %v820_v1 = vld [vmem:[#allocation2 + $0x74] sm:$0x1]  ;;  %782 = vst [vmem:[#allocation2 + $0x88] sm:$0x1] %v781_v15 }
 0x1ce   :  { %785 = vst [vmem:[#allocation2 + $0x90] sm:$0x1] %v784_v43  ;;  %v818_v8 = vsel %vm5940_vm6, 0, %v817_v35  ;;  %v821_v17 = vsel %vm5940_vm6, 0, %v820_v1  ;;  %v823_v48 = vld [vmem:[#allocation2 + $0x7c] sm:$0x1] }
 0x1cf   :  { %v826_v24 = vld [vmem:[#allocation2 + $0x84] sm:$0x1]  ;;  %819 = vst [vmem:[#allocation2 + $0x6c] sm:$0x1] %v818_v8  ;;  %822 = vst [vmem:[#allocation2 + $0x74] sm:$0x1] %v821_v17 }
 0x1d0   :  { %v824_v52 = vsel %vm5940_vm6, 0, %v823_v48  ;;  %v827_v42 = vsel %vm5940_vm6, 0, %v826_v24  ;;  %v829_v3 = vld [vmem:[#allocation2 + $0x8c] sm:$0x1]  ;;  %v832_v16 = vld [vmem:[#allocation2 + $0x94] sm:$0x1] }
 0x1d1   :  { %825 = vst [vmem:[#allocation2 + $0x7c] sm:$0x1] %v824_v52  ;;  %828 = vst [vmem:[#allocation2 + $0x84] sm:$0x1] %v827_v42  ;;  %v830_v54 = vsel %vm5940_vm6, 0, %v829_v3  ;;  %v833_v14 = vsel %vm5940_vm6, 0, %v832_v16 }
 0x1d2   :  { %v738_v10 = vld [vmem:[#allocation2 + $0x8] sm:$0x1]  ;;  %v6019_v5 = vld [vmem:[#allocation2 + $0x10] sm:$0xf]  ;;  %v6027_v39 = vld [vmem:[#allocation2 + $0x18] sm:$0xe] }
 0x1d3   :  { %831 = vst [vmem:[#allocation2 + $0x8c] sm:$0x1] %v830_v54  ;;  %834 = vst [vmem:[#allocation2 + $0x94] sm:$0x1] %v833_v14  ;;  %v739_v30 = vsel %vm5822_vm5, 0, %v738_v10  ;;  %v915_v28 = vshrl.u32 %v6019_v5, 16 }
 0x1d4   :  { %v6031_v20 = vld [vmem:[#allocation2 + $0x18] sm:$0xf]  ;;  %v747_v55 = vld [vmem:[#allocation2 + $0x20] sm:$0x1]  ;;  %740 = vst [vmem:[#allocation2 + $0x8] sm:$0x1] %v739_v30 }
 0x1d5   :  { %v748_v62 = vsel %vm5822_vm5, 0, %v747_v55  ;;  %v750_v25 = vld [vmem:[#allocation2 + $0x28] sm:$0x1]  ;;  %v787_v63 = vld [vmem:[#allocation2 + $0xc] sm:$0x1]  ;;  %v918_v26 = vshll.u32 %v6019_v5, 16  ;;  %v4443_v29 = vcombine.low %v6019_v5, %v6031_v20 }
 0x1d6   :  { %749 = vst [vmem:[#allocation2 + $0x20] sm:$0x1] %v748_v62  ;;  %v751_v21 = vsel %vm5822_vm5, 0, %v750_v25  ;;  %v788_v31 = vsel %vm5940_vm6, 0, %v787_v63  ;;  %v6045_v23 = vld [vmem:[#allocation2 + $0x30] sm:$0xf] }
 0x1d7   :  { %v6047_v33 = vld [vmem:[#allocation2 + $0x38] sm:$0xf]  ;;  %752 = vst [vmem:[#allocation2 + $0x28] sm:$0x1] %v751_v21  ;;  %789 = vst [vmem:[#allocation2 + $0xc] sm:$0x1] %v788_v31 }
 0x1d8   :  { %v971_v41 = vshrl.u32 %v6045_v23, 16  ;;  %v974_v4 = vshll.u32 %v6045_v23, 16  ;;  %v985_v36 = vshrl.u32 %v6047_v33, 16  ;;  %v988_v46 = vshll.u32 %v6047_v33, 16  ;;  %v6057_v61 = vld [vmem:[#allocation2 + $0x14] sm:$0x1] }
 0x1d9   :  { %v6059_v38 = vld [vmem:[#allocation2 + $0x1c] sm:$0x1]  ;;  %v917_v40 = vrot.slane %v915_v28, 4  ;;  %v920_v60 = vrot.slane %v918_v26, 5  ;;  %v924_v32 = vshll.u32 %v6057_v61, 16  ;;  %v4461_v53 = vrot.slane %v6027_v39, 9 }
 0x1da   :  { %v6065_v12 = vrot.slane %v971_v41, 4  ;;  %v6067_v58 = vrot.slane %v974_v4, 5  ;;  %v6069_v27 = vrot.slane %v985_v36, 4  ;;  %v762_v2 = vld [vmem:[#allocation2 + $0x58] sm:$0x1]  ;;  %v6071_v56 = vrot.slane %v988_v46, 5 }
 0x1db   :  { %v921_v7 = vor.u32 %v920_v60, %v917_v40  ;;  %v929_v13 = vshrl.u32 %v6031_v20, 16  ;;  %v932_v37 = vshll.u32 %v6031_v20, 16  ;;  %v6075_v15 = vld [vmem:[#allocation2 + $0x24] sm:$0x1]  ;;  %v926_v43 = vrot.slane %v924_v32, 5  ;;  %v5226_v54 = vld [vmem:[#allocation8 + $0xf0] sm:$0xff]  }
 0x1dc   :  { %v938_v35 = vshll.u32 %v6059_v38, 16  ;;  %v1558_v1 = vrot.slane %v6057_v61, 5  ;;  %v763_v8 = vsel %vm5822_vm5, 0, %v762_v2  ;;  %v836_v17 = vld [vmem:[#allocation2 + $0x8] sm:$0xf]  ;;  %v952_v42 = vshll.u32 %v6075_v15, 16 }
 0x1dd   :  { %v922_v48 = vrot.slane %v921_v7, 4  ;;  %v931_v24 = vrot.slane %v929_v13, 4  ;;  %v934_v52 = vrot.slane %v932_v37, 5  ;;  %764 = vst [vmem:[#allocation2 + $0x58] sm:$0x1] %v763_v8  ;;  %v4442_v3 = vcombine.low %v5663_v18, %v836_v17  ;;  %v5229_v13 = vld [vmem:[#allocation8 + $0xe8] sm:$0xff]  }
 0x1de   :  { %v839_v16 = vld [vmem:[#allocation2 + $0x20] sm:$0xf]  ;;  %v901_v14 = vshrl.u32 %v836_v17, 16  ;;  %v904_v10 = vshll.u32 %v836_v17, 16  ;;  %v940_v5 = vrot.slane %v938_v35, 5  ;;  %v4445_v62 = vcombine.low %v6045_v23, %v6047_v33 }
 0x1df   :  { %v840_v30 = vld [vmem:[#allocation2 + $0x28] sm:$0xf]  ;;  %v943_v20 = vshrl.u32 %v839_v16, 16  ;;  %v946_v55 = vshll.u32 %v839_v16, 16  ;;  %v6083_v28 = vld [vmem:[#allocation2 + $0xc] sm:$0x1]  ;;  %v935_v25 = vor.u32 %v934_v52, %v931_v24  ;;  %4900 = vmatprep.mubr.bf16.mxu0 %v4442_v3  ;;  %v927_v23 = vsel %vm6023_vm9, %v922_v48, %v926_v43 }
 0x1e0   :  { %v957_v63 = vshrl.u32 %v840_v30, 16  ;;  %v960_v26 = vshll.u32 %v840_v30, 16  ;;  %v4444_v21 = vcombine.low %v839_v16, %v840_v30  ;;  %v903_v31 = vrot.slane %v901_v14, 4  ;;  %v6087_v18 = vld [vmem:[#allocation2 + $0x2c] sm:$0x1]  ;;  %4901 = vmatmul.mubr.bf16.vlgmr.msra.gmra.mxu0 %v4443_v29 }
 0x1e1   :  { %v945_v41 = vrot.slane %v943_v20, 4  ;;  %v948_v4 = vrot.slane %v946_v55, 5  ;;  %v906_v36 = vrot.slane %v904_v10, 5  ;;  %v910_v46 = vshll.u32 %v6083_v28, 16  ;;  %v765_v40 = vld [vmem:[#allocation2 + $0x60] sm:$0x1]  ;;  %4949 = vmatpush3.bf16.msra.mxu0 %v5596_v34 }
 0x1e2   :  { %v959_v60 = vrot.slane %v957_v63, 4  ;;  %v962_v32 = vrot.slane %v960_v26, 5  ;;  %4904 = vmatprep.mubr.bf16.mxu0 %v4444_v21  ;;  %v936_v33 = vrot.slane %v935_v25, 4  ;;  %4950 = vmatprep.subr.bf16.mxu0 %v5226_v54  ;;  %v954_v37 = vrot.slane %v952_v42, 5  ;;  %v6098_v52 = vld [vmem:[#allocation2 + $0x68] sm:$0xf] }
 0x1e3   :  { %v907_v2 = vor.u32 %v906_v36, %v903_v31  ;;  %v912_v7 = vrot.slane %v910_v46, 5  ;;  %v949_v29 = vor.u32 %v948_v4, %v945_v41  ;;  %v966_v24 = vshll.u32 %v6087_v18, 16  ;;  %v802_v14 = vld [vmem:[#allocation2 + $0x34] sm:$0x1]  ;;  %v805_v20 = vld [vmem:[#allocation2 + $0x3c] sm:$0x1] }
 0x1e4   :  { %v941_v35 = vsel %vm6023_vm9, %v936_v33, %v940_v5  ;;  %v844_v8 = vld [vmem:[#allocation2 + $0x58] sm:$0xf]  ;;  %v963_v17 = vor.u32 %v962_v32, %v959_v60  ;;  %v766_v34 = vsel %vm5822_vm5, 0, %v765_v40  ;;  %v1041_v26 = vshrl.u32 %v6098_v52, 16  ;;  %v6104_v21 = vld [vmem:[#allocation2 + $0x70] sm:$0xf] }
 0x1e5   :  { %v908_v43 = vrot.slane %v907_v2, 4  ;;  %v4427_v48 = vcombine.low %v927_v23, %v941_v35  ;;  %v1013_v3 = vshrl.u32 %v844_v8, 16  ;;  %v1016_v16 = vshll.u32 %v844_v8, 16  ;;  %767 = vst [vmem:[#allocation2 + $0x60] sm:$0x1] %v766_v34  ;;  %4951 = vmatpush3.bf16.msra.mxu0 %v5226_v54  ;;  %v5231_v41 = vld [vmem:[#allocation8 + $0xb0] sm:$0xff]  }
 0x1e6   :  { %v4446_v42 = vcombine.low %v5665_v19, %v844_v8  ;;  %v950_v10 = vrot.slane %v949_v29, 4  ;;  %v964_v5 = vrot.slane %v963_v17, 4  ;;  %v968_v30 = vrot.slane %v966_v24, 5  ;;  %4952 = vmatprep.subr.bf16.mxu0 %v5229_v13  ;;  %v5232_v4 = vld [vmem:[#allocation8 + $0xe0] sm:$0xff]   ;;  %v6116_v46 = vld [vmem:[#allocation2 + $0x78] sm:$0xf] }
 0x1e7   :  { %v913_v55 = vsel %vm6023_vm9, %v908_v43, %v912_v7  ;;  %v1015_v25 = vrot.slane %v1013_v3, 4  ;;  %v1018_v63 = vrot.slane %v1016_v16, 5  ;;  %v1044_v36 = vshll.u32 %v6098_v52, 16  ;;  %v6124_v32 = vld [vmem:[#allocation8 + $0xd8] sm:$0xff]   ;;  %v6135_v29 = vld [vmem:[#allocation8 + $0xa8] sm:$0xff]  }
 0x1e8   :  { %v4426_v19 = vcombine.low %v899_v51, %v913_v55  ;;  %v955_v54 = vsel %vm6023_vm9, %v950_v10, %v954_v37  ;;  %v969_v31 = vsel %vm6023_vm9, %v964_v5, %v968_v30  ;;  %v1554_v40 = vrot.slane %v6083_v28, 5  ;;  %4905 = vmatmul.mubr.bf16.gmra.mxu0 %v4445_v62  ;;  %v6139_v8 = vld [vmem:[#allocation2 + $0x5c] sm:$0x1]  ;;  %v6146_v24 = vld [vmem:[#allocation2 + $0x80] sm:$0xf]  ;;  %v5238_v30 = vld [vmem:[#allocation8 + $0xd0] sm:$0xff]  }
 0x1e9   :  { %v1562_v60 = vrot.slane %v6059_v38, 5  ;;  %v803_v59 = vsel %vm5940_vm6, 0, %v802_v14  ;;  %v806_v45 = vsel %vm5940_vm6, 0, %v805_v20  ;;  %4908 = vmatprep.mubr.bf16.mxu0 %v4446_v42  ;;  %v4428_v51 = vcombine.low %v955_v54, %v969_v31  ;;  %4953 = vmatpush3.bf16.msra.mxu0 %v5229_v13  ;;  %v6152_v16 = vld [vmem:[#allocation2 + $0x88] sm:$0xf] }
 0x1ea   :  { %4868 = vmatprep.mubr.bf16.mxu1 %v4426_v19  ;;  %804 = vst [vmem:[#allocation2 + $0x34] sm:$0x1] %v803_v59  ;;  %807 = vst [vmem:[#allocation2 + $0x3c] sm:$0x1] %v806_v45  ;;  %v977_v23 = vor.u32 %v6067_v58, %v6065_v12  ;;  %v991_v62 = vor.u32 %v6071_v56, %v6069_v27  ;;  %v1055_v33 = vshrl.u32 %v6104_v21, 16  ;;  %v6131_v2 = vrot.slane %v1041_v26, 4 }
 0x1eb   :  { %4869 = vmatmul.mubr.bf16.vlgmr.msra.gmra.mxu1 %v4427_v48  ;;  %v6133_v7 = vrot.slane %v1044_v36, 5  ;;  %v1058_v37 = vshll.u32 %v6104_v21, 16  ;;  %v1069_v35 = vshrl.u32 %v6116_v46, 16  ;;  %v5316_v12 = vld [vmem:[#allocation8 + $0xb8] sm:$0xff]   ;;  %v1072_v56 = vshll.u32 %v6116_v46, 16  ;;  %4954 = vmatprep.subr.bf16.mxu0 %v5232_v4  ;;  %v5237_v59 = vld [vmem:[#allocation8 + $0xa0] sm:$0xff]  }
 0x1ec   :  { %4917 = vmatpush3.bf16.msra.mxu1 %v5316_v12  ;;  %4872 = vmatprep.mubr.bf16.mxu1 %v4428_v51  ;;  %v845_v58 = vld [vmem:[#allocation2 + $0x60] sm:$0xf]  ;;  %v6141_v27 = vrot.slane %v977_v23, 4  ;;  %v4448_v13 = vcombine.low %v6104_v21, %v6116_v46  ;;  %v1019_v17 = vor.u32 %v1018_v63, %v1015_v25  ;;  %v6148_v48 = vrot.slane %v991_v62, 4  ;;  %v6158_v20 = vld [vmem:[#allocation2 + $0x64] sm:$0x1] }
 0x1ed   :  { %4918 = vmatprep.subr.bf16.mxu1 %v5231_v41  ;;  %v1027_v34 = vshrl.u32 %v845_v58, 16  ;;  %v1030_v43 = vshll.u32 %v845_v58, 16  ;;  %v6150_v3 = vrot.slane %v1055_v33, 4  ;;  %v4447_v14 = vcombine.low %v845_v58, %v6098_v52  ;;  %4955 = vmatpush3.bf16.msra.mxu0 %v5232_v4  ;;  %v6165_v31 = vld [vmem:[#allocation2 + $0x6c] sm:$0x1] }
 0x1ee   :  { %v6155_v42 = vrot.slane %v1058_v37, 5  ;;  %v1020_v10 = vrot.slane %v1019_v17, 4  ;;  %v1022_v5 = vshll.u32 %v6139_v8, 16  ;;  %v1083_v63 = vshrl.u32 %v6146_v24, 16  ;;  %4956 = vmatprep.subr.bf16.mxu0 %v6124_v32  ;;  %v5241_v17 = vld [vmem:[#allocation8 + $0xc8] sm:$0xff]  }
 0x1ef   :  { %v1029_v55 = vrot.slane %v1027_v34, 4  ;;  %v1032_v25 = vrot.slane %v1030_v43, 5  ;;  %v1086_v26 = vshll.u32 %v6146_v24, 16  ;;  %v1071_v21 = vrot.slane %v1069_v35, 4  ;;  %v6178_v35 = vld [vmem:[#allocation2 + $0x74] sm:$0x1] }
 0x1f0   :  { %4919 = vmatpush3.bf16.msra.mxu1 %v5231_v41  ;;  %v1074_v52 = vrot.slane %v1072_v56, 5  ;;  %v1097_v19 = vshrl.u32 %v6152_v16, 16  ;;  %v1100_v54 = vshll.u32 %v6152_v16, 16  ;;  %4909 = vmatmul.mubr.bf16.gmra.mxu0 %v4447_v14  ;;  %v1024_v46 = vrot.slane %v1022_v5, 5 }
 0x1f1   :  { %4920 = vmatprep.subr.bf16.mxu1 %v6135_v29  ;;  %v6168_v4 = vld [vmem:[#allocation2 + $0x34] sm:$0x1]  ;;  %v6170_v36 = vld [vmem:[#allocation2 + $0x3c] sm:$0x1]  ;;  %v4449_v41 = vcombine.low %v6146_v24, %v6152_v16  ;;  %v1033_v45 = vor.u32 %v1032_v25, %v1029_v55  ;;  %v1047_v51 = vor.u32 %v6133_v7, %v6131_v2  ;;  %4912 = vmatprep.mubr.bf16.mxu0 %v4448_v13  ;;  %v1085_v33 = vrot.slane %v1083_v63, 4 }
 0x1f2   :  { %v980_v23 = vshll.u32 %v6168_v4, 16  ;;  %v994_v62 = vshll.u32 %v6170_v36, 16  ;;  %v1088_v37 = vrot.slane %v1086_v26, 5  ;;  %4957 = vmatpush3.bf16.msra.mxu0 %v6124_v32  ;;  %v1025_v12 = vsel %vm6023_vm9, %v1020_v10, %v1024_v46  ;;  %v6186_v7 = vld [vmem:[#allocation2 + $0x7c] sm:$0x1] }
 0x1f3   :  { %v6183_v58 = vrot.slane %v1097_v19, 4  ;;  %v1102_v56 = vrot.slane %v1100_v54, 5  ;;  %v1036_v2 = vshll.u32 %v6158_v20, 16  ;;  %4958 = vmatprep.subr.bf16.mxu0 %v5238_v30  ;;  %v5240_v13 = vld [vmem:[#allocation8 + $0x98] sm:$0xff]   ;;  %v1034_v43 = vrot.slane %v1033_v45, 4 }
 0x1f4   :  { %v982_v24 = vrot.slane %v980_v23, 5  ;;  %v996_v34 = vrot.slane %v994_v62, 5  ;;  %4921 = vmatpush3.bf16.msra.mxu1 %v6135_v29  ;;  %v1050_v32 = vshll.u32 %v6165_v31, 16  ;;  %v6190_v16 = vld [vmem:[#allocation2 + $0x84] sm:$0x1]  ;;  %v1048_v14 = vrot.slane %v1047_v51, 4 }
 0x1f5   :  { %4922 = vmatprep.subr.bf16.mxu1 %v5237_v59  ;;  %v1061_v10 = vor.u32 %v6155_v42, %v6150_v3  ;;  %v1064_v5 = vshll.u32 %v6178_v35, 16  ;;  %v1075_v55 = vor.u32 %v1074_v52, %v1071_v21  ;;  %v6195_v25 = vld [vmem:[#allocation2 + $0x8c] sm:$0x1]  ;;  %v1038_v26 = vrot.slane %v1036_v2, 5  ;;  %v1498_v54 = vld [vmem:[#allocation2 + $0x8] sm:$0xe] }
 0x1f6   :  { %v983_v29 = vsel %vm6023_vm9, %v6141_v27, %v982_v24  ;;  %v997_v63 = vsel %vm6023_vm9, %v6148_v48, %v996_v34  ;;  %v1078_v19 = vshll.u32 %v6186_v7, 16  ;;  %v759_v46 = vld [vmem:[#allocation2 + $0x40] sm:$0x1]  ;;  %v4430_v3 = vcombine.low %v1011_v9, %v1025_v12  ;;  %4959 = vmatpush3.bf16.msra.mxu0 %v5238_v30  ;;  %v5242_v9 = vld [vmem:[#allocation2 + $0x8] ss:$8 sps:$4 sm:$0xff]   ;;  %v5247_v12 = vld [vmem:[#allocation8 + $0x178] sm:$0xff]  }
 0x1f7   :  { %v4429_v45 = vcombine.low %v983_v29, %v997_v63  ;;  %v1052_v42 = vrot.slane %v1050_v32, 5  ;;  %v1062_v21 = vrot.slane %v1061_v10, 4  ;;  %4960 = vmatprep.subr.bf16.mxu0 %v5241_v17  ;;  %v1066_v27 = vrot.slane %v1064_v5, 5  ;;  %v5244_v51 = vld [vmem:[#allocation8 + $0xc0] sm:$0xff]   ;;  %v5243_v30 = vld [vmem:[#allocation8 + $0x90] sm:$0xff]  }
 0x1f8   :  { %4923 = vmatpush3.bf16.msra.mxu1 %v5237_v59  ;;  %v1076_v52 = vrot.slane %v1075_v55, 4  ;;  %v1080_v48 = vrot.slane %v1078_v19, 5  ;;  %v1089_v23 = vor.u32 %v1088_v37, %v1085_v33  ;;  %4913 = vmatmul.mubr.bf16.gmra.mxu0 %v4449_v41  ;;  %v1039_v49 = vsel %vm6023_vm9, %v1034_v43, %v1038_v26  ;;  %v7119_v34 = vld [vmem:[#allocation16_spill] sm:$0xff]  ;;  %v7121_v32 = vld [vmem:[#allocation18_spill] sm:$0xff]  ;;  %v7123_v19 = vld [vmem:[#allocation19_spill] sm:$0xff] }
 0x1f9   :  { %4873 = vmatmul.mubr.bf16.gmra.mxu1 %v4429_v45  ;;  %v1053_v0 = vsel %vm6023_vm9, %v1048_v14, %v1052_v42  ;;  %v1092_v59 = vshll.u32 %v6190_v16, 16  ;;  %v1103_v33 = vor.u32 %v1102_v56, %v6183_v58  ;;  %4924 = vmatprep.subr.bf16.mxu1 %v5240_v13  ;;  %v1067_v37 = vsel %vm6023_vm9, %v1062_v21, %v1066_v27  ;;  %v1501_v5 = vld [vmem:[#allocation2 + $0x20] sm:$0xe]  ;;  %v1503_v26 = vld [vmem:[#allocation2 + $0x30] sm:$0xe] }
 0x1fa   :  { %4876 = vmatprep.mubr.bf16.mxu1 %v4430_v3  ;;  %v1081_v41 = vsel %vm6023_vm9, %v1076_v52, %v1080_v48  ;;  %v6225_v2 = vrot.slane %v1089_v23, 4  ;;  %v1106_v24 = vshll.u32 %v6195_v25, 16  ;;  %4961 = vmatpush3.bf16.msra.mxu0 %v5241_v17  ;;  %v7120_v43 = vrot.slane %v7119_v34, 5  ;;  %v1502_v17 = vld [vmem:[#allocation2 + $0x28] sm:$0xe]  ;;  %v6263_v42 = vld [vmem:[#allocation8 + $0x170] sm:$0xff]  }
 0x1fb   :  { %4964 = vmatprep.mubr.bf16.mxu0 %v5242_v9  ;;  %v7122_v14 = vrot.slane %v7121_v32, 9  ;;  %v4459_v56 = vrot.slane %v1498_v54, 9  ;;  %v760_v10 = vsel %vm5822_vm5, 0, %v759_v46  ;;  %v4431_v55 = vcombine.low %v1039_v49, %v1053_v0  ;;  %4962 = vmatprep.subr.bf16.mxu0 %v5244_v51  ;;  %v5248_v48 = vld [vmem:[#allocation2 + $0x28] ss:$8 sps:$4 sm:$0xff]  }
 0x1fc   :  { %4925 = vmatpush3.bf16.msra.mxu1 %v5240_v13  ;;  %v1094_v29 = vrot.slane %v1092_v59, 5  ;;  %v1104_v63 = vrot.slane %v1103_v33, 4  ;;  %761 = vst [vmem:[#allocation2 + $0x40] sm:$0x1] %v760_v10  ;;  %v7124_v45 = vrot.slane %v7123_v19, 9  ;;  %v4432_v54 = vcombine.low %v1067_v37, %v1081_v41  ;;  %v6300_v33 = vld [vmem:[#allocation8 + $0x138] sm:$0xff]  }
 0x1fd   :  { %v6234_v58 = vsel %vm6211_vm12, %v7122_v14, %v7120_v43  ;;  %4926 = vmatprep.subr.bf16.mxu1 %v5243_v30  ;;  %v1108_v46 = vrot.slane %v1106_v24, 5  ;;  %v6250_v13 = vsel %vm6211_vm12, %v4459_v56, %v1554_v40  ;;  %v6258_v44 = vsel %vm6211_vm12, %v4460_v6, %v1558_v1  ;;  %v1504_v6 = vld [vmem:[#allocation2 + $0x38] sm:$0xe]  ;;  %v6275_v40 = vld [vmem:[#allocation8 + $0x80] sm:$0xff]   ;;  %v5253_v37 = vld [vmem:[#allocation8 + $0x168] sm:$0xff]  }
 0x1fe   :  { %v6244_v3 = vsel %vm6211_vm12, %v7124_v45, %v1582_v50  ;;  %v1095_v50 = vsel %vm6023_vm9, %v6225_v2, %v1094_v29  ;;  %v6271_v28 = vsel %vm6211_vm12, %v4461_v53, %v1562_v60  ;;  %v1566_v47 = vrot.slane %v6075_v15, 5  ;;  %4963 = vmatpush3.bf16.msra.mxu0 %v5244_v51  ;;  %v5246_v1 = vld [vmem:[#allocation2 + $0x18] ss:$8 sps:$4 sm:$0xff]   ;;  %v6314_v43 = vld [vmem:[#allocation2 + $0xc] sm:$0x1] }
 0x1ff   :  { %v1570_v61 = vrot.slane %v6087_v18, 5  ;;  %v4462_v21 = vrot.slane %v1501_v5, 9  ;;  %v4463_v27 = vrot.slane %v1502_v17, 9  ;;  %v4464_v52 = vrot.slane %v1503_v26, 9  ;;  %5012 = vmatprep.subr.bf16.mxu0 %v5247_v12  ;;  %v1506_v18 = vld [vmem:[#allocation2 + $0x58] sm:$0xe] }
 0x200   :  { %v1574_v38 = vrot.slane %v6168_v4, 5  ;;  %4927 = vmatpush3.bf16.msra.mxu1 %v5243_v30  ;;  %v1109_v39 = vsel %vm6023_vm9, %v1104_v63, %v1108_v46  ;;  %v4474_v53 = vcombine.low %v6234_v58, %v6250_v13  ;;  %v1578_v15 = vrot.slane %v6170_v36, 5  ;;  %v1507_v9 = vld [vmem:[#allocation2 + $0x60] sm:$0xe]  ;;  %v1508_v30 = vld [vmem:[#allocation2 + $0x68] sm:$0xe] }
 0x201   :  { %v1586_v60 = vrot.slane %v6139_v8, 5  ;;  %4877 = vmatmul.mubr.bf16.gmra.mxu1 %v4431_v55  ;;  %4928 = vmatprep.subr.bf16.mxu1 %v5245_v11  ;;  %v6286_v51 = vsel %vm6211_vm12, %v4462_v21, %v1566_v47  ;;  %v6290_v4 = vsel %vm6211_vm12, %v4463_v27, %v1570_v61  ;;  %v4465_v23 = vrot.slane %v1504_v6, 9  ;;  %v6316_v32 = vld [vmem:[#allocation2 + $0x14] sm:$0x1]  ;;  %v2530_v14 = vld [vmem:[#allocation2 + $0x8] sm:$0xe] }
 0x202   :  { %v1590_v49 = vrot.slane %v6158_v20, 5  ;;  %4880 = vmatprep.mubr.bf16.mxu1 %v4432_v54  ;;  %4965 = vmatmul.mubr.bf16.vlgmr.msra.gmra.mxu0 %v5246_v1  ;;  %v4475_v36 = vcombine.low %v6258_v44, %v6271_v28  ;;  %v6297_v8 = vsel %vm6211_vm12, %v4464_v52, %v1574_v38  ;;  %v4467_v0 = vrot.slane %v1506_v18, 9  ;;  %v2531_v10 = vld [vmem:[#allocation2 + $0x10] sm:$0xe]  ;;  %v6328_v17 = vld [vmem:[#allocation8 + $0x160] sm:$0xff]  }
 0x203   :  { %v1594_v59 = vrot.slane %v6165_v31, 5  ;;  %4968 = vmatprep.mubr.bf16.mxu0 %v5248_v48  ;;  %5013 = vmatpush3.bf16.msra.mxu0 %v5247_v12  ;;  %v6304_v20 = vsel %vm6211_vm12, %v4465_v23, %v1578_v15  ;;  %v4468_v41 = vrot.slane %v1507_v9, 9  ;;  %v4469_v2 = vrot.slane %v1508_v30, 9  ;;  %v1509_v29 = vld [vmem:[#allocation2 + $0x70] sm:$0xe] }
 0x204   :  { %v1598_v24 = vrot.slane %v6178_v35, 5  ;;  %v4433_v34 = vcombine.low %v1095_v50, %v1109_v39  ;;  %4929 = vmatpush3.bf16.msra.mxu1 %v5245_v11  ;;  %5014 = vmatprep.subr.bf16.mxu0 %v6263_v42  ;;  %v4476_v31 = vcombine.low %v6286_v51, %v6290_v4  ;;  %v6312_v12 = vsel %vm6211_vm12, %v4467_v0, %v1586_v60  ;;  %v5251_v63 = vld [vmem:[#allocation2 + $0x38] ss:$8 sps:$4 sm:$0xff]   ;;  %v6341_v1 = vld [vmem:[#allocation2 + $0x1c] sm:$0x1] }
 0x205   :  { %4930 = vmatprep.subr.bf16.mxu1 %v6275_v40  ;;  %v6321_v35 = vsel %vm6211_vm12, %v4468_v41, %v1590_v49  ;;  %v6325_v56 = vsel %vm6211_vm12, %v4469_v2, %v1594_v59  ;;  %v4522_v5 = vrot.slane %v2530_v14, 9  ;;  %v2580_v55 = vrot.slane %v6314_v43, 5  ;;  %v1510_v54 = vld [vmem:[#allocation2 + $0x78] sm:$0xe]  ;;  %v6343_v21 = vld [vmem:[#allocation2 + $0x24] sm:$0x1] }
 0x206   :  { %v4477_v26 = vcombine.low %v6297_v8, %v6304_v20  ;;  %v4523_v19 = vrot.slane %v2531_v10, 9  ;;  %v2584_v45 = vrot.slane %v6316_v32, 5  ;;  %v4470_v11 = vrot.slane %v1509_v29, 9  ;;  %v5254_v46 = vld [vmem:[#allocation2 + $0x58] ss:$8 sps:$4 sm:$0xff]  }
 0x207   :  { %5015 = vmatpush3.bf16.msra.mxu0 %v6263_v42  ;;  %v4478_v50 = vcombine.low %v6244_v3, %v6312_v12  ;;  %v6338_v47 = vsel %vm6211_vm12, %v4522_v5, %v2580_v55  ;;  %v4471_v61 = vrot.slane %v1510_v54, 9  ;;  %v1602_v6 = vrot.slane %v6186_v7, 5  ;;  %v2532_v52 = vld [vmem:[#allocation2 + $0x18] sm:$0xe]  ;;  %v2533_v38 = vld [vmem:[#allocation2 + $0x20] sm:$0xe] }
 0x208   :  { %4931 = vmatpush3.bf16.msra.mxu1 %v6275_v40  ;;  %5016 = vmatprep.subr.bf16.mxu0 %v5253_v37  ;;  %v4479_v42 = vcombine.low %v6321_v35, %v6325_v56  ;;  %v6350_v27 = vsel %vm6211_vm12, %v4523_v19, %v2584_v45  ;;  %v2588_v39 = vrot.slane %v6341_v1, 5  ;;  %v2592_v7 = vrot.slane %v6343_v21, 5  ;;  %v1511_v48 = vld [vmem:[#allocation2 + $0x80] sm:$0xe]  ;;  %v1512_v23 = vld [vmem:[#allocation2 + $0x88] sm:$0xe] }
 0x209   :  { %4881 = vmatmul.mubr.bf16.gmra.mxu1 %v4433_v34  ;;  %4980 = vmatprep.subr.bf16.mxu1 %v6300_v33  ;;  %v6357_v40 = vsel %vm6211_vm12, %v4470_v11, %v1598_v24  ;;  %v6361_v15 = vsel %vm6211_vm12, %v4471_v61, %v1602_v6  ;;  %v4524_v18 = vrot.slane %v2532_v52, 9  ;;  %v4525_v60 = vrot.slane %v2533_v38, 9  ;;  %v6366_v49 = vld [vmem:[#allocation8 + $0x158] sm:$0xff]   ;;  %v6371_v41 = vld [vmem:[#allocation2 + $0x2c] sm:$0x1]  ;;  %v5255_v38 = vld [vmem:[#allocation8 + $0x130] sm:$0xff]  }
 0x20a   :  { %4932 = vmatprep.mubr.bf16.mxu1 %v4474_v53  ;;  %4969 = vmatmul.mubr.bf16.gmra.mxu0 %v5251_v63  ;;  %v4538_v0 = vcombine.low %v6338_v47, %v6350_v27  ;;  %v4472_v9 = vrot.slane %v1511_v48, 9  ;;  %v1606_v30 = vrot.slane %v6190_v16, 5  ;;  %v4473_v59 = vrot.slane %v1512_v23, 9  ;;  %v6382_v53 = vld [vmem:[#allocation2 + $0x34] sm:$0x1] }
 0x20b   :  { %4972 = vmatprep.mubr.bf16.mxu0 %v5254_v46  ;;  %5017 = vmatpush3.bf16.msra.mxu0 %v5253_v37  ;;  %v6375_v2 = vsel %vm6211_vm12, %v4524_v18, %v2588_v39  ;;  %v6379_v58 = vsel %vm6211_vm12, %v4525_v60, %v2592_v7  ;;  %v1610_v13 = vrot.slane %v6195_v25, 5  ;;  %v2534_v24 = vld [vmem:[#allocation2 + $0x28] sm:$0xe]  ;;  %v2596_v16 = vrot.slane %v6371_v41, 5  ;;  %v2535_v14 = vld [vmem:[#allocation2 + $0x30] sm:$0xe] }
 0x20c   :  { %5018 = vmatprep.subr.bf16.mxu0 %v6328_v17  ;;  %v4480_v37 = vcombine.low %v6357_v40, %v6361_v15  ;;  %v6390_v34 = vsel %vm6211_vm12, %v4472_v9, %v1606_v30  ;;  %v4526_v10 = vrot.slane %v2534_v24, 9  ;;  %v2600_v5 = vrot.slane %v6382_v53, 5  ;;  %v2064_v55 = vld [vmem:[#allocation2 + $0x8] sm:$0xf]  ;;  %v2066_v63 = vld [vmem:[#allocation2 + $0x10] sm:$0xf] }
 0x20d   :  { %v6395_v25 = vsel %vm6211_vm12, %v4473_v59, %v1610_v13  ;;  %v4527_v29 = vrot.slane %v2535_v14, 9  ;;  %v2097_v19 = vshrl.u32 %v2064_v55, 16  ;;  %v2100_v45 = vshll.u32 %v2064_v55, 16  ;;  %v808_v6 = vld [vmem:[#allocation2 + $0x44] sm:$0x1] }
 0x20e   :  { %v4539_v54 = vcombine.low %v6375_v2, %v6379_v58  ;;  %v6401_v11 = vsel %vm6211_vm12, %v4526_v10, %v2596_v16  ;;  %v2106_v46 = vshll.u32 %v6314_v43, 16  ;;  %v2111_v61 = vshrl.u32 %v2066_v63, 16  ;;  %v6404_v52 = vld [vmem:[#allocation2 + $0x3c] sm:$0x1]  ;;  %v5257_v39 = vld [vmem:[#allocation2 + $0x68] ss:$8 sps:$4 sm:$0xff]  }
 0x20f   :  { %5019 = vmatpush3.bf16.msra.mxu0 %v6328_v17  ;;  %v6409_v7 = vsel %vm6211_vm12, %v4527_v29, %v2600_v5  ;;  %v2099_v18 = vrot.slane %v2097_v19, 4  ;;  %v2102_v60 = vrot.slane %v2100_v45, 5  ;;  %v2114_v48 = vshll.u32 %v2066_v63, 16  ;;  %v2536_v23 = vld [vmem:[#allocation2 + $0x38] sm:$0xe]  ;;  %v5262_v43 = vld [vmem:[#allocation8 + $0x150] sm:$0xff]  }
 0x210   :  { %5020 = vmatprep.subr.bf16.mxu0 %v6366_v49  ;;  %v5260_v9 = vld [vmem:[#allocation2 + $0x78] ss:$8 sps:$4 sm:$0xff]   ;;  %v4481_v30 = vcombine.low %v6390_v34, %v6395_v25  ;;  %v6414_v59 = vrot.slane %v2106_v46, 5  ;;  %v2113_v13 = vrot.slane %v2111_v61, 4  ;;  %v2120_v17 = vshll.u32 %v6316_v32, 16  ;;  %v5265_v63 = vld [vmem:[#allocation8 + $0x148] sm:$0xff]  }
 0x211   :  { %4933 = vmatmul.mubr.bf16.vlgmr.msra.gmra.mxu1 %v4475_v36  ;;  %v4540_v24 = vcombine.low %v6401_v11, %v6409_v7  ;;  %v2103_v16 = vor.u32 %v2102_v60, %v2099_v18  ;;  %v2116_v14 = vrot.slane %v2114_v48, 5  ;;  %v809_v10 = vsel %vm5940_vm6, 0, %v808_v6  ;;  %v6424_v5 = vld [vmem:[#allocation2 + $0x40] sm:$0xe]  ;;  %v2068_v55 = vld [vmem:[#allocation2 + $0x18] sm:$0xf] }
 0x212   :  { %4981 = vmatpush3.bf16.msra.mxu1 %v6300_v33  ;;  %4936 = vmatprep.mubr.bf16.mxu1 %v4476_v31  ;;  %v6430_v32 = vrot.slane %v2120_v17, 5  ;;  %810 = vst [vmem:[#allocation2 + $0x44] sm:$0x1] %v809_v10  ;;  %v4528_v44 = vrot.slane %v2536_v23, 9  ;;  %v2604_v28 = vrot.slane %v6404_v52, 5  ;;  %v2125_v29 = vshrl.u32 %v2068_v55, 16 }
 0x213   :  { %v2070_v36 = vld [vmem:[#allocation2 + $0x20] sm:$0xf]  ;;  %4982 = vmatprep.subr.bf16.mxu1 %v5255_v38  ;;  %4973 = vmatmul.mubr.bf16.gmra.mxu0 %v5257_v39  ;;  %v2104_v19 = vrot.slane %v2103_v16, 4  ;;  %v2117_v45 = vor.u32 %v2116_v14, %v2113_v13  ;;  %v2128_v46 = vshll.u32 %v2068_v55, 16  ;;  %v2134_v33 = vshll.u32 %v6341_v1, 16  ;;  %v5273_v58 = vld [vmem:[#allocation8 + $0x1e8] sm:$0xff]  }
 0x214   :  { %4976 = vmatprep.mubr.bf16.mxu0 %v5260_v9  ;;  %5021 = vmatpush3.bf16.msra.mxu0 %v6366_v49  ;;  %v4529_v51 = vrot.slane %v6424_v5, 9  ;;  %v2127_v4 = vrot.slane %v2125_v29, 4  ;;  %v2139_v31 = vshrl.u32 %v2070_v36, 16  ;;  %v2142_v61 = vshll.u32 %v2070_v36, 16  ;;  %v6436_v6 = vld [vmem:[#allocation2 + $0x5c] sm:$0x1] }
 0x215   :  { %v6438_v18 = vld [vmem:[#allocation8 + $0x120] sm:$0xff]   ;;  %5022 = vmatprep.subr.bf16.mxu0 %v5262_v43  ;;  %v2109_v39 = vsel %vm6023_vm9, %v2104_v19, %v6414_v59  ;;  %v2118_v60 = vrot.slane %v2117_v45, 4  ;;  %v6445_v1 = vsel %vm6211_vm12, %v4528_v44, %v2604_v28  ;;  %v2130_v49 = vrot.slane %v2128_v46, 5  ;;  %v2538_v23 = vld [vmem:[#allocation2 + $0x58] sm:$0xe] }
 0x216   :  { %v6447_v48 = vld [vmem:[#allocation2 + $0x64] sm:$0x1]  ;;  %4983 = vmatpush3.bf16.msra.mxu1 %v5255_v38  ;;  %v6449_v9 = vrot.slane %v2134_v33, 5  ;;  %v2141_v13 = vrot.slane %v2139_v31, 4  ;;  %v2144_v17 = vrot.slane %v2142_v61, 5  ;;  %v2148_v16 = vshll.u32 %v6343_v21, 16 }
 0x217   :  { %v2539_v14 = vld [vmem:[#allocation2 + $0x60] sm:$0xe]  ;;  %4984 = vmatprep.subr.bf16.mxu1 %v5258_v57  ;;  %v5263_v10 = vld [vmem:[#allocation2 + $0x88] ss:$8 sps:$4 sm:$0xff]   ;;  %v2123_v59 = vsel %vm6023_vm9, %v2118_v60, %v6430_v32  ;;  %v2131_v5 = vor.u32 %v2130_v49, %v2127_v4  ;;  %v4530_v55 = vrot.slane %v2538_v23, 9  ;;  %v2612_v44 = vrot.slane %v6436_v6, 5 }
 0x218   :  { %v2072_v28 = vld [vmem:[#allocation2 + $0x28] sm:$0xf]  ;;  %5023 = vmatpush3.bf16.msra.mxu0 %v5262_v43  ;;  %v2145_v38 = vor.u32 %v2144_v17, %v2141_v13  ;;  %v2150_v36 = vrot.slane %v2148_v16, 5  ;;  %v4531_v29 = vrot.slane %v2539_v14, 9  ;;  %v2616_v19 = vrot.slane %v6447_v48, 5  ;;  %v5267_v21 = vld [vmem:[#allocation8 + $0x140] sm:$0xff]  }
 0x219   :  { %v2074_v45 = vld [vmem:[#allocation2 + $0x30] sm:$0xf]  ;;  %4937 = vmatmul.mubr.bf16.gmra.mxu1 %v4477_v26  ;;  %5024 = vmatprep.subr.bf16.mxu0 %v5265_v63  ;;  %v6460_v46 = vld [vmem:[#allocation2 + $0x44] sm:$0x1]  ;;  %v2132_v32 = vrot.slane %v2131_v5, 4  ;;  %v6464_v33 = vsel %vm6211_vm12, %v4530_v55, %v2612_v44  ;;  %v2153_v43 = vshrl.u32 %v2072_v28, 16  ;;  %v6476_v60 = vcombine.low %v2109_v39, %v2123_v59 }
 0x21a   :  { %v2156_v4 = vshll.u32 %v2072_v28, 16  ;;  %4985 = vmatpush3.bf16.msra.mxu1 %v5258_v57  ;;  %4940 = vmatprep.mubr.bf16.mxu1 %v4478_v50  ;;  %v5264_v31 = vld [vmem:[#allocation8 + $0x118] sm:$0xff]   ;;  %v2608_v8 = vrot.slane %v6460_v46, 5  ;;  %v2146_v20 = vrot.slane %v2145_v38, 4  ;;  %v6472_v26 = vsel %vm6211_vm12, %v4531_v29, %v2616_v19  ;;  %v6481_v57 = vld [vmem:[#allocation2 + $0x6c] sm:$0x1] }
 0x21b   :  { %v2162_v61 = vshll.u32 %v6371_v41, 16  ;;  %4986 = vmatprep.subr.bf16.mxu1 %v6438_v18  ;;  %4977 = vmatmul.mubr.bf16.gmra.mxu0 %v5263_v10  ;;  %v2137_v3 = vsel %vm6023_vm9, %v2132_v32, %v6449_v9  ;;  %v2155_v12 = vrot.slane %v2153_v43, 4  ;;  %v2540_v49 = vld [vmem:[#allocation2 + $0x68] sm:$0xe]  ;;  %v4542_v23 = vcombine.low %v6464_v33, %v6472_v26  ;;  %v6494_v13 = vld [vmem:[#allocation2 + $0x74] sm:$0x1] }
 0x21c   :  { %v2158_v50 = vrot.slane %v2156_v4, 5  ;;  %5025 = vmatpush3.bf16.msra.mxu0 %v5265_v63  ;;  %5028 = vmatprep.mubr.bf16.mxu0 %v4538_v0  ;;  %v6488_v41 = vsel %vm6211_vm12, %v4529_v51, %v2608_v8  ;;  %v2151_v39 = vsel %vm6023_vm9, %v2146_v20, %v2150_v36  ;;  %v2167_v9 = vshrl.u32 %v2074_v45, 16  ;;  %v2541_v17 = vld [vmem:[#allocation2 + $0x70] sm:$0xe]  ;;  %v5269_v63 = vld [vmem:[#allocation8 + $0x1f8] sm:$0xff]  }
 0x21d   :  { %5026 = vmatprep.subr.bf16.mxu0 %v5267_v21  ;;  %v4541_v47 = vcombine.low %v6445_v1, %v6488_v41  ;;  %v6498_v0 = vrot.slane %v2162_v61, 5  ;;  %v2170_v51 = vshll.u32 %v2074_v45, 16  ;;  %v2076_v16 = vld [vmem:[#allocation2 + $0x38] sm:$0xf]  ;;  %v5266_v14 = vld [vmem:[#allocation8 + $0x110] sm:$0xff]   ;;  %v2176_v59 = vshll.u32 %v6382_v53, 16 }
 0x21e   :  { %v2159_v27 = vor.u32 %v2158_v50, %v2155_v12  ;;  %4987 = vmatpush3.bf16.msra.mxu1 %v6438_v18  ;;  %v2169_v10 = vrot.slane %v2167_v9, 4  ;;  %v4532_v5 = vrot.slane %v2540_v49, 9  ;;  %v2620_v55 = vrot.slane %v6481_v57, 5  ;;  %v2078_v29 = vld [vmem:[#allocation2 + $0x40] sm:$0xf]  ;;  %v5271_v19 = vld [vmem:[#allocation8 + $0x1f0] sm:$0xff]  }
 0x21f   :  { %4988 = vmatprep.subr.bf16.mxu1 %v5264_v31  ;;  %v2172_v28 = vrot.slane %v2170_v51, 5  ;;  %v4533_v38 = vrot.slane %v2541_v17, 9  ;;  %v2624_v36 = vrot.slane %v6494_v13, 5  ;;  %v6504_v45 = vcombine.low %v2137_v3, %v2151_v39  ;;  %v6518_v20 = vld [vmem:[#allocation2 + $0x7c] sm:$0x1]  ;;  %v5268_v50 = vld [vmem:[#allocation8 + $0x108] sm:$0xff]  }
 0x220   :  { %v2160_v44 = vrot.slane %v2159_v27, 4  ;;  %5027 = vmatpush3.bf16.msra.mxu0 %v5267_v21  ;;  %v6508_v18 = vsel %vm6211_vm12, %v4532_v5, %v2620_v55  ;;  %v2181_v32 = vshrl.u32 %v2076_v16, 16  ;;  %v2184_v53 = vshll.u32 %v2076_v16, 16  ;;  %v2542_v61 = vld [vmem:[#allocation2 + $0x78] sm:$0xe]  ;;  %v5270_v16 = vld [vmem:[#allocation8 + $0x100] sm:$0xff]  }
 0x221   :  { %4941 = vmatmul.mubr.bf16.gmra.mxu1 %v4479_v42  ;;  %5076 = vmatprep.subr.bf16.mxu0 %v5269_v63  ;;  %v2173_v43 = vor.u32 %v2172_v28, %v2169_v10  ;;  %v2178_v4 = vrot.slane %v2176_v59, 5  ;;  %v6515_v8 = vsel %vm6211_vm12, %v4533_v38, %v2624_v36  ;;  %v2190_v21 = vshll.u32 %v6404_v52, 16  ;;  %v6526_v12 = vld [vmem:[#allocation2 + $0x84] sm:$0x1]  ;;  %v2080_v2 = vld [vmem:[#allocation2 + $0x58] sm:$0xf] }
 0x222   :  { %4989 = vmatpush3.bf16.msra.mxu1 %v5264_v31  ;;  %4944 = vmatprep.mubr.bf16.mxu1 %v4480_v37  ;;  %v2165_v35 = vsel %vm6023_vm9, %v2160_v44, %v6498_v0  ;;  %v2183_v56 = vrot.slane %v2181_v32, 4  ;;  %v2186_v42 = vrot.slane %v2184_v53, 5  ;;  %v2195_v3 = vshrl.u32 %v2078_v29, 16  ;;  %v2543_v31 = vld [vmem:[#allocation2 + $0x80] sm:$0xe]  ;;  %v5277_v41 = vld [vmem:[#allocation8 + $0x1d8] sm:$0xff]  }
 0x223   :  { %4990 = vmatprep.subr.bf16.mxu1 %v5266_v14  ;;  %5029 = vmatmul.mubr.bf16.vlgmr.msra.gmra.mxu0 %v4539_v54  ;;  %v2174_v52 = vrot.slane %v2173_v43, 4  ;;  %v4543_v40 = vcombine.low %v6508_v18, %v6515_v8  ;;  %v2198_v15 = vshll.u32 %v2078_v29, 16  ;;  %v2204_v37 = vshll.u32 %v6460_v46, 16  ;;  %v2082_v51 = vld [vmem:[#allocation2 + $0x60] sm:$0xf]  ;;  %v5274_v33 = vld [vmem:[#allocation8 + $0x1b0] sm:$0xff]  }
 0x224   :  { %5032 = vmatprep.mubr.bf16.mxu0 %v4540_v24  ;;  %5077 = vmatpush3.bf16.msra.mxu0 %v5269_v63  ;;  %v2187_v49 = vor.u32 %v2186_v42, %v2183_v56  ;;  %v2197_v39 = vrot.slane %v2195_v3, 4  ;;  %v4534_v9 = vrot.slane %v2542_v61, 9  ;;  %v2628_v17 = vrot.slane %v6518_v20, 5  ;;  %v6552_v44 = vld [vmem:[#allocation2 + $0x8c] sm:$0x1]  ;;  %v5272_v56 = vld [vmem:[#allocation8 + $0x1b8] sm:$0xff]  }
 0x225   :  { %5078 = vmatprep.subr.bf16.mxu0 %v5271_v19  ;;  %v2179_v54 = vsel %vm6023_vm9, %v2174_v52, %v2178_v4  ;;  %v6540_v27 = vrot.slane %v2190_v21, 5  ;;  %v2200_v46 = vrot.slane %v2198_v15, 5  ;;  %v6542_v0 = vrot.slane %v2204_v37, 5  ;;  %v6560_v29 = vld [vmem:[#allocation2 + $0x94] sm:$0x1] }
 0x226   :  { %4991 = vmatpush3.bf16.msra.mxu1 %v5266_v14  ;;  %v6544_v11 = vrot.slane %v2187_v49, 4  ;;  %v6548_v7 = vsel %vm6211_vm12, %v4534_v9, %v2628_v17  ;;  %v4535_v24 = vrot.slane %v2543_v31, 9  ;;  %v2632_v63 = vrot.slane %v6526_v12, 5  ;;  %v2544_v32 = vld [vmem:[#allocation2 + $0x88] sm:$0xe] }
 0x227   :  { %4992 = vmatprep.subr.bf16.mxu1 %v5268_v50  ;;  %v2201_v10 = vor.u32 %v2200_v46, %v2197_v39  ;;  %v2209_v59 = vshrl.u32 %v2080_v2, 16  ;;  %v2212_v5 = vshll.u32 %v2080_v2, 16  ;;  %v2218_v55 = vshll.u32 %v6436_v6, 16  ;;  %v5275_v6 = vld [vmem:[#allocation8 + $0x1e0] sm:$0xff]   ;;  %v2545_v21 = vld [vmem:[#allocation2 + $0x90] sm:$0xe] }
 0x228   :  { %5079 = vmatpush3.bf16.msra.mxu0 %v5271_v19  ;;  %v6554_v14 = vcombine.low %v2165_v35, %v2179_v54  ;;  %v6558_v28 = vsel %vm6211_vm12, %v4535_v24, %v2632_v63  ;;  %v2223_v38 = vshrl.u32 %v2082_v51, 16  ;;  %v2226_v36 = vshll.u32 %v2082_v51, 16  ;;  %v3095_v46 = vld [vmem:[#allocation2 + $0x10] sm:$0xf] }
 0x229   :  { %4945 = vmatmul.mubr.bf16.gmra.mxu1 %v4481_v30  ;;  %5080 = vmatprep.subr.bf16.mxu0 %v5273_v58  ;;  %v2193_v19 = vsel %vm6023_vm9, %v6544_v11, %v6540_v27  ;;  %v2202_v53 = vrot.slane %v2201_v10, 4  ;;  %v2211_v43 = vrot.slane %v2209_v59, 4  ;;  %v2214_v4 = vrot.slane %v2212_v5, 5  ;;  %v2084_v30 = vld [vmem:[#allocation2 + $0x68] sm:$0xf] }
 0x22a   :  { %4993 = vmatpush3.bf16.msra.mxu1 %v5268_v50  ;;  %4996 = vmatprep.mubr.bf16.mxu1 %v6476_v60  ;;  %v4544_v61 = vcombine.low %v6548_v7, %v6558_v28  ;;  %v2225_v35 = vrot.slane %v2223_v38, 4  ;;  %v2228_v34 = vrot.slane %v2226_v36, 5  ;;  %v2232_v25 = vshll.u32 %v6447_v48, 16  ;;  %v2086_v60 = vld [vmem:[#allocation2 + $0x70] sm:$0xf] }
 0x22b   :  { %4994 = vmatprep.subr.bf16.mxu1 %v5270_v16  ;;  %5033 = vmatmul.mubr.bf16.gmra.mxu0 %v4541_v47  ;;  %v2215_v42 = vor.u32 %v2214_v4, %v2211_v43  ;;  %v2220_v3 = vrot.slane %v2218_v55, 5  ;;  %v4536_v52 = vrot.slane %v2544_v32, 9  ;;  %v2636_v50 = vrot.slane %v6552_v44, 5  ;;  %v6604_v32 = vld [vmem:[#allocation2 + $0x1c] sm:$0x1] }
 0x22c   :  { %5036 = vmatprep.mubr.bf16.mxu0 %v4542_v23  ;;  %5081 = vmatpush3.bf16.msra.mxu0 %v5273_v58  ;;  %v2207_v48 = vsel %vm6023_vm9, %v2202_v53, %v6542_v0  ;;  %v2229_v15 = vor.u32 %v2228_v34, %v2225_v35  ;;  %v2234_v37 = vrot.slane %v2232_v25, 5  ;;  %v4537_v1 = vrot.slane %v2545_v21, 9  ;;  %v6595_v0 = vld [vmem:[#allocation2 + $0x14] sm:$0x1]  ;;  %v2088_v21 = vld [vmem:[#allocation2 + $0x78] sm:$0xf] }
 0x22d   :  { %5082 = vmatprep.subr.bf16.mxu0 %v5275_v6  ;;  %v2216_v47 = vrot.slane %v2215_v42, 4  ;;  %v6585_v31 = vsel %vm6211_vm12, %v4536_v52, %v2636_v50  ;;  %v2640_v49 = vrot.slane %v6560_v29, 5  ;;  %v2237_v39 = vshrl.u32 %v2084_v30, 16  ;;  %v2090_v52 = vld [vmem:[#allocation2 + $0x80] sm:$0xf] }
 0x22e   :  { %4995 = vmatpush3.bf16.msra.mxu1 %v5270_v16  ;;  %v2230_v26 = vrot.slane %v2229_v15, 4  ;;  %v2240_v23 = vshll.u32 %v2084_v30, 16  ;;  %v2246_v9 = vshll.u32 %v6481_v57, 16  ;;  %v2251_v17 = vshrl.u32 %v2086_v60, 16  ;;  %v5279_v57 = vld [vmem:[#allocation8 + $0x1d0] sm:$0xff]  }
 0x22f   :  { %5044 = vmatprep.subr.bf16.mxu1 %v5272_v56  ;;  %v2221_v2 = vsel %vm6023_vm9, %v2216_v47, %v2220_v3  ;;  %v6593_v58 = vsel %vm6211_vm12, %v4537_v1, %v2640_v49  ;;  %v2239_v54 = vrot.slane %v2237_v39, 4  ;;  %v2254_v27 = vshll.u32 %v2086_v60, 16  ;;  %v3097_v16 = vld [vmem:[#allocation2 + $0x18] sm:$0xf]  ;;  %v6619_v39 = vld [vmem:[#allocation2 + $0x24] sm:$0x1] }
 0x230   :  { %5083 = vmatpush3.bf16.msra.mxu0 %v5275_v6  ;;  %v4509_v51 = vcombine.low %v2193_v19, %v2207_v48  ;;  %v2235_v11 = vsel %vm6023_vm9, %v2230_v26, %v2234_v37  ;;  %v4545_v24 = vcombine.low %v6585_v31, %v6593_v58  ;;  %v2242_v63 = vrot.slane %v2240_v23, 5  ;;  %v3099_v37 = vld [vmem:[#allocation2 + $0x20] sm:$0xf] }
 0x231   :  { %4997 = vmatmul.mubr.bf16.vlgmr.msra.gmra.mxu1 %v6504_v45  ;;  %5084 = vmatprep.subr.bf16.mxu0 %v5277_v41  ;;  %v2248_v10 = vrot.slane %v2246_v9, 5  ;;  %v2253_v59 = vrot.slane %v2251_v17, 4  ;;  %v2256_v5 = vrot.slane %v2254_v27, 5  ;;  %v2260_v55 = vshll.u32 %v6494_v13, 16  ;;  %v5276_v45 = vld [vmem:[#allocation8 + $0x1a8] sm:$0xff]   ;;  %v5283_v17 = vld [vmem:[#allocation8 + $0x1c0] sm:$0xff]  }
 0x232   :  { %5045 = vmatpush3.bf16.msra.mxu1 %v5272_v56  ;;  %5000 = vmatprep.mubr.bf16.mxu1 %v6554_v14  ;;  %v4510_v38 = vcombine.low %v2221_v2, %v2235_v11  ;;  %v2243_v36 = vor.u32 %v2242_v63, %v2239_v54  ;;  %v3128_v6 = vshrl.u32 %v3095_v46, 16  ;;  %v3131_v19 = vshll.u32 %v3095_v46, 16  ;;  %v5281_v14 = vld [vmem:[#allocation8 + $0x1c8] sm:$0xff]  }
 0x233   :  { %5046 = vmatprep.subr.bf16.mxu1 %v5274_v33  ;;  %5037 = vmatmul.mubr.bf16.gmra.mxu0 %v4543_v40  ;;  %v2257_v53 = vor.u32 %v2256_v5, %v2253_v59  ;;  %v3137_v43 = vshll.u32 %v6595_v0, 16  ;;  %v3142_v4 = vshrl.u32 %v3097_v16, 16  ;;  %v3145_v13 = vshll.u32 %v3097_v16, 16  ;;  %v3101_v2 = vld [vmem:[#allocation2 + $0x28] sm:$0xf] }
 0x234   :  { %5040 = vmatprep.mubr.bf16.mxu0 %v4544_v61  ;;  %5085 = vmatpush3.bf16.msra.mxu0 %v5277_v41  ;;  %v2244_v35 = vrot.slane %v2243_v36, 4  ;;  %v2262_v34 = vrot.slane %v2260_v55, 5  ;;  %v3130_v25 = vrot.slane %v3128_v6, 4  ;;  %v3133_v30 = vrot.slane %v3131_v19, 5  ;;  %v5278_v61 = vld [vmem:[#allocation8 + $0x1a0] sm:$0xff]  }
 0x235   :  { %5086 = vmatprep.subr.bf16.mxu0 %v5279_v57  ;;  %v2258_v18 = vrot.slane %v2257_v53, 4  ;;  %v3144_v8 = vrot.slane %v3142_v4, 4  ;;  %v3147_v40 = vrot.slane %v3145_v13, 5  ;;  %v3151_v56 = vshll.u32 %v6604_v32, 16  ;;  %v2094_v53 = vld [vmem:[#allocation2 + $0x90] sm:$0xf] }
 0x236   :  { %5047 = vmatpush3.bf16.msra.mxu1 %v5274_v33  ;;  %v2249_v42 = vsel %vm6023_vm9, %v2244_v35, %v2248_v10  ;;  %v3134_v3 = vor.u32 %v3133_v30, %v3130_v25  ;;  %v2265_v7 = vshrl.u32 %v2088_v21, 16  ;;  %v2268_v28 = vshll.u32 %v2088_v21, 16  ;;  %v2092_v10 = vld [vmem:[#allocation2 + $0x88] sm:$0xf]  ;;  %v5282_v13 = vld [vmem:[#allocation8 + $0x190] sm:$0xff]  }
 0x237   :  { %5048 = vmatprep.subr.bf16.mxu1 %v5276_v45  ;;  %v2263_v50 = vsel %vm6023_vm9, %v2258_v18, %v2262_v34  ;;  %v3139_v60 = vrot.slane %v3137_v43, 5  ;;  %v3148_v48 = vor.u32 %v3147_v40, %v3144_v8  ;;  %v3153_v15 = vrot.slane %v3151_v56, 5 }
 0x238   :  { %5087 = vmatpush3.bf16.msra.mxu0 %v5279_v57  ;;  %v3135_v1 = vrot.slane %v3134_v3, 4  ;;  %v2267_v41 = vrot.slane %v2265_v7, 4  ;;  %v2270_v47 = vrot.slane %v2268_v28, 5  ;;  %v2274_v49 = vshll.u32 %v6518_v20, 16  ;;  %v5280_v20 = vld [vmem:[#allocation8 + $0x198] sm:$0xff]  }
 0x239   :  { %5001 = vmatmul.mubr.bf16.gmra.mxu1 %v4509_v51  ;;  %5088 = vmatprep.subr.bf16.mxu0 %v5281_v14  ;;  %v4511_v33 = vcombine.low %v2249_v42, %v2263_v50  ;;  %v3149_v26 = vrot.slane %v3148_v48, 4  ;;  %v2279_v23 = vshrl.u32 %v2090_v52, 16  ;;  %v2282_v9 = vshll.u32 %v2090_v52, 16  ;;  %v3103_v3 = vld [vmem:[#allocation2 + $0x30] sm:$0xf]  ;;  %v5284_v48 = vld [vmem:[#allocation8 + $0x188] sm:$0xff]  }
 0x23a   :  { %5049 = vmatpush3.bf16.msra.mxu1 %v5276_v45  ;;  %5004 = vmatprep.mubr.bf16.mxu1 %v4510_v38  ;;  %v3140_v54 = vsel %vm6023_vm9, %v3135_v1, %v3139_v60  ;;  %v2271_v27 = vor.u32 %v2270_v47, %v2267_v41  ;;  %v2288_v46 = vshll.u32 %v6526_v12, 16  ;;  %v3156_v11 = vshrl.u32 %v3099_v37, 16  ;;  %v6629_v38 = vld [vmem:[#allocation2 + $0x2c] sm:$0x1]  ;;  %v6638_v50 = vld [vmem:[#allocation2 + $0x34] sm:$0x1] }
 0x23b   :  { %5050 = vmatprep.subr.bf16.mxu1 %v5278_v61  ;;  %5041 = vmatmul.mubr.bf16.gmra.mxu0 %v4545_v24  ;;  %v3154_v51 = vsel %vm6023_vm9, %v3149_v26, %v3153_v15  ;;  %v2281_v57 = vrot.slane %v2279_v23, 4  ;;  %v2284_v63 = vrot.slane %v2282_v9, 5  ;;  %v3159_v16 = vshll.u32 %v3099_v37, 16  ;;  %v3105_v60 = vld [vmem:[#allocation2 + $0x38] sm:$0xf] }
 0x23c   :  { %5089 = vmatpush3.bf16.msra.mxu0 %v5281_v14  ;;  %v4570_v59 = vcombine.low %v3140_v54, %v3154_v51  ;;  %v2272_v5 = vrot.slane %v2271_v27, 4  ;;  %v2276_v55 = vrot.slane %v2274_v49, 5  ;;  %v3158_v12 = vrot.slane %v3156_v11, 4  ;;  %v3107_v23 = vld [vmem:[#allocation2 + $0x40] sm:$0xf] }
 0x23d   :  { %v2285_v36 = vor.u32 %v2284_v63, %v2281_v57  ;;  %5090 = vmatprep.subr.bf16.mxu0 %v5283_v17  ;;  %v3161_v6 = vrot.slane %v3159_v16, 5  ;;  %v3165_v31 = vshll.u32 %v6619_v39, 16  ;;  %v3170_v58 = vshrl.u32 %v3101_v2, 16 }
 0x23e   :  { %5051 = vmatpush3.bf16.msra.mxu1 %v5278_v61  ;;  %5092 = vmatprep.mubr.bf16.mxu0 %v4570_v59  ;;  %v2277_v24 = vsel %vm6023_vm9, %v2272_v5, %v2276_v55  ;;  %v2290_v19 = vrot.slane %v2288_v46, 5  ;;  %v3173_v45 = vshll.u32 %v3101_v2, 16  ;;  %v2293_v43 = vshrl.u32 %v2092_v10, 16  ;;  %v3109_v59 = vld [vmem:[#allocation2 + $0x48] sm:$0xf] }
 0x23f   :  { %5052 = vmatprep.subr.bf16.mxu1 %v5280_v20  ;;  %v2286_v4 = vrot.slane %v2285_v36, 4  ;;  %v3162_v21 = vor.u32 %v3161_v6, %v3158_v12  ;;  %v3172_v14 = vrot.slane %v3170_v58, 4  ;;  %v3179_v35 = vshll.u32 %v6629_v38, 16 }
 0x240   :  { %5091 = vmatpush3.bf16.msra.mxu0 %v5283_v17  ;;  %v3167_v34 = vrot.slane %v3165_v31, 5  ;;  %v3175_v25 = vrot.slane %v3173_v45, 5  ;;  %v2295_v30 = vrot.slane %v2293_v43, 4  ;;  %v2296_v18 = vshll.u32 %v2092_v10, 16  ;;  %v5286_v10 = vld [vmem:[#allocation8 + $0x180] sm:$0xff]  }
 0x241   :  { %5005 = vmatmul.mubr.bf16.gmra.mxu1 %v4511_v33  ;;  %v2291_v8 = vsel %vm6023_vm9, %v2286_v4, %v2290_v19  ;;  %v3163_v40 = vrot.slane %v3162_v21, 4  ;;  %v2302_v56 = vshll.u32 %v6552_v44, 16  ;;  %v2307_v42 = vshrl.u32 %v2094_v53, 16  ;;  %v6643_v44 = vld [vmem:[#allocation2 + $0x3c] sm:$0x1] }
 0x242   :  { %5053 = vmatpush3.bf16.msra.mxu1 %v5280_v20  ;;  %v4512_v52 = vcombine.low %v2277_v24, %v2291_v8  ;;  %v3176_v7 = vor.u32 %v3175_v25, %v3172_v14  ;;  %v2298_v28 = vrot.slane %v2296_v18, 5  ;;  %v2310_v61 = vshll.u32 %v2094_v53, 16  ;;  %v6648_v20 = vld [vmem:[#allocation2 + $0x44] sm:$0x1]  ;;  %v3111_v19 = vld [vmem:[#allocation2 + $0x60] sm:$0xf] }
 0x243   :  { %5054 = vmatprep.subr.bf16.mxu1 %v5282_v13  ;;  %v3168_v15 = vsel %vm6023_vm9, %v3163_v40, %v3167_v34  ;;  %v3181_v37 = vrot.slane %v3179_v35, 5  ;;  %v2309_v1 = vrot.slane %v2307_v42, 4  ;;  %v2316_v41 = vshll.u32 %v6560_v29, 16  ;;  %v5285_v4 = vld [vmem:[#allocation2 + $0x10] ss:$8 sps:$4 sm:$0xff]  }
 0x244   :  { %5008 = vmatprep.mubr.bf16.mxu1 %v4512_v52  ;;  %v3177_v47 = vrot.slane %v3176_v7, 4  ;;  %v2299_v49 = vor.u32 %v2298_v28, %v2295_v30  ;;  %v2312_v33 = vrot.slane %v2310_v61, 5  ;;  %v3184_v26 = vshrl.u32 %v3103_v3, 16  ;;  %v6658_v14 = vld [vmem:[#allocation2 + $0x64] sm:$0x1]  ;;  %v5287_v8 = vld [vmem:[#allocation8 + $0x238] sm:$0xff]  }
 0x245   :  { %v2304_v9 = vrot.slane %v2302_v56, 5  ;;  %v3187_v17 = vshll.u32 %v3103_v3, 16  ;;  %v3193_v2 = vshll.u32 %v6638_v50, 16  ;;  %v3198_v54 = vshrl.u32 %v3105_v60, 16  ;;  %v3113_v35 = vld [vmem:[#allocation2 + $0x68] sm:$0xf] }
 0x246   :  { %5055 = vmatpush3.bf16.msra.mxu1 %v5282_v13  ;;  %v3182_v27 = vsel %vm6023_vm9, %v3177_v47, %v3181_v37  ;;  %v2300_v46 = vrot.slane %v2299_v49, 4  ;;  %v2313_v11 = vor.u32 %v2312_v33, %v2309_v1  ;;  %v3186_v29 = vrot.slane %v3184_v26, 4  ;;  %v6656_v13 = vld [vmem:[#allocation2 + $0x4c] sm:$0x1]  ;;  %v3115_v26 = vld [vmem:[#allocation2 + $0x70] sm:$0xf] }
 0x247   :  { %5056 = vmatprep.subr.bf16.mxu1 %v5284_v48  ;;  %v4571_v51 = vcombine.low %v3168_v15, %v3182_v27  ;;  %v2318_v57 = vrot.slane %v2316_v41, 5  ;;  %v3189_v63 = vrot.slane %v3187_v17, 5  ;;  %v3200_v16 = vrot.slane %v3198_v54, 4  ;;  %v6661_v61 = vld [vmem:[#allocation2 + $0x6c] sm:$0x1] }
 0x248   :  { %v2305_v5 = vsel %vm6023_vm9, %v2300_v46, %v2304_v9  ;;  %v2314_v55 = vrot.slane %v2313_v11, 4  ;;  %v3201_v12 = vshll.u32 %v3105_v60, 16  ;;  %v3207_v36 = vshll.u32 %v6643_v44, 16  ;;  %v3117_v54 = vld [vmem:[#allocation2 + $0x78] sm:$0xf] }
 0x249   :  { %5093 = vmatmul.mubr.bf16.vlgmr.msra.gmra.mxu0 %v4571_v51  ;;  %v3190_v6 = vor.u32 %v3189_v63, %v3186_v29  ;;  %v3212_v31 = vshrl.u32 %v3107_v23, 16  ;;  %v3215_v58 = vshll.u32 %v3107_v23, 16  ;;  %v3221_v24 = vshll.u32 %v6648_v20, 16  ;;  %v5288_v11 = vld [vmem:[#allocation2 + $0x20] ss:$8 sps:$4 sm:$0xff]  }
 0x24a   :  { %v2319_v45 = vsel %vm6023_vm9, %v2314_v55, %v2318_v57  ;;  %5057 = vmatpush3.bf16.msra.mxu1 %v5284_v48  ;;  %v3195_v53 = vrot.slane %v3193_v2, 5  ;;  %v3203_v43 = vrot.slane %v3201_v12, 5  ;;  %v3226_v21 = vshrl.u32 %v3109_v59, 16  ;;  %v6670_v57 = vld [vmem:[#allocation2 + $0x74] sm:$0x1] }
 0x24b   :  { %v4513_v34 = vcombine.low %v2305_v5, %v2319_v45  ;;  %v3191_v25 = vrot.slane %v3190_v6, 4  ;;  %5058 = vmatprep.subr.bf16.mxu1 %v5286_v10  ;;  %v3214_v30 = vrot.slane %v3212_v31, 4  ;;  %v3217_v18 = vrot.slane %v3215_v58, 5  ;;  %v5290_v5 = vld [vmem:[#allocation8 + $0x230] sm:$0xff]   ;;  %v6673_v6 = vld [vmem:[#allocation2 + $0x7c] sm:$0x1] }
 0x24c   :  { %v3204_v40 = vor.u32 %v3203_v43, %v3200_v16  ;;  %v3209_v56 = vrot.slane %v3207_v36, 5  ;;  %v3228_v42 = vrot.slane %v3226_v21, 4  ;;  %v3229_v3 = vshll.u32 %v3109_v59, 16  ;;  %v5289_v59 = vld [vmem:[#allocation2 + $0x30] ss:$8 sps:$4 sm:$0xff]  }
 0x24d   :  { %5009 = vmatmul.mubr.bf16.gmra.mxu1 %v4513_v34  ;;  %v3218_v52 = vor.u32 %v3217_v18, %v3214_v30  ;;  %v3223_v7 = vrot.slane %v3221_v24, 5  ;;  %v3235_v28 = vshll.u32 %v6656_v13, 16  ;;  %v3240_v60 = vshrl.u32 %v3111_v19, 16  ;;  %v3119_v43 = vld [vmem:[#allocation2 + $0x80] sm:$0xf] }
 0x24e   :  { %v3196_v48 = vsel %vm6023_vm9, %v3191_v25, %v3195_v53  ;;  %v3205_v15 = vrot.slane %v3204_v40, 4  ;;  %5060 = vmatprep.mubr.bf16.mxu1 %v5285_v4  ;;  %5059 = vmatpush3.bf16.msra.mxu1 %v5286_v10  ;;  %v3231_v37 = vrot.slane %v3229_v3, 5  ;;  %v3243_v1 = vshll.u32 %v3111_v19, 16  ;;  %v3121_v25 = vld [vmem:[#allocation2 + $0x88] sm:$0xf] }
 0x24f   :  { %v3219_v41 = vrot.slane %v3218_v52, 4  ;;  %5108 = vmatprep.subr.bf16.mxu1 %v5287_v8  ;;  %v3242_v47 = vrot.slane %v3240_v60, 4  ;;  %v3249_v49 = vshll.u32 %v6658_v14, 16  ;;  %v3254_v33 = vshrl.u32 %v3113_v35, 16  ;;  %v5291_v52 = vld [vmem:[#allocation8 + $0x228] sm:$0xff]  }
 0x250   :  { %v3210_v23 = vsel %vm6023_vm9, %v3205_v15, %v3209_v56  ;;  %v3232_v9 = vor.u32 %v3231_v37, %v3228_v42  ;;  %v3237_v17 = vrot.slane %v3235_v28, 5  ;;  %v3245_v2 = vrot.slane %v3243_v1, 5  ;;  %v5292_v1 = vld [vmem:[#allocation2 + $0x40] ss:$8 sps:$4 sm:$0xff]  }
 0x251   :  { %v4572_v27 = vcombine.low %v3196_v48, %v3210_v23  ;;  %v3224_v46 = vsel %vm6023_vm9, %v3219_v41, %v3223_v7  ;;  %v3256_v29 = vrot.slane %v3254_v33, 4  ;;  %v3257_v51 = vshll.u32 %v3113_v35, 16  ;;  %v6681_v48 = vld [vmem:[#allocation2 + $0x84] sm:$0x1] }
 0x252   :  { %v3233_v63 = vrot.slane %v3232_v9, 4  ;;  %v3246_v16 = vor.u32 %v3245_v2, %v3242_v47  ;;  %v3263_v10 = vshll.u32 %v6661_v61, 16  ;;  %v3268_v55 = vshrl.u32 %v3115_v26, 16  ;;  %v3125_v2 = vld [vmem:[#allocation2 + $0x98] sm:$0xf] }
 0x253   :  { %5096 = vmatprep.mubr.bf16.mxu0 %v4572_v27  ;;  %v3251_v12 = vrot.slane %v3249_v49, 5  ;;  %v3259_v36 = vrot.slane %v3257_v51, 5  ;;  %v3271_v31 = vshll.u32 %v3115_v26, 16  ;;  %v3282_v58 = vshrl.u32 %v3117_v54, 16  ;;  %v3123_v49 = vld [vmem:[#allocation2 + $0x90] sm:$0xf] }
 0x254   :  { %v3238_v24 = vsel %vm6023_vm9, %v3233_v63, %v3237_v17  ;;  %v3247_v19 = vrot.slane %v3246_v16, 4  ;;  %v3270_v45 = vrot.slane %v3268_v55, 4  ;;  %v3277_v53 = vshll.u32 %v6670_v57, 16  ;;  %v6685_v17 = vld [vmem:[#allocation2 + $0x8c] sm:$0x1]  ;;  %v5294_v51 = vld [vmem:[#allocation8 + $0x220] sm:$0xff]  }
 0x255   :  { %v4573_v4 = vcombine.low %v3224_v46, %v3238_v24  ;;  %5061 = vmatmul.mubr.bf16.vlgmr.msra.gmra.mxu1 %v5288_v11  ;;  %v3260_v21 = vor.u32 %v3259_v36, %v3256_v29  ;;  %v3265_v35 = vrot.slane %v3263_v10, 5  ;;  %v3273_v34 = vrot.slane %v3271_v31, 5  ;;  %v5293_v29 = vld [vmem:[#allocation2 + $0x60] ss:$8 sps:$4 sm:$0xff]   ;;  %v6690_v10 = vld [vmem:[#allocation2 + $0x94] sm:$0x1] }
 0x256   :  { %v3252_v30 = vsel %vm6023_vm9, %v3247_v19, %v3251_v12  ;;  %5109 = vmatpush3.bf16.msra.mxu1 %v5287_v8  ;;  %5064 = vmatprep.mubr.bf16.mxu1 %v5289_v59  ;;  %v3284_v18 = vrot.slane %v3282_v58, 4  ;;  %v3285_v40 = vshll.u32 %v3117_v54, 16  ;;  %v3291_v56 = vshll.u32 %v6673_v6, 16 }
 0x257   :  { %5097 = vmatmul.mubr.bf16.gmra.mxu0 %v4573_v4  ;;  %v3261_v42 = vrot.slane %v3260_v21, 4  ;;  %5110 = vmatprep.subr.bf16.mxu1 %v5290_v5  ;;  %v3274_v3 = vor.u32 %v3273_v34, %v3270_v45  ;;  %v3296_v7 = vshrl.u32 %v3119_v43, 16  ;;  %v3299_v28 = vshll.u32 %v3119_v43, 16  ;;  %v6695_v4 = vld [vmem:[#allocation2 + $0x9c] sm:$0x1] }
 0x258   :  { %v3287_v60 = vrot.slane %v3285_v40, 5  ;;  %v3310_v15 = vshrl.u32 %v3121_v25, 16  ;;  %v3279_v26 = vrot.slane %v3277_v53, 5  ;;  %v3293_v9 = vrot.slane %v3291_v56, 5 }
 0x259   :  { %v3266_v37 = vsel %vm6023_vm9, %v3261_v42, %v3265_v35  ;;  %v3275_v8 = vrot.slane %v3274_v3, 4  ;;  %v3298_v41 = vrot.slane %v3296_v7, 4  ;;  %v3301_v47 = vrot.slane %v3299_v28, 5  ;;  %v5295_v35 = vld [vmem:[#allocation8 + $0x218] sm:$0xff]  }
 0x25a   :  { %v4574_v33 = vcombine.low %v3252_v30, %v3266_v37  ;;  %5111 = vmatpush3.bf16.msra.mxu1 %v5290_v5  ;;  %v3288_v23 = vor.u32 %v3287_v60, %v3284_v18  ;;  %v3305_v27 = vshll.u32 %v6681_v48, 16  ;;  %v3312_v46 = vrot.slane %v3310_v15, 4  ;;  %v5296_v28 = vld [vmem:[#allocation2 + $0x70] ss:$8 sps:$4 sm:$0xff]  }
 0x25b   :  { %5112 = vmatprep.subr.bf16.mxu1 %v5291_v52  ;;  %v3302_v54 = vor.u32 %v3301_v47, %v3298_v41  ;;  %v3313_v11 = vshll.u32 %v3121_v25, 16  ;;  %v3280_v63 = vsel %vm6023_vm9, %v3275_v8, %v3279_v26  ;;  %v3324_v59 = vshrl.u32 %v3123_v49, 16  ;;  %v5298_v60 = vld [vmem:[#allocation8 + $0x210] sm:$0xff]   ;;  %v3562_v47 = vld [vmem:[#allocation2 + $0x18] sm:$0xe] }
 0x25c   :  { %5100 = vmatprep.mubr.bf16.mxu0 %v4574_v33  ;;  %v3289_v16 = vrot.slane %v3288_v23, 4  ;;  %v3327_v5 = vshll.u32 %v3123_v49, 16  ;;  %v3319_v36 = vshll.u32 %v6685_v17, 16  ;;  %v3338_v31 = vshrl.u32 %v3125_v2, 16  ;;  %v3561_v41 = vld [vmem:[#allocation2 + $0x10] sm:$0xe] }
 0x25d   :  { %5065 = vmatmul.mubr.bf16.gmra.mxu1 %v5292_v1  ;;  %v3303_v55 = vrot.slane %v3302_v54, 4  ;;  %v3315_v12 = vrot.slane %v3313_v11, 5  ;;  %v3326_v24 = vrot.slane %v3324_v59, 4  ;;  %v3307_v53 = vrot.slane %v3305_v27, 5  ;;  %v5297_v49 = vld [vmem:[#allocation2 + $0x80] ss:$8 sps:$4 sm:$0xff]  }
 0x25e   :  { %v3294_v58 = vsel %vm6023_vm9, %v3289_v16, %v3293_v9  ;;  %5113 = vmatpush3.bf16.msra.mxu1 %v5291_v52  ;;  %5068 = vmatprep.mubr.bf16.mxu1 %v5293_v29  ;;  %v3329_v19 = vrot.slane %v3327_v5, 5  ;;  %v3333_v21 = vshll.u32 %v6690_v10, 16  ;;  %v3340_v25 = vrot.slane %v3338_v31, 4  ;;  %v5301_v29 = vld [vmem:[#allocation8 + $0x200] sm:$0xff]   ;;  %v3564_v16 = vld [vmem:[#allocation2 + $0x28] sm:$0xe] }
 0x25f   :  { %v4575_v45 = vcombine.low %v3280_v63, %v3294_v58  ;;  %v3316_v43 = vor.u32 %v3315_v12, %v3312_v46  ;;  %5114 = vmatprep.subr.bf16.mxu1 %v5294_v51  ;;  %v3341_v30 = vshll.u32 %v3125_v2, 16  ;;  %v3347_v18 = vshll.u32 %v6695_v4, 16  ;;  %v5299_v2 = vld [vmem:[#allocation8 + $0x208] sm:$0xff]   ;;  %v3563_v63 = vld [vmem:[#allocation2 + $0x20] sm:$0xe] }
 0x260   :  { %v3330_v34 = vor.u32 %v3329_v19, %v3326_v24  ;;  %v3308_v40 = vsel %vm6023_vm9, %v3303_v55, %v3307_v53  ;;  %v3321_v42 = vrot.slane %v3319_v36, 5  ;;  %v3335_v37 = vrot.slane %v3333_v21, 5  ;;  %v3565_v55 = vld [vmem:[#allocation2 + $0x30] sm:$0xe]  ;;  %v3566_v12 = vld [vmem:[#allocation2 + $0x38] sm:$0xe] }
 0x261   :  { %5101 = vmatmul.mubr.bf16.gmra.mxu0 %v4575_v45  ;;  %v3317_v56 = vrot.slane %v3316_v43, 4  ;;  %v3343_v52 = vrot.slane %v3341_v30, 5  ;;  %v3349_v1 = vrot.slane %v3347_v18, 5  ;;  %v3611_v33 = vrot.slane %v6595_v0, 5  ;;  %v3567_v21 = vld [vmem:[#allocation2 + $0x40] sm:$0xe] }
 0x262   :  { %5115 = vmatpush3.bf16.msra.mxu1 %v5294_v51  ;;  %v3331_v3 = vrot.slane %v3330_v34, 4  ;;  %v3615_v26 = vrot.slane %v6604_v32, 5  ;;  %v4586_v54 = vrot.slane %v3561_v41, 9  ;;  %v4587_v27 = vrot.slane %v3562_v47, 9  ;;  %v5300_v51 = vld [vmem:[#allocation2 + $0x90] ss:$8 sps:$4 sm:$0xff]  }
 0x263   :  { %v3322_v7 = vsel %vm6023_vm9, %v3317_v56, %v3321_v42  ;;  %5116 = vmatprep.subr.bf16.mxu1 %v5295_v35  ;;  %v3344_v8 = vor.u32 %v3343_v52, %v3340_v25  ;;  %v3619_v5 = vrot.slane %v6619_v39, 5  ;;  %v3623_v22 = vrot.slane %v6629_v38, 5  ;;  %v3573_v41 = vld [vmem:[#allocation2 + $0x80] sm:$0xe]  ;;  %v3574_v47 = vld [vmem:[#allocation2 + $0x88] sm:$0xe] }
 0x264   :  { %v4576_v15 = vcombine.low %v3308_v40, %v3322_v7  ;;  %v3336_v23 = vsel %vm6023_vm9, %v3331_v3, %v3335_v37  ;;  %v3612_v0 = vsel %vm6211_vm12, %v4586_v54, %v3611_v33  ;;  %v3616_v32 = vsel %vm6211_vm12, %v4587_v27, %v3615_v26  ;;  %v3570_v40 = vld [vmem:[#allocation2 + $0x68] sm:$0xe]  ;;  %v3572_v37 = vld [vmem:[#allocation2 + $0x78] sm:$0xe] }
 0x265   :  { %5069 = vmatmul.mubr.bf16.gmra.mxu1 %v5296_v28  ;;  %v3345_v9 = vrot.slane %v3344_v8, 4  ;;  %v4602_v59 = vcombine.low %v3612_v0, %v3616_v32  ;;  %v3627_v36 = vrot.slane %v6638_v50, 5  ;;  %v3631_v31 = vrot.slane %v6643_v44, 5  ;;  %v3568_v44 = vld [vmem:[#allocation2 + $0x48] sm:$0xe] }
 0x266   :  { %5104 = vmatprep.mubr.bf16.mxu0 %v4576_v15  ;;  %5117 = vmatpush3.bf16.msra.mxu1 %v5295_v35  ;;  %v4588_v58 = vrot.slane %v3563_v63, 9  ;;  %v4589_v24 = vrot.slane %v3564_v16, 9  ;;  %v4590_v19 = vrot.slane %v3565_v55, 9  ;;  %v4591_v45 = vrot.slane %v3566_v12, 9  ;;  %v3569_v35 = vld [vmem:[#allocation2 + $0x60] sm:$0xe] }
 0x267   :  { %5072 = vmatprep.mubr.bf16.mxu1 %v5297_v49  ;;  %5118 = vmatprep.subr.bf16.mxu1 %v5298_v60  ;;  %v3350_v46 = vsel %vm6023_vm9, %v3345_v9, %v3349_v1  ;;  %v3635_v25 = vrot.slane %v6648_v20, 5  ;;  %v4593_v30 = vrot.slane %v3568_v44, 9  ;;  %v3639_v18 = vrot.slane %v6656_v13, 5 }
 0x268   :  { %v4577_v11 = vcombine.low %v3336_v23, %v3350_v46  ;;  %v3620_v53 = vsel %vm6211_vm12, %v4588_v58, %v3619_v5  ;;  %v3624_v39 = vsel %vm6211_vm12, %v4589_v24, %v3623_v22  ;;  %v3628_v38 = vsel %vm6211_vm12, %v4590_v19, %v3627_v36 }
 0x269   :  { %v3632_v50 = vsel %vm6211_vm12, %v4591_v45, %v3631_v31  ;;  %v4603_v43 = vcombine.low %v3620_v53, %v3624_v39  ;;  %v3643_v56 = vrot.slane %v6658_v14, 5  ;;  %v3647_v42 = vrot.slane %v6661_v61, 5  ;;  %v3571_v14 = vld [vmem:[#allocation2 + $0x70] sm:$0xe] }
 0x26a   :  { %5119 = vmatpush3.bf16.msra.mxu1 %v5298_v60  ;;  %5105 = vmatmul.mubr.bf16.gmra.mxu0 %v4577_v11  ;;  %v4604_v34 = vcombine.low %v3628_v38, %v3632_v50  ;;  %v4592_v3 = vrot.slane %v3567_v21, 9  ;;  %v4594_v52 = vrot.slane %v3569_v35, 9  ;;  %v4595_v7 = vrot.slane %v3570_v40, 9 }
 0x26b   :  { %5120 = vmatprep.subr.bf16.mxu1 %v5299_v2  ;;  %v3640_v60 = vsel %vm6211_vm12, %v4593_v30, %v3639_v18  ;;  %v3651_v8 = vrot.slane %v6670_v57, 5  ;;  %v3655_v1 = vrot.slane %v6673_v6, 5  ;;  %v3659_v49 = vrot.slane %v6681_v48, 5  ;;  %v3576_v48 = vld [vmem:[#allocation2 + $0x98] sm:$0xe] }
 0x26c   :  { %v3636_v28 = vsel %vm6211_vm12, %v4592_v3, %v3635_v25  ;;  %v3644_v20 = vsel %vm6211_vm12, %v4594_v52, %v3643_v56  ;;  %v3648_v13 = vsel %vm6211_vm12, %v4595_v7, %v3647_v42  ;;  %v3663_v33 = vrot.slane %v6685_v17, 5  ;;  %v3575_v17 = vld [vmem:[#allocation2 + $0x90] sm:$0xe] }
 0x26d   :  { %5073 = vmatmul.mubr.bf16.gmra.mxu1 %v5300_v51  ;;  %v4605_v15 = vcombine.low %v3636_v28, %v3640_v60  ;;  %v4606_v61 = vcombine.low %v3644_v20, %v3648_v13  ;;  %v4596_v26 = vrot.slane %v3571_v14, 9  ;;  %v4597_v23 = vrot.slane %v3572_v37, 9 }
 0x26e   :  { %5121 = vmatpush3.bf16.msra.mxu1 %v5299_v2  ;;  %5124 = vmatprep.mubr.bf16.mxu1 %v4602_v59  ;;  %v4598_v9 = vrot.slane %v3573_v41, 9  ;;  %v4599_v2 = vrot.slane %v3574_v47, 9  ;;  %v3667_v0 = vrot.slane %v6690_v10, 5  ;;  %v4601_v32 = vrot.slane %v3576_v48, 9 }
 0x26f   :  { %5122 = vmatprep.subr.bf16.mxu1 %v5301_v29  ;;  %v3652_v54 = vsel %vm6211_vm12, %v4596_v26, %v3651_v8  ;;  %v3656_v57 = vsel %vm6211_vm12, %v4597_v23, %v3655_v1  ;;  %v4600_v51 = vrot.slane %v3575_v17, 9 }
 0x270   :  { %v3660_v6 = vsel %vm6211_vm12, %v4598_v9, %v3659_v49  ;;  %v3664_v27 = vsel %vm6211_vm12, %v4599_v2, %v3663_v33  ;;  %v4607_v46 = vcombine.low %v3652_v54, %v3656_v57 }
 0x271   :  { %v4608_v11 = vcombine.low %v3660_v6, %v3664_v27  ;;  %v3668_v63 = vsel %vm6211_vm12, %v4600_v51, %v3667_v0 }
 0x272   :  { %5123 = vmatpush3.bf16.msra.mxu1 %v5301_v29  ;;  %v3671_v29 = vrot.slane %v6695_v4, 5 }
 0x274   :  { %v3672_v16 = vsel %vm6211_vm12, %v4601_v32, %v3671_v29 }
 0x275   :  { %5125 = vmatmul.mubr.bf16.vlgmr.msra.gmra.mxu1 %v4603_v43  ;;  %v4609_v59 = vcombine.low %v3668_v63, %v3672_v16 }
 0x276   :  { %5128 = vmatprep.mubr.bf16.mxu1 %v4604_v34 }
 0x27d   :  { %5129 = vmatmul.mubr.bf16.gmra.mxu1 %v4605_v15 }
 0x27e   :  { %5132 = vmatprep.mubr.bf16.mxu1 %v4606_v61 }
 0x285   :  { %5133 = vmatmul.mubr.bf16.gmra.mxu1 %v4607_v46 }
 0x286   :  { %5136 = vmatprep.mubr.bf16.mxu1 %v4608_v11 }
 0x28d   :  { %5137 = vmatmul.mubr.bf16.gmra.mxu1 %v4609_v59 }
 0x2a0   :  { %v4902_v5 = vpop.f32.mrf.mxu0 }
 0x2a2   :  { %v1434_v22 = vpop.f32.mrf.mxu0 }
 0x2a4   :  { %v4903_v55 = vpop.f32.mrf.mxu0 }
 0x2a6   :  { %v1437_v12 = vpop.f32.mrf.mxu0 }
 0x2a8   :  { %v4906_v36 = vpop.f32.mrf.mxu0 }
 0x2aa   :  { %v1450_v31 = vpop.f32.mrf.mxu0 }
 0x2ab   :  { %v4870_v10 = vpop.f32.mrf.mxu1 }
 0x2ac   :  { %v1443_v58 = vadd.f32 %v4902_v5, %v4870_v10  ;;  %v4907_v24 = vpop.f32.mrf.mxu0 }
 0x2ad   :  { %v1241_v4 = vpop.f32.mrf.mxu1 }
 0x2ae   :  { %v1435_v19 = vadd.f32 %v1434_v22, %v1241_v4  ;;  %v1453_v53 = vpop.f32.mrf.mxu0 }
 0x2af   :  { %v4871_v45 = vpop.f32.mrf.mxu1 }
 0x2b0   :  { %v1446_v39 = vadd.f32 %v4903_v55, %v4871_v45  ;;  %v4910_v50 = vpop.f32.mrf.mxu0 }
 0x2b1   :  { %v1244_v38 = vpop.f32.mrf.mxu1 }
 0x2b2   :  { %v1438_v62 = vadd.f32 %v1437_v12, %v1244_v38  ;;  %v1466_v44 = vpop.f32.mrf.mxu0 }
 0x2b4   :  { %v4911_v43 = vpop.f32.mrf.mxu0 }
 0x2b6   :  { %v1469_v21 = vpop.f32.mrf.mxu0 }
 0x2b8   :  { %v4914_v34 = vpop.f32.mrf.mxu0 }
 0x2b9   :  { %v4874_v35 = vpop.f32.mrf.mxu1 }
 0x2ba   :  { %v1459_v25 = vadd.f32 %v4906_v36, %v4874_v35  ;;  %v1482_v18 = vpop.f32.mrf.mxu0 }
 0x2bb   :  { %v1257_v30 = vpop.f32.mrf.mxu1 }
 0x2bc   :  { %v1451_v40 = vadd.f32 %v1450_v31, %v1257_v30  ;;  %v4915_v42 = vpop.f32.mrf.mxu0 }
 0x2bd   :  { %v4875_v56 = vpop.f32.mrf.mxu1 }
 0x2be   :  { %v1462_v3 = vadd.f32 %v4907_v24, %v4875_v56  ;;  %v1485_v7 = vpop.f32.mrf.mxu0 }
 0x2bf   :  { %v1260_v52 = vpop.f32.mrf.mxu1 }
 0x2c0   :  { %v1454_v28 = vadd.f32 %v1453_v53, %v1260_v52 }
 0x2c1   :  { %v4878_v60 = vpop.f32.mrf.mxu1 }
 0x2c2   :  { %v1475_v20 = vadd.f32 %v4910_v50, %v4878_v60  ;;  %v4966_v13 = vpop.f32.mrf.mxu0 }
 0x2c3   :  { %v1273_v15 = vpop.f32.mrf.mxu1 }
 0x2c4   :  { %v1467_v14 = vadd.f32 %v1466_v44, %v1273_v15  ;;  %v6755_v37 = vpop.f32.mrf.mxu0 }
 0x2c5   :  { %v4879_v61 = vpop.f32.mrf.mxu1 }
 0x2c6   :  { %v1478_v8 = vadd.f32 %v4911_v43, %v4879_v61  ;;  %v6757_v1 = vpop.f32.mrf.mxu0 }
 0x2c7   :  { %v1276_v41 = vpop.f32.mrf.mxu1 }
 0x2c8   :  { %v1470_v47 = vadd.f32 %v1469_v21, %v1276_v41  ;;  %v6759_v49 = vpop.f32.mrf.mxu0 }
 0x2c9   :  { %v4882_v33 = vpop.f32.mrf.mxu1 }
 0x2ca   :  { %v1491_v26 = vadd.f32 %v4914_v34, %v4882_v33  ;;  %v4970_v23 = vpop.f32.mrf.mxu0 }
 0x2cb   :  { %v1289_v9 = vpop.f32.mrf.mxu1 }
 0x2cc   :  { %v1483_v2 = vadd.f32 %v1482_v18, %v1289_v9  ;;  %v6761_v54 = vpop.f32.mrf.mxu0 }
 0x2cd   :  { %v4883_v57 = vpop.f32.mrf.mxu1 }
 0x2ce   :  { %v1494_v6 = vadd.f32 %v4915_v42, %v4883_v57  ;;  %v6763_v27 = vpop.f32.mrf.mxu0 }
 0x2cf   :  { %v1292_v48 = vpop.f32.mrf.mxu1 }
 0x2d0   :  { %v1486_v46 = vadd.f32 %v1485_v7, %v1292_v48  ;;  %v6765_v17 = vpop.f32.mrf.mxu0 }
 0x2d1   :  { %v4934_v11 = vpop.f32.mrf.mxu1 }
 0x2d2   :  { %v1808_v0 = vadd.f32 %v4934_v11, %v1443_v58 }
 0x2d3   :  { %v1743_v32 = vpop.f32.mrf.mxu1  ;;  %v4974_v29 = vpop.f32.mrf.mxu0 }
 0x2d4   :  { %v6767_v51 = vadd.f32 %v1743_v32, %v1435_v19  ;;  %v2050_v63 = vadd.f32 %v4966_v13, %v1808_v0 }
 0x2d5   :  { %v4935_v16 = vpop.f32.mrf.mxu1  ;;  %v6769_v59 = vpop.f32.mrf.mxu0 }
 0x2d6   :  { %v6771_v5 = vadd.f32 %v4935_v16, %v1446_v39 }
 0x2d7   :  { %v1746_v22 = vpop.f32.mrf.mxu1  ;;  %v6773_v55 = vpop.f32.mrf.mxu0 }
 0x2d8   :  { %v6775_v12 = vadd.f32 %v1746_v22, %v1438_v62 }
 0x2d9   :  { %v4938_v36 = vpop.f32.mrf.mxu1  ;;  %v6777_v10 = vpop.f32.mrf.mxu0 }
 0x2da   :  { %v1812_v31 = vadd.f32 %v4938_v36, %v1459_v25 }
 0x2db   :  { %v1759_v58 = vpop.f32.mrf.mxu1  ;;  %v4978_v4 = vpop.f32.mrf.mxu0 }
 0x2dc   :  { %v6779_v24 = vadd.f32 %v1759_v58, %v1451_v40  ;;  %v2054_v19 = vadd.f32 %v4970_v23, %v1812_v31 }
 0x2dd   :  { %v4939_v45 = vpop.f32.mrf.mxu1  ;;  %v6781_v53 = vpop.f32.mrf.mxu0 }
 0x2de   :  { %7125 = vst [vmem:[#allocation16_spill] sm:$0xff] %v6781_v53  ;;  %v6783_v38 = vadd.f32 %v4939_v45, %v1462_v3 }
 0x2df   :  { %v1762_v39 = vpop.f32.mrf.mxu1  ;;  %v6785_v50 = vpop.f32.mrf.mxu0 }
 0x2e0   :  { %7126 = vst [vmem:[#allocation18_spill] sm:$0xff] %v6785_v50  ;;  %v6787_v44 = vadd.f32 %v1762_v39, %v1454_v28 }
 0x2e1   :  { %v4942_v62 = vpop.f32.mrf.mxu1  ;;  %v6789_v43 = vpop.f32.mrf.mxu0 }
 0x2e2   :  { %7127 = vst [vmem:[#allocation19_spill] sm:$0xff] %v6789_v43  ;;  %v1816_v21 = vadd.f32 %v4942_v62, %v1475_v20  ;;  %v2051_v43 = vadd.f32 %v6757_v1, %v6771_v5  ;;  %v2053_v1 = vadd.f32 %v6765_v17, %v6787_v44  ;;  %v2055_v44 = vadd.f32 %v6763_v27, %v6783_v38 }
 0x2e3   :  { %v1775_v35 = vpop.f32.mrf.mxu1  ;;  %v6791_v34 = vpop.f32.mrf.mxu0 }
 0x2e4   :  { %v6793_v25 = vadd.f32 %v1775_v35, %v1467_v14  ;;  %v2058_v30 = vadd.f32 %v4974_v29, %v1816_v21 }
 0x2e5   :  { %v4943_v18 = vpop.f32.mrf.mxu1  ;;  %v6795_v40 = vpop.f32.mrf.mxu0 }
 0x2e6   :  { %v6797_v56 = vadd.f32 %v4943_v18, %v1478_v8 }
 0x2e7   :  { %v1778_v42 = vpop.f32.mrf.mxu1  ;;  %v6799_v3 = vpop.f32.mrf.mxu0 }
 0x2e8   :  { %v6801_v52 = vadd.f32 %v1778_v42, %v1470_v47 }
 0x2e9   :  { %v4946_v7 = vpop.f32.mrf.mxu1  ;;  %v6803_v28 = vpop.f32.mrf.mxu0 }
 0x2ea   :  { %v1820_v60 = vadd.f32 %v4946_v7, %v1491_v26  ;;  %v2057_v27 = vadd.f32 %v6777_v10, %v6801_v52 }
 0x2eb   :  { %v1791_v20 = vpop.f32.mrf.mxu1  ;;  %v6805_v13 = vpop.f32.mrf.mxu0 }
 0x2ec   :  { %v6807_v15 = vadd.f32 %v1791_v20, %v1483_v2  ;;  %v2062_v14 = vadd.f32 %v4978_v4, %v1820_v60 }
 0x2ed   :  { %v4947_v61 = vpop.f32.mrf.mxu1  ;;  %v6809_v41 = vpop.f32.mrf.mxu0 }
 0x2ee   :  { %v6811_v8 = vadd.f32 %v4947_v61, %v1494_v6 }
 0x2ef   :  { %v1794_v33 = vpop.f32.mrf.mxu1  ;;  %v6813_v23 = vpop.f32.mrf.mxu0 }
 0x2f0   :  { %7128 = vst [vmem:[#allocation20_spill] sm:$0xff] %v6811_v8  ;;  %v6815_v47 = vadd.f32 %v1794_v33, %v1486_v46 }
 0x2f1   :  { %v4998_v9 = vpop.f32.mrf.mxu1  ;;  %v6817_v57 = vpop.f32.mrf.mxu0 }
 0x2f2   :  { %7129 = vst [vmem:[#allocation21_spill] sm:$0xff] %v6815_v47  ;;  %v6819_v26 = vadd.f32 %v4998_v9, %v2050_v63  ;;  %v5303_v47 = vld [vmem:[#allocation9 + $0x30] sm:$0xff]  }
 0x2f3   :  { %v2451_v48 = vpop.f32.mrf.mxu1  ;;  %v6821_v2 = vpop.f32.mrf.mxu0 }
 0x2f4   :  { %7130 = vst [vmem:[#allocation22_spill] sm:$0xff] %v6821_v2  ;;  %v2838_v5 = vadd.f32 %v6791_v34, %v6819_v26 }
 0x2f5   :  { %v4999_v11 = vpop.f32.mrf.mxu1  ;;  %v6823_v29 = vpop.f32.mrf.mxu0 }
 0x2f7   :  { %v2454_v0 = vpop.f32.mrf.mxu1  ;;  %v6827_v22 = vpop.f32.mrf.mxu0 }
 0x2f8   :  { %7131 = vst [vmem:[#allocation23_spill] sm:$0xff] %v6827_v22 }
 0x2f9   :  { %v5002_v32 = vpop.f32.mrf.mxu1  ;;  %v6833_v31 = vpop.f32.mrf.mxu0 }
 0x2fa   :  { %v6825_v6 = vadd.f32 %v5002_v32, %v2054_v19  ;;  %7132 = vst [vmem:[#allocation24_spill] sm:$0xff] %v6833_v31 }
 0x2fb   :  { %v2467_v16 = vpop.f32.mrf.mxu1  ;;  %v6839_v45 = vpop.f32.mrf.mxu0 }
 0x2fc   :  { %7134 = vst [vmem:[#allocation26_spill] sm:$0xff] %v6839_v45 }
 0x2fd   :  { %v6829_v46 = vpop.f32.mrf.mxu1  ;;  %v6843_v19 = vpop.f32.mrf.mxu0 }
 0x2fe   :  { %7135 = vst [vmem:[#allocation27_spill] sm:$0xff] %v6843_v19 }
 0x2ff   :  { %v6831_v36 = vpop.f32.mrf.mxu1  ;;  %v6847_v21 = vpop.f32.mrf.mxu0 }
 0x300   :  { %7136 = vst [vmem:[#allocation28_spill] sm:$0xff] %v6847_v21 }
 0x301   :  { %v5006_v63 = vpop.f32.mrf.mxu1  ;;  %v6853_v7 = vpop.f32.mrf.mxu0 }
 0x302   :  { %v6835_v58 = vadd.f32 %v5006_v63, %v2058_v30  ;;  %7139 = vst [vmem:[#allocation31_spill] sm:$0xff] %v6853_v7 }
 0x303   :  { %v6837_v4 = vpop.f32.mrf.mxu1 }
 0x304   :  { %7133 = vst [vmem:[#allocation25_spill] sm:$0xff] %v6835_v58 }
 0x305   :  { %v6841_v39 = vpop.f32.mrf.mxu1 }
 0x307   :  { %v6845_v62 = vpop.f32.mrf.mxu1 }
 0x309   :  { %v6859_v20 = vpop.f32.mrf.mxu0 }
 0x30b   :  { %v3482_v9 = vpop.f32.mrf.mxu0 }
 0x30d   :  { %v5010_v35 = vpop.f32.mrf.mxu1  ;;  %v6861_v45 = vpop.f32.mrf.mxu0 }
 0x30e   :  { %v6849_v18 = vadd.f32 %v5010_v35, %v2062_v14 }
 0x30f   :  { %v6851_v42 = vpop.f32.mrf.mxu1  ;;  %v3485_v35 = vpop.f32.mrf.mxu0 }
 0x310   :  { %7137 = vst [vmem:[#allocation29_spill] sm:$0xff] %v6849_v18  ;;  %7138 = vst [vmem:[#allocation30_spill] sm:$0xff] %v6851_v42  ;;  %v2048_v42 = vadd.f32 %v6755_v37, %v6767_v51  ;;  %v2052_v37 = vadd.f32 %v6761_v54, %v6779_v24  ;;  %v5304_v24 = vld [vmem:[#allocation9 + $0x28] sm:$0xff]  }
 0x311   :  { %v6855_v30 = vpop.f32.mrf.mxu1 }
 0x312   :  { %7140 = vst [vmem:[#allocation32_spill] sm:$0xff] %v6855_v30 }
 0x313   :  { %v6857_v60 = vpop.f32.mrf.mxu1 }
 0x314   :  { %7141 = vst [vmem:[#allocation33_spill] sm:$0xff] %v6857_v60 }
 0x315   :  { %v5062_v61 = vpop.f32.mrf.mxu1 }
 0x316   :  { %v3081_v17 = vadd.f32 %v5062_v61, %v2838_v5  ;;  %v7151_v5 = vld [vmem:[#allocation19_spill] sm:$0xff] }
 0x317   :  { %v3016_v33 = vpop.f32.mrf.mxu1  ;;  %v6869_v30 = vpop.f32.mrf.mxu0 }
 0x318   :  { %7142 = vst [vmem:[#allocation34_spill] sm:$0xff] %v6869_v30  ;;  %v2049_v30 = vadd.f32 %v6759_v49, %v6775_v12 }
 0x319   :  { %v5063_v32 = vpop.f32.mrf.mxu1  ;;  %v6875_v8 = vpop.f32.mrf.mxu0 }
 0x31b   :  { %v3019_v63 = vpop.f32.mrf.mxu1  ;;  %v6881_v2 = vpop.f32.mrf.mxu0 }
 0x31c   :  { %7147 = vst [vmem:[#allocation39_spill] sm:$0xff] %v6881_v2  ;;  %v5302_v2 = vld [vmem:[#allocation9 + $0x38] sm:$0xff]  }
 0x31d   :  { %v6863_v21 = vpop.f32.mrf.mxu1  ;;  %5140 = vmatprep.subr.bf16.mxu0 %v5302_v2  ;;  %5172 = vmatprep.subr.bf16.mxu1 %v5302_v2 }
 0x31e   :  { %5141 = vmatpush3.bf16.msra.mxu0 %v5302_v2  ;;  %5180 = vmatpush3.bf16.msra.mxu1 %v5302_v2 }
 0x31f   :  { %v3032_v14 = vpop.f32.mrf.mxu1  ;;  %5142 = vmatprep.subr.bf16.mxu0 %v5303_v47  ;;  %5173 = vmatprep.subr.bf16.mxu1 %v5303_v47 }
 0x321   :  { %v6865_v18 = vpop.f32.mrf.mxu1 }
 0x322   :  { %5143 = vmatpush3.bf16.msra.mxu0 %v5303_v47  ;;  %5181 = vmatpush3.bf16.msra.mxu1 %v5303_v47  ;;  %v3547_v47 = vadd.f32 %v6859_v20, %v3081_v17  ;;  %v2523_v20 = vadd.f32 %v6845_v62, %v2057_v27  ;;  %v7155_v17 = vld [vmem:[#allocation30_spill] sm:$0xff] }
 0x323   :  { %v6867_v7 = vpop.f32.mrf.mxu1  ;;  %5144 = vmatprep.subr.bf16.mxu0 %v5304_v24  ;;  %5174 = vmatprep.subr.bf16.mxu1 %v5304_v24 }
 0x325   :  { %v6871_v19 = vpop.f32.mrf.mxu1 }
 0x326   :  { %7143 = vst [vmem:[#allocation35_spill] sm:$0xff] %v6871_v19  ;;  %v2514_v19 = vadd.f32 %v2451_v48, %v2048_v42  ;;  %v2518_v48 = vadd.f32 %v2467_v16, %v2052_v37  ;;  %5145 = vmatpush3.bf16.msra.mxu0 %v5304_v24  ;;  %5182 = vmatpush3.bf16.msra.mxu1 %v5304_v24 }
 0x327   :  { %v6873_v50 = vpop.f32.mrf.mxu1 }
 0x328   :  { %7144 = vst [vmem:[#allocation36_spill] sm:$0xff] %v6873_v50  ;;  %v2515_v50 = vadd.f32 %v2454_v0, %v2049_v30  ;;  %v2836_v49 = vadd.f32 %v6795_v40, %v2514_v19  ;;  %v2840_v2 = vadd.f32 %v6809_v41, %v2518_v48 }
 0x329   :  { %v6877_v22 = vpop.f32.mrf.mxu1 }
 0x32a   :  { %7145 = vst [vmem:[#allocation37_spill] sm:$0xff] %v6877_v22  ;;  %v6893_v22 = vpop.f32.mrf.mxu0  ;;  %v2837_v51 = vadd.f32 %v6803_v28, %v2515_v50  ;;  %v2519_v50 = vadd.f32 %v6831_v36, %v2053_v1  ;;  %v5305_v36 = vld [vmem:[#allocation9 + $0x20] sm:$0xff]   ;;  %v3083_v30 = vadd.f32 %v3032_v14, %v2840_v2  ;;  %v2059_v14 = vadd.f32 %v6773_v55, %v6797_v56  ;;  %v7158_v2 = vld [vmem:[#allocation39_spill] sm:$0xff] }
 0x32b   :  { %v6879_v60 = vpop.f32.mrf.mxu1  ;;  %5146 = vmatprep.subr.bf16.mxu0 %v5305_v36  ;;  %5175 = vmatprep.subr.bf16.mxu1 %v5305_v36  ;;  %v7149_v55 = vld [vmem:[#allocation16_spill] sm:$0xff] }
 0x32c   :  { %7146 = vst [vmem:[#allocation38_spill] sm:$0xff] %v6879_v60  ;;  %v6907_v12 = vpop.f32.mrf.mxu0  ;;  %v3080_v54 = vadd.f32 %v3019_v63, %v2837_v51  ;;  %v2841_v38 = vadd.f32 %v6817_v57, %v2519_v50  ;;  %5147 = vmatpush3.bf16.msra.mxu0 %v5305_v36  ;;  %5183 = vmatpush3.bf16.msra.mxu1 %v5305_v36  ;;  %v7154_v50 = vld [vmem:[#allocation34_spill] sm:$0xff] }
 0x32d   :  { %v6883_v58 = vpop.f32.mrf.mxu1  ;;  %v2525_v1 = vadd.f32 %v6841_v39, %v2059_v14  ;;  %v2060_v56 = vadd.f32 %v7149_v55, %v6807_v15  ;;  %v7157_v15 = vld [vmem:[#allocation22_spill] sm:$0xff]  ;;  %v7166_v14 = vld [vmem:[#allocation27_spill] sm:$0xff] }
 0x32e   :  { %7148 = vst [vmem:[#allocation40_spill] sm:$0xff] %v6883_v58  ;;  %v2517_v58 = vadd.f32 %v4999_v11, %v2051_v43  ;;  %v3079_v11 = vadd.f32 %v3016_v33, %v2836_v49  ;;  %v6913_v26 = vpop.f32.mrf.mxu0  ;;  %v3546_v19 = vadd.f32 %v3485_v35, %v3080_v54 }
 0x32f   :  { %v6889_v31 = vpop.f32.mrf.mxu1  ;;  %v7153_v54 = vld [vmem:[#allocation36_spill] sm:$0xff] }
 0x330   :  { %v2839_v40 = vadd.f32 %v6799_v3, %v2517_v58  ;;  %v3545_v16 = vadd.f32 %v3482_v9, %v3079_v11  ;;  %v2521_v3 = vadd.f32 %v6829_v46, %v2055_v44  ;;  %v2056_v58 = vadd.f32 %v6769_v59, %v6793_v25  ;;  %v6930_v9 = vpop.f32.mrf.mxu0 }
 0x331   :  { %v6895_v60 = vpop.f32.mrf.mxu1  ;;  %v2842_v46 = vadd.f32 %v6805_v13, %v6825_v6  ;;  %v3084_v25 = vadd.f32 %v6867_v7, %v2841_v38  ;;  %v3549_v7 = vadd.f32 %v6875_v8, %v3083_v30  ;;  %v5307_v8 = vld [vmem:[#allocation9 + $0x10] sm:$0xff]   ;;  %v2526_v44 = vadd.f32 %v7155_v17, %v2060_v56  ;;  %v5308_v38 = vld [vmem:[#allocation9 + $0x8] sm:$0xff]   ;;  %v7168_v56 = vld [vmem:[#allocation31_spill] sm:$0xff] }
 0x332   :  { %v3082_v34 = vadd.f32 %v5063_v32, %v2839_v40  ;;  %v2522_v33 = vadd.f32 %v6837_v4, %v2056_v58  ;;  %v5306_v4 = vld [vmem:[#allocation9 + $0x18] sm:$0xff]   ;;  %v2843_v13 = vadd.f32 %v6813_v23, %v2521_v3  ;;  %v3517_v37 = vpop.f32.mrf.mxu0 }
 0x333   :  { %v6897_v53 = vpop.f32.mrf.mxu1  ;;  %v3550_v51 = vadd.f32 %v6893_v22, %v3084_v25  ;;  %5148 = vmatprep.subr.bf16.mxu0 %v5306_v4  ;;  %5176 = vmatprep.subr.bf16.mxu1 %v5306_v4  ;;  %v7159_v36 = vld [vmem:[#allocation38_spill] sm:$0xff] }
 0x334   :  { %v3548_v59 = vadd.f32 %v6861_v45, %v3082_v34  ;;  %v3085_v45 = vadd.f32 %v6863_v21, %v2842_v46  ;;  %v3086_v35 = vadd.f32 %v6865_v18, %v2843_v13  ;;  %v2844_v49 = vadd.f32 %v6823_v29, %v2522_v33  ;;  %v7150_v18 = vld [vmem:[#allocation21_spill] sm:$0xff]  ;;  %v6965_v39 = vpop.f32.mrf.mxu0  ;;  %5149 = vmatpush3.bf16.msra.mxu0 %v5306_v4  ;;  %v7164_v13 = vld [vmem:[#allocation18_spill] sm:$0xff] }
 0x335   :  { %v5126_v43 = vpop.f32.mrf.mxu1  ;;  %v2061_v29 = vadd.f32 %v7151_v5, %v7150_v18  ;;  %v7156_v34 = vld [vmem:[#allocation25_spill] sm:$0xff]  ;;  %5184 = vmatpush3.bf16.msra.mxu1 %v5306_v4  ;;  %5150 = vmatprep.subr.bf16.mxu0 %v5307_v8 }
 0x336   :  { %v6934_v52 = vadd.f32 %v5126_v43, %v3547_v47  ;;  %v7152_v43 = vld [vmem:[#allocation24_spill] sm:$0xff]  ;;  %v3087_v24 = vadd.f32 %v7153_v54, %v2844_v49  ;;  %v3551_v40 = vadd.f32 %v7154_v50, %v3085_v45  ;;  %5177 = vmatprep.subr.bf16.mxu1 %v5307_v8  ;;  %v7161_v47 = vld [vmem:[#allocation23_spill] sm:$0xff]  ;;  %v3530_v45 = vpop.f32.mrf.mxu0  ;;  %v7169_v54 = vld [vmem:[#allocation29_spill] sm:$0xff] }
 0x337   :  { %v3804_v28 = vpop.f32.mrf.mxu1  ;;  %v2845_v48 = vadd.f32 %v7152_v43, %v2523_v20  ;;  %v2847_v33 = vadd.f32 %v7161_v47, %v2525_v1  ;;  %v5309_v1 = vld [vmem:[#allocation9] sm:$0xff]  }
 0x338   :  { %v6923_v41 = vadd.f32 %v3804_v28, %v3545_v16  ;;  %v3552_v16 = vadd.f32 %v7158_v2, %v3086_v35  ;;  %v3553_v20 = vadd.f32 %v6913_v26, %v3087_v24  ;;  %v2848_v35 = vadd.f32 %v7166_v14, %v2526_v44  ;;  %5151 = vmatpush3.bf16.msra.mxu0 %v5307_v8  ;;  %v7167_v26 = vld [vmem:[#allocation32_spill] sm:$0xff]  ;;  %v7170_v24 = vld [vmem:[#allocation26_spill] sm:$0xff] }
 0x339   :  { %v5127_v0 = vpop.f32.mrf.mxu1  ;;  %v3088_v3 = vadd.f32 %v7159_v36, %v2845_v48  ;;  %5185 = vmatpush3.bf16.msra.mxu1 %v5307_v8  ;;  %5152 = vmatprep.subr.bf16.mxu0 %v5308_v38  ;;  %v2850_v50 = vadd.f32 %v7170_v24, %v7169_v54 }
 0x33a   :  { %v6941_v32 = vadd.f32 %v5127_v0, %v3548_v59  ;;  %v2846_v0 = vadd.f32 %v7157_v15, %v7156_v34  ;;  %v7162_v59 = vld [vmem:[#allocation35_spill] sm:$0xff]  ;;  %5178 = vmatprep.subr.bf16.mxu1 %v5308_v38  ;;  %v7172_v15 = vld [vmem:[#allocation40_spill] sm:$0xff] }
 0x33b   :  { %v3807_v42 = vpop.f32.mrf.mxu1 }
 0x33c   :  { %v6925_v61 = vadd.f32 %v3807_v42, %v3546_v19  ;;  %v7160_v42 = vld [vmem:[#allocation33_spill] sm:$0xff]  ;;  %v3089_v25 = vadd.f32 %v7162_v59, %v2846_v0  ;;  %5153 = vmatpush3.bf16.msra.mxu0 %v5308_v38  ;;  %v3093_v0 = vadd.f32 %v7172_v15, %v2850_v50 }
 0x33d   :  { %v5130_v10 = vpop.f32.mrf.mxu1  ;;  %v2527_v30 = vadd.f32 %v7160_v42, %v2061_v29  ;;  %v3091_v29 = vadd.f32 %v6889_v31, %v2848_v35  ;;  %5186 = vmatpush3.bf16.msra.mxu1 %v5308_v38  ;;  %5154 = vmatprep.subr.bf16.mxu0 %v5309_v1  ;;  %v7171_v31 = vld [vmem:[#allocation28_spill] sm:$0xff] }
 0x33e   :  { %v3883_v57 = vadd.f32 %v6925_v61, %v6923_v41  ;;  %v6971_v58 = vadd.f32 %v5130_v10, %v3551_v40  ;;  %v7163_v10 = vld [vmem:[#allocation20_spill] sm:$0xff]  ;;  %v3555_v43 = vadd.f32 %v6907_v12, %v3089_v25  ;;  %5179 = vmatprep.subr.bf16.mxu1 %v5309_v1 }
 0x33f   :  { %v3820_v6 = vpop.f32.mrf.mxu1  ;;  %v2849_v18 = vadd.f32 %v7168_v56, %v2527_v30  ;;  %v3557_v36 = vadd.f32 %v3530_v45, %v3091_v29  ;;  %v3559_v30 = vadd.f32 %v6965_v39, %v3093_v0 }
 0x340   :  { %v3884_v63 = vadd.f32 %v3883_v57, %v6934_v52  ;;  %v6949_v23 = vadd.f32 %v3820_v6, %v3549_v7  ;;  %v2063_v6 = vadd.f32 %v7164_v13, %v7163_v10  ;;  %5155 = vmatpush3.bf16.msra.mxu0 %v5309_v1 }
 0x341   :  { %v5131_v62 = vpop.f32.mrf.mxu1  ;;  %5187 = vmatpush3.bf16.msra.mxu1 %v5309_v1 }
 0x342   :  { %v3885_v21 = vadd.f32 %v3884_v63, %v6941_v32  ;;  %v6977_v57 = vadd.f32 %v5131_v62, %v3552_v16  ;;  %v7165_v63 = vld [vmem:[#allocation37_spill] sm:$0xff]  ;;  %v2529_v55 = vadd.f32 %v7167_v26, %v2063_v6 }
 0x343   :  { %v3823_v11 = vpop.f32.mrf.mxu1  ;;  %v3090_v7 = vadd.f32 %v7165_v63, %v2847_v33 }
 0x344   :  { %v3886_v22 = vadd.f32 %v3885_v21, %v6949_v23  ;;  %v6962_v28 = vadd.f32 %v3823_v11, %v3550_v51  ;;  %v3554_v51 = vadd.f32 %v3517_v37, %v3088_v3  ;;  %v5107_v11 = vpop.f32.mrf.mxu0  ;;  %v2851_v12 = vadd.f32 %v7171_v31, %v2529_v55 }
 0x345   :  { %v5134_v19 = vpop.f32.mrf.mxu1  ;;  %v3556_v37 = vadd.f32 %v6930_v9, %v3090_v7 }
 0x346   :  { %v3887_v27 = vadd.f32 %v3886_v22, %v6962_v28  ;;  %v3092_v22 = vadd.f32 %v6897_v53, %v2849_v18  ;;  %v3877_v17 = vadd.f32 %v5134_v19, %v3555_v43  ;;  %v3533_v3 = vpop.f32.mrf.mxu0  ;;  %v3094_v9 = vadd.f32 %v6895_v60, %v2851_v12 }
 0x347   :  { %v3836_v46 = vpop.f32.mrf.mxu1 }
 0x348   :  { %v3888_v4 = vadd.f32 %v3887_v27, %v6971_v58  ;;  %v6985_v21 = vadd.f32 %v3836_v46, %v3553_v20  ;;  %v3558_v19 = vadd.f32 %v3533_v3, %v3092_v22  ;;  %v3560_v59 = vadd.f32 %v5107_v11, %v3094_v9 }
 0x349   :  { %v5135_v49 = vpop.f32.mrf.mxu1 }
 0x34a   :  { %v3889_v62 = vadd.f32 %v3888_v4, %v6977_v57  ;;  %v3878_v2 = vadd.f32 %v5135_v49, %v3556_v37 }
 0x34b   :  { %v3839_v5 = vpop.f32.mrf.mxu1 }
 0x34c   :  { %v3890_v48 = vadd.f32 %v3889_v62, %v6985_v21  ;;  %v3876_v8 = vadd.f32 %v3839_v5, %v3554_v51 }
 0x34d   :  { %v5138_v40 = vpop.f32.mrf.mxu1 }
 0x34e   :  { %v3891_v44 = vadd.f32 %v3890_v48, %v3876_v8  ;;  %v3881_v46 = vadd.f32 %v5138_v40, %v3559_v30 }
 0x34f   :  { %v3852_v34 = vpop.f32.mrf.mxu1 }
 0x350   :  { %v3892_v16 = vadd.f32 %v3891_v44, %v3877_v17  ;;  %v3879_v38 = vadd.f32 %v3852_v34, %v3557_v36 }
 0x351   :  { %v5139_v27 = vpop.f32.mrf.mxu1 }
 0x352   :  { %v3893_v53 = vadd.f32 %v3892_v16, %v3878_v2  ;;  %v3882_v4 = vadd.f32 %v5139_v27, %v3560_v59 }
 0x353   :  { %v3855_v42 = vpop.f32.mrf.mxu1 }
 0x354   :  { %v3894_v47 = vadd.f32 %v3893_v53, %v3879_v38  ;;  %v3880_v33 = vadd.f32 %v3855_v42, %v3558_v19 }
 0x356   :  { %v3895_v25 = vadd.f32 %v3894_v47, %v3880_v33 }
 0x358   :  { %v3896_v20 = vadd.f32 %v3895_v25, %v3881_v46 }
 0x35a   :  { %v3897_v10 = vadd.f32 %v3896_v20, %v3882_v4  ;;  %v3959_v20 = vld [vmem:[%s7081_s6] sm:$0x1] }
 0x35c   :  { %v3898_v13 = vrot.slane %v3897_v10, 4 }
 0x35e   :  { %v3899_v6 = vadd.f32 %v3898_v13, %v3897_v10 }
 0x360   :  { %v3900_v45 = vrot.slane %v3899_v6, 2 }
 0x362   :  { %v3901_v63 = vadd.f32 %v3900_v45, %v3899_v6  ;;  %v7173_v6 = vld [vmem:[#allocation17_spill] sm:$0xff] }
 0x364   :  { %v3902_v7 = vrot.slane %v3901_v63, 1 }
 0x366   :  { %v3903_v60 = vadd.f32 %v3902_v7, %v3901_v63  ;;  %v4618_v63 = vld [vmem:[%s7082_s7] ss:$0 sm:$0xff] }
 0x368   :  { %v3904_v14 = vmul.f32 0.0078125, %v3903_v60 }
 0x36a   :  { %v3905_v35 = vsub.f32 %v6923_v41, %v3904_v14  ;;  %v3906_v49 = vsub.f32 %v6925_v61, %v3904_v14  ;;  %v7004_v39 = vsub.f32 %v6934_v52, %v3904_v14  ;;  %v7007_v62 = vsub.f32 %v6941_v32, %v3904_v14 }
 0x36b   :  { %v7010_v51 = vsub.f32 %v6949_v23, %v3904_v14  ;;  %v7013_v1 = vsub.f32 %v6962_v28, %v3904_v14  ;;  %v7016_v26 = vsub.f32 %v6971_v58, %v3904_v14  ;;  %v7019_v55 = vsub.f32 %v6977_v57, %v3904_v14 }
 0x36c   :  { %v3913_v41 = vsub.f32 %v6985_v21, %v3904_v14  ;;  %v3914_v61 = vsub.f32 %v3876_v8, %v3904_v14  ;;  %v3915_v52 = vsub.f32 %v3877_v17, %v3904_v14  ;;  %v3916_v56 = vsub.f32 %v3878_v2, %v3904_v14 }
 0x36d   :  { %v7022_v18 = vsub.f32 %v3879_v38, %v3904_v14  ;;  %v3918_v32 = vsub.f32 %v3880_v33, %v3904_v14  ;;  %v7024_v5 = vsub.f32 %v3881_v46, %v3904_v14  ;;  %v7026_v23 = vsub.f32 %v3882_v4, %v3904_v14 }
 0x36e   :  { %v3921_v28 = vmul.f32 %v3905_v35, %v3905_v35  ;;  %v3922_v29 = vmul.f32 %v3906_v49, %v3906_v49  ;;  %v3923_v58 = vmul.f32 %v7004_v39, %v7004_v39  ;;  %v3924_v57 = vmul.f32 %v7007_v62, %v7007_v62 }
 0x36f   :  { %v3925_v48 = vmul.f32 %v7010_v51, %v7010_v51  ;;  %v3926_v11 = vmul.f32 %v7013_v1, %v7013_v1  ;;  %v3927_v24 = vmul.f32 %v7016_v26, %v7016_v26  ;;  %v3928_v37 = vmul.f32 %v7019_v55, %v7019_v55 }
 0x370   :  { %v3937_v43 = vadd.f32 %v3922_v29, %v3921_v28  ;;  %v3929_v22 = vmul.f32 %v3913_v41, %v3913_v41  ;;  %v3930_v44 = vmul.f32 %v3914_v61, %v3914_v61  ;;  %v3931_v12 = vmul.f32 %v3915_v52, %v3915_v52 }
 0x371   :  { %v3932_v15 = vmul.f32 %v3916_v56, %v3916_v56  ;;  %v3933_v2 = vmul.f32 %v7022_v18, %v7022_v18  ;;  %v3934_v36 = vmul.f32 %v3918_v32, %v3918_v32  ;;  %v3935_v27 = vmul.f32 %v7024_v5, %v7024_v5 }
 0x372   :  { %v3938_v21 = vadd.f32 %v3937_v43, %v3923_v58  ;;  %v3936_v38 = vmul.f32 %v7026_v23, %v7026_v23 }
 0x374   :  { %v3939_v8 = vadd.f32 %v3938_v21, %v3924_v57 }
 0x376   :  { %v3940_v54 = vadd.f32 %v3939_v8, %v3925_v48 }
 0x378   :  { %v3941_v50 = vadd.f32 %v3940_v54, %v3926_v11 }
 0x37a   :  { %v3942_v40 = vadd.f32 %v3941_v50, %v3927_v24 }
 0x37c   :  { %v3943_v17 = vadd.f32 %v3942_v40, %v3928_v37 }
 0x37e   :  { %v3944_v31 = vadd.f32 %v3943_v17, %v3929_v22 }
 0x380   :  { %v3945_v34 = vadd.f32 %v3944_v31, %v3930_v44 }
 0x382   :  { %v3946_v0 = vadd.f32 %v3945_v34, %v3931_v12 }
 0x384   :  { %v3947_v16 = vadd.f32 %v3946_v0, %v3932_v15 }
 0x386   :  { %v3948_v3 = vadd.f32 %v3947_v16, %v3933_v2 }
 0x388   :  { %v3949_v9 = vadd.f32 %v3948_v3, %v3934_v36 }
 0x38a   :  { %v3950_v53 = vadd.f32 %v3949_v9, %v3935_v27 }
 0x38c   :  { %v3951_v19 = vadd.f32 %v3950_v53, %v3936_v38 }
 0x38e   :  { %v3952_v42 = vrot.slane %v3951_v19, 4 }
 0x390   :  { %v3953_v30 = vadd.f32 %v3952_v42, %v3951_v19 }
 0x392   :  { %v3954_v47 = vrot.slane %v3953_v30, 2 }
 0x394   :  { %v3955_v33 = vadd.f32 %v3954_v47, %v3953_v30 }
 0x396   :  { %v3956_v46 = vrot.slane %v3955_v33, 1 }
 0x398   :  { %v3957_v59 = vadd.f32 %v3956_v46, %v3955_v33 }
 0x39a   :  { %v3958_v25 = vmul.f32 0.0078125, %v3957_v59 }
 0x39c   :  { %v3960_v4 = vadd.f32 1e-05, %v3958_v25 }
 0x39e   :  { %5312 = vrsqrt.f32 %v3960_v4 }
 0x3ab   :  { %v5313_v10 = vpop.eup %5312 }
 0x3ac   :  { %v3962_v13 = vmul.f32 %v5313_v10, %v3959_v20 }
 0x3ae   :  { %v3967_v45 = vrot.slane %v3962_v13, %v7173_v6 }
 0x3b0   :  { %v3982_v7 = vmul.f32 %v3967_v45, %v3918_v32  ;;  %v3969_v60 = vmul.f32 %v3967_v45, %v3905_v35  ;;  %v3970_v14 = vmul.f32 %v3967_v45, %v3906_v49  ;;  %v3977_v28 = vmul.f32 %v3967_v45, %v3913_v41 }
 0x3b1   :  { %v3978_v29 = vmul.f32 %v3967_v45, %v3914_v61  ;;  %v3971_v58 = vmul.f32 %v3967_v45, %v7004_v39  ;;  %v3972_v43 = vmul.f32 %v3967_v45, %v7007_v62  ;;  %v3979_v57 = vmul.f32 %v3967_v45, %v3915_v52 }
 0x3b2   :  { %v3992_v21 = vadd.f32 %v4618_v63, %v3969_v60  ;;  %v3993_v48 = vadd.f32 %v4618_v63, %v3970_v14  ;;  %v4000_v8 = vadd.f32 %v4618_v63, %v3977_v28  ;;  %v3980_v11 = vmul.f32 %v3967_v45, %v3916_v56 }
 0x3b3   :  { %v4001_v54 = vadd.f32 %v4618_v63, %v3978_v29  ;;  %v3994_v24 = vadd.f32 %v4618_v63, %v3971_v58  ;;  %v3995_v50 = vadd.f32 %v4618_v63, %v3972_v43  ;;  %v4002_v37 = vadd.f32 %v4618_v63, %v3979_v57 }
 0x3b4   :  { %v4008_v40 = vmax.f32 %v3992_v21, 0.0  ;;  %v4009_v22 = vmax.f32 %v3993_v48, 0.0  ;;  %v4016_v32 = vmax.f32 %v4000_v8, 0.0  ;;  %v4003_v35 = vadd.f32 %v4618_v63, %v3980_v11 }
 0x3b5   :  { %v4017_v49 = vmax.f32 %v4001_v54, 0.0  ;;  %v4010_v41 = vmax.f32 %v3994_v24, 0.0  ;;  %v4011_v61 = vmax.f32 %v3995_v50, 0.0  ;;  %v4018_v17 = vmax.f32 %v4002_v37, 0.0 }
 0x3b6   :  { %v4024_v39 = vpack.c.bf16 %v4009_v22, %v4008_v40  ;;  %v4019_v44 = vmax.f32 %v4003_v35, 0.0  ;;  %v3973_v62 = vmul.f32 %v3967_v45, %v7010_v51  ;;  %v3974_v52 = vmul.f32 %v3967_v45, %v7013_v1 }
 0x3b7   :  { %v4028_v31 = vpack.c.bf16 %v4017_v49, %v4016_v32  ;;  %v4025_v56 = vpack.c.bf16 %v4011_v61, %v4010_v41  ;;  %v3981_v12 = vmul.f32 %v3967_v45, %v7022_v18  ;;  %v4005_v34 = vadd.f32 %v4618_v63, %v3982_v7 }
 0x3b8   :  { %5156 = vmatprep.mubr.bf16.mxu0 %v4024_v39  ;;  %v4029_v15 = vpack.c.bf16 %v4019_v44, %v4018_v17  ;;  %v3996_v0 = vadd.f32 %v4618_v63, %v3973_v62  ;;  %v3997_v2 = vadd.f32 %v4618_v63, %v3974_v52  ;;  %v3975_v16 = vmul.f32 %v3967_v45, %v7016_v26 }
 0x3b9   :  { %5164 = vmatprep.mubr.bf16.mxu1 %v4028_v31  ;;  %5157 = vmatmul.mubr.bf16.vlgmr.msra.gmra.mxu0 %v4025_v56  ;;  %v4004_v36 = vadd.f32 %v4618_v63, %v3981_v12  ;;  %v4021_v3 = vmax.f32 %v4005_v34, 0.0  ;;  %v3976_v27 = vmul.f32 %v3967_v45, %v7019_v55  ;;  %v3983_v51 = vmul.f32 %v3967_v45, %v7024_v5 }
 0x3ba   :  { %5165 = vmatmul.mubr.bf16.vlgmr.msra.gmra.mxu1 %v4029_v15  ;;  %v4012_v1 = vmax.f32 %v3996_v0, 0.0  ;;  %v4013_v9 = vmax.f32 %v3997_v2, 0.0  ;;  %v3998_v38 = vadd.f32 %v4618_v63, %v3975_v16  ;;  %v3984_v18 = vmul.f32 %v3967_v45, %v7026_v23 }
 0x3bb   :  { %v4020_v53 = vmax.f32 %v4004_v36, 0.0  ;;  %v3999_v19 = vadd.f32 %v4618_v63, %v3976_v27  ;;  %v4006_v42 = vadd.f32 %v4618_v63, %v3983_v51 }
 0x3bc   :  { %v4026_v30 = vpack.c.bf16 %v4013_v9, %v4012_v1  ;;  %v4014_v47 = vmax.f32 %v3998_v38, 0.0  ;;  %v4007_v26 = vadd.f32 %v4618_v63, %v3984_v18 }
 0x3bd   :  { %v4030_v33 = vpack.c.bf16 %v4021_v3, %v4020_v53  ;;  %v4015_v46 = vmax.f32 %v3999_v19, 0.0  ;;  %v4022_v59 = vmax.f32 %v4006_v42, 0.0 }
 0x3be   :  { %5160 = vmatprep.mubr.bf16.mxu0 %v4026_v30  ;;  %v4023_v25 = vmax.f32 %v4007_v26, 0.0 }
 0x3bf   :  { %5168 = vmatprep.mubr.bf16.mxu1 %v4030_v33  ;;  %v4027_v55 = vpack.c.bf16 %v4015_v46, %v4014_v47 }
 0x3c0   :  { %v4031_v5 = vpack.c.bf16 %v4023_v25, %v4022_v59 }
 0x3c1   :  { %5161 = vmatmul.mubr.bf16.gmra.mxu0 %v4027_v55 }
 0x3c2   :  { %5169 = vmatmul.mubr.bf16.gmra.mxu1 %v4031_v5 }
 0x479   :  { %v5158_v4 = vpop.f32.mrf.mxu0 }
 0x47a   :  { %v5166_v20 = vpop.f32.mrf.mxu1 }
 0x47b   :  { %v4130_v10 = vpop.f32.mrf.mxu0 }
 0x47c   :  { %v4162_v13 = vpop.f32.mrf.mxu1 }
 0x47d   :  { %v5159_v23 = vpop.f32.mrf.mxu0 }
 0x47e   :  { %v5167_v63 = vpop.f32.mrf.mxu1 }
 0x47f   :  { %v4133_v45 = vpop.f32.mrf.mxu0 }
 0x480   :  { %v4193_v7 = vadd.f32 %v4133_v45, %v4130_v10  ;;  %v4165_v57 = vpop.f32.mrf.mxu1 }
 0x481   :  { %v5162_v60 = vpop.f32.mrf.mxu0 }
 0x482   :  { %v4194_v14 = vadd.f32 %v5158_v4, %v4193_v7  ;;  %v5170_v11 = vpop.f32.mrf.mxu1 }
 0x483   :  { %v4146_v28 = vpop.f32.mrf.mxu0 }
 0x484   :  { %v4195_v29 = vadd.f32 %v5159_v23, %v4194_v14  ;;  %v4178_v50 = vpop.f32.mrf.mxu1 }
 0x485   :  { %v5163_v58 = vpop.f32.mrf.mxu0 }
 0x486   :  { %v4196_v43 = vadd.f32 %v4195_v29, %v4146_v28  ;;  %v5171_v22 = vpop.f32.mrf.mxu1 }
 0x487   :  { %v4149_v21 = vpop.f32.mrf.mxu0 }
 0x488   :  { %v4197_v48 = vadd.f32 %v4196_v43, %v4149_v21  ;;  %v4181_v49 = vpop.f32.mrf.mxu1 }
 0x48a   :  { %v4198_v8 = vadd.f32 %v5162_v60, %v4197_v48 }
 0x48c   :  { %v4199_v54 = vadd.f32 %v5163_v58, %v4198_v8 }
 0x48e   :  { %v4200_v24 = vadd.f32 %v4199_v54, %v4162_v13 }
 0x490   :  { %v4201_v37 = vadd.f32 %v4200_v24, %v4165_v57 }
 0x492   :  { %v4202_v40 = vadd.f32 %v5166_v20, %v4201_v37 }
 0x494   :  { %v4203_v32 = vadd.f32 %v5167_v63, %v4202_v40 }
 0x496   :  { %v4204_v35 = vadd.f32 %v4203_v32, %v4178_v50 }
 0x498   :  { %v4205_v41 = vadd.f32 %v4204_v35, %v4181_v49 }
 0x49a   :  { %v4206_v61 = vadd.f32 %v5170_v11, %v4205_v41 }
 0x49c   :  { %v4207_v17 = vadd.f32 %v5171_v22, %v4206_v61 }
 0x49e   :  { %v4208_v39 = vrot.slane %v4207_v17, 4 }
 0x4a0   :  { %v4209_v44 = vadd.f32 %v4208_v39, %v4207_v17 }
 0x4a2   :  { %v4210_v62 = vrot.slane %v4209_v44, 2 }
 0x4a4   :  { %v4211_v52 = vadd.f32 %v4210_v62, %v4209_v44 }
 0x4a6   :  { %v4212_v31 = vrot.slane %v4211_v52, 1 }
 0x4a8   :  { %v4213_v56 = vadd.f32 %v4212_v31, %v4211_v52 }
 0x4aa   :  { %v4214_v12 = vmul.f32 0.0078125, %v4213_v56 }
 0x4ac   :  { %v4215_v34 = vsub.f32 %v4130_v10, %v4214_v12  ;;  %v4216_v15 = vsub.f32 %v4133_v45, %v4214_v12  ;;  %v4217_v0 = vsub.f32 %v5158_v4, %v4214_v12  ;;  %v4218_v36 = vsub.f32 %v5159_v23, %v4214_v12 }
 0x4ad   :  { %v4219_v3 = vsub.f32 %v4146_v28, %v4214_v12  ;;  %v4220_v1 = vsub.f32 %v4149_v21, %v4214_v12  ;;  %v4221_v18 = vsub.f32 %v5162_v60, %v4214_v12  ;;  %v4222_v42 = vsub.f32 %v5163_v58, %v4214_v12 }
 0x4ae   :  { %v4231_v2 = vmul.f32 %v4215_v34, %v4215_v34  ;;  %v4232_v16 = vmul.f32 %v4216_v15, %v4216_v15  ;;  %v4233_v27 = vmul.f32 %v4217_v0, %v4217_v0  ;;  %v4234_v9 = vmul.f32 %v4218_v36, %v4218_v36 }
 0x4af   :  { %v4235_v53 = vmul.f32 %v4219_v3, %v4219_v3  ;;  %v4236_v30 = vmul.f32 %v4220_v1, %v4220_v1  ;;  %v4223_v26 = vsub.f32 %v4162_v13, %v4214_v12  ;;  %v4237_v33 = vmul.f32 %v4221_v18, %v4221_v18 }
 0x4b0   :  { %v4247_v51 = vadd.f32 %v4232_v16, %v4231_v2  ;;  %v4224_v59 = vsub.f32 %v4165_v57, %v4214_v12  ;;  %v4238_v25 = vmul.f32 %v4222_v42, %v4222_v42  ;;  %v4225_v5 = vsub.f32 %v5166_v20, %v4214_v12 }
 0x4b1   :  { %v4239_v4 = vmul.f32 %v4223_v26, %v4223_v26  ;;  %v4226_v23 = vsub.f32 %v5167_v63, %v4214_v12  ;;  %v4227_v14 = vsub.f32 %v4178_v50, %v4214_v12  ;;  %v4228_v29 = vsub.f32 %v4181_v49, %v4214_v12 }
 0x4b2   :  { %v4248_v38 = vadd.f32 %v4247_v51, %v4233_v27  ;;  %v4240_v45 = vmul.f32 %v4224_v59, %v4224_v59  ;;  %v4241_v28 = vmul.f32 %v4225_v5, %v4225_v5  ;;  %v4229_v21 = vsub.f32 %v5170_v11, %v4214_v12  ;;  %v4269_v11 = vld [vmem:[%s7083_s8] sm:$0x1]  ;;  %s5434_s8 = smov [#allocation11]  }
 0x4b3   :  { %v4242_v43 = vmul.f32 %v4226_v23, %v4226_v23  ;;  %v4243_v48 = vmul.f32 %v4227_v14, %v4227_v14  ;;  %v4230_v8 = vsub.f32 %v5171_v22, %v4214_v12  ;;  %v4244_v54 = vmul.f32 %v4228_v29, %v4228_v29 }
 0x4b4   :  { %v4249_v19 = vadd.f32 %v4248_v38, %v4234_v9  ;;  %v4245_v24 = vmul.f32 %v4229_v21, %v4229_v21  ;;  %v4627_v9 = vld [vmem:[%s7084_s9] ss:$0 sm:$0xff]  ;;  %s4387_s9 = sshll.u32 %s5434_s8, 4  ;;  %s4388_s9 = int_to_ptr.vmem [resolvable:$true] %s4387_s9 }
 0x4b5   :  { %v4246_v20 = vmul.f32 %v4230_v8, %v4230_v8  ;;  %s5397_s21 = scalar_lea.vmem %s4388_s9, 2048  ;;  %p5402_p7 = scmp.lt.s32.totalorder %s4388_s9, %s4388_s9 }
 0x4b6   :  { %v4250_v47 = vadd.f32 %v4249_v19, %v4235_v53  ;;  %p5398_p6 = scmp.ne.s32.totalorder %s4388_s9, %s5397_s21  ;;  %p5403_p8 = scmp.lt.s32.totalorder %s5397_s21, %s5397_s21 }
 0x4b8   :  { %v4251_v46 = vadd.f32 %v4250_v47, %v4236_v30  ;;  %p5404_p9 = por %p5403_p8, %p5402_p7 }
 0x4ba   :  { %v4252_v55 = vadd.f32 %v4251_v46, %v4237_v33  ;;  %p5405_p10 = pnand %p5404_p9, %p5398_p6 }
 0x4bc   :  { %v4253_v10 = vadd.f32 %v4252_v55, %v4238_v25 }
 0x4be   :  { %v4254_v7 = vadd.f32 %v4253_v10, %v4239_v4 }
 0x4c0   :  { %v4255_v60 = vadd.f32 %v4254_v7, %v4240_v45 }
 0x4c2   :  { %v4256_v58 = vadd.f32 %v4255_v60, %v4241_v28  ;;  %v4325_v28 = vld [vmem:[#allocation3 + $0x38] sm:$0xff]  ;;  %v4326_v60 = vld [vmem:[#allocation3 + $0x40] sm:$0xff] }
 0x4c4   :  { %v4257_v13 = vadd.f32 %v4256_v58, %v4242_v43 }
 0x4c6   :  { %v4258_v57 = vadd.f32 %v4257_v13, %v4243_v48  ;;  %v4328_v13 = vld [vmem:[#allocation3 + $0x50] sm:$0xff] }
 0x4c8   :  { %v4259_v37 = vadd.f32 %v4258_v57, %v4244_v54  ;;  %v4330_v54 = vld [vmem:[#allocation3 + $0x60] sm:$0xff]  ;;  %v4331_v57 = vld [vmem:[#allocation3 + $0x68] sm:$0xff] }
 0x4ca   :  { %v4260_v40 = vadd.f32 %v4259_v37, %v4245_v24  ;;  %v4332_v24 = vld [vmem:[#allocation3 + $0x70] sm:$0xff]  ;;  %v4333_v37 = vld [vmem:[#allocation3 + $0x78] sm:$0xff] }
 0x4cc   :  { %v4261_v32 = vadd.f32 %v4260_v40, %v4246_v20 }
 0x4ce   :  { %v4262_v63 = vrot.slane %v4261_v32, 4 }
 0x4d0   :  { %v4263_v35 = vadd.f32 %v4262_v63, %v4261_v32 }
 0x4d2   :  { %v4264_v41 = vrot.slane %v4263_v35, 2 }
 0x4d4   :  { %v4265_v50 = vadd.f32 %v4264_v41, %v4263_v35 }
 0x4d6   :  { %v4266_v61 = vrot.slane %v4265_v50, 1 }
 0x4d8   :  { %v4267_v17 = vadd.f32 %v4266_v61, %v4265_v50 }
 0x4da   :  { %v4268_v49 = vmul.f32 0.0078125, %v4267_v17 }
 0x4dc   :  { %v4270_v39 = vadd.f32 1e-05, %v4268_v49 }
 0x4de   :  { %5314 = vrsqrt.f32 %v4270_v39 }
 0x4eb   :  { %v5315_v22 = vpop.eup %5314 }
 0x4ec   :  { %v4272_v44 = vmul.f32 %v5315_v22, %v4269_v11 }
 0x4ee   :  { %v4277_v62 = vrot.slane %v4272_v44, %v7173_v6 }
 0x4f0   :  { %v4279_v52 = vmul.f32 %v4277_v62, %v4215_v34  ;;  %v4280_v31 = vmul.f32 %v4277_v62, %v4216_v15  ;;  %v4281_v56 = vmul.f32 %v4277_v62, %v4217_v0  ;;  %v4282_v12 = vmul.f32 %v4277_v62, %v4218_v36  ;;  %v4318_v34 = vld [vmem:[#allocation3] sm:$0xff] }
 0x4f1   :  { %v4283_v2 = vmul.f32 %v4277_v62, %v4219_v3  ;;  %v4284_v16 = vmul.f32 %v4277_v62, %v4220_v1  ;;  %v4285_v27 = vmul.f32 %v4277_v62, %v4221_v18  ;;  %v4286_v51 = vmul.f32 %v4277_v62, %v4222_v42  ;;  %v4319_v1 = vld [vmem:[#allocation3 + $0x8] sm:$0xff]  ;;  %v4320_v18 = vld [vmem:[#allocation3 + $0x10] sm:$0xff]  ;;  %v4321_v42 = vld [vmem:[#allocation3 + $0x18] sm:$0xff] }
 0x4f2   :  { %v4287_v38 = vmul.f32 %v4277_v62, %v4223_v26  ;;  %v4288_v53 = vmul.f32 %v4277_v62, %v4224_v59  ;;  %v4289_v19 = vmul.f32 %v4277_v62, %v4225_v5  ;;  %v4290_v30 = vmul.f32 %v4277_v62, %v4226_v23  ;;  %v4322_v26 = vld [vmem:[#allocation3 + $0x20] sm:$0xff]  ;;  %v4323_v59 = vld [vmem:[#allocation3 + $0x28] sm:$0xff]  ;;  %v4324_v5 = vld [vmem:[#allocation3 + $0x30] sm:$0xff] }
 0x4f3   :  { %v4291_v47 = vmul.f32 %v4277_v62, %v4227_v14  ;;  %v4292_v33 = vmul.f32 %v4277_v62, %v4228_v29  ;;  %v4293_v46 = vmul.f32 %v4277_v62, %v4229_v21  ;;  %v4294_v6 = vmul.f32 %v4277_v62, %v4230_v8  ;;  %v4327_v29 = vld [vmem:[#allocation3 + $0x48] sm:$0xff]  ;;  %v4329_v8 = vld [vmem:[#allocation3 + $0x58] sm:$0xff] }
 0x4f4   :  { %v4302_v15 = vadd.f32 %v4627_v9, %v4279_v52  ;;  %v4303_v0 = vadd.f32 %v4627_v9, %v4280_v31  ;;  %v4304_v36 = vadd.f32 %v4627_v9, %v4281_v56  ;;  %v4305_v3 = vadd.f32 %v4627_v9, %v4282_v12 }
 0x4f5   :  { %v4306_v25 = vadd.f32 %v4627_v9, %v4283_v2  ;;  %v4307_v55 = vadd.f32 %v4627_v9, %v4284_v16  ;;  %v4308_v4 = vadd.f32 %v4627_v9, %v4285_v27  ;;  %v4309_v10 = vadd.f32 %v4627_v9, %v4286_v51 }
 0x4f6   :  { %v4310_v23 = vadd.f32 %v4627_v9, %v4287_v38  ;;  %v4311_v45 = vadd.f32 %v4627_v9, %v4288_v53  ;;  %v4312_v7 = vadd.f32 %v4627_v9, %v4289_v19  ;;  %v4313_v14 = vadd.f32 %v4627_v9, %v4290_v30 }
 0x4f7   :  { %v4314_v43 = vadd.f32 %v4627_v9, %v4291_v47  ;;  %v4315_v58 = vadd.f32 %v4627_v9, %v4292_v33  ;;  %v4316_v21 = vadd.f32 %v4627_v9, %v4293_v46  ;;  %v4317_v48 = vadd.f32 %v4627_v9, %v4294_v6 }
 0x4f8   :  { %v4334_v20 = vadd.f32 %v4318_v34, %v4302_v15  ;;  %v4335_v40 = vadd.f32 %v4319_v1, %v4303_v0  ;;  %v4336_v32 = vadd.f32 %v4320_v18, %v4304_v36  ;;  %v4337_v63 = vadd.f32 %v4321_v42, %v4305_v3 }
 0x4f9   :  { %v4338_v35 = vadd.f32 %v4322_v26, %v4306_v25  ;;  %v4339_v41 = vadd.f32 %v4323_v59, %v4307_v55  ;;  %v4340_v50 = vadd.f32 %v4324_v5, %v4308_v4  ;;  %v4341_v61 = vadd.f32 %v4325_v28, %v4309_v10 }
 0x4fa   :  { %v4342_v17 = vadd.f32 %v4326_v60, %v4310_v23  ;;  %v4343_v49 = vadd.f32 %v4327_v29, %v4311_v45  ;;  %v4344_v39 = vadd.f32 %v4328_v13, %v4312_v7  ;;  %v4345_v11 = vadd.f32 %v4329_v8, %v4313_v14 }
 0x4fb   :  { %v4346_v22 = vadd.f32 %v4330_v54, %v4314_v43  ;;  %v4347_v44 = vadd.f32 %v4331_v57, %v4315_v58  ;;  %v4348_v62 = vadd.f32 %v4332_v24, %v4316_v21  ;;  %v4349_v52 = vadd.f32 %v4333_v37, %v4317_v48 }
 0x4fc   :  { %v4350_v31 = vmax.f32 %v4334_v20, 0.0  ;;  %v4351_v56 = vmax.f32 %v4335_v40, 0.0  ;;  %v4352_v12 = vmax.f32 %v4336_v32, 0.0  ;;  %v4353_v2 = vmax.f32 %v4337_v63, 0.0 }
 0x4fd   :  { %v4354_v16 = vmax.f32 %v4338_v35, 0.0  ;;  %v4355_v27 = vmax.f32 %v4339_v41, 0.0  ;;  %v4356_v51 = vmax.f32 %v4340_v50, 0.0  ;;  %v4357_v9 = vmax.f32 %v4341_v61, 0.0 }
 0x4fe   :  { %v4358_v38 = vmax.f32 %v4342_v17, 0.0  ;;  %v4359_v53 = vmax.f32 %v4343_v49, 0.0  ;;  %v4360_v19 = vmax.f32 %v4344_v39, 0.0  ;;  %v4361_v30 = vmax.f32 %v4345_v11, 0.0  ;;  %4366 = vst [vmem:[#allocation11] sm:$0xff] %v4350_v31  ;;  %4367 = vst [vmem:[#allocation11 + $0x8] sm:$0xff] %v4351_v56 }
 0x4ff   :  { %4368 = vst [vmem:[#allocation11 + $0x10] sm:$0xff] %v4352_v12  ;;  %4369 = vst [vmem:[#allocation11 + $0x18] sm:$0xff] %v4353_v2  ;;  %v4362_v47 = vmax.f32 %v4346_v22, 0.0  ;;  %v4363_v33 = vmax.f32 %v4347_v44, 0.0  ;;  %v4364_v46 = vmax.f32 %v4348_v62, 0.0  ;;  %v4365_v6 = vmax.f32 %v4349_v52, 0.0 }
 0x500   :  { %4370 = vst [vmem:[#allocation11 + $0x20] sm:$0xff] %v4354_v16  ;;  %4371 = vst [vmem:[#allocation11 + $0x28] sm:$0xff] %v4355_v27 }
 0x501   :  { %4372 = vst [vmem:[#allocation11 + $0x30] sm:$0xff] %v4356_v51  ;;  %4373 = vst [vmem:[#allocation11 + $0x38] sm:$0xff] %v4357_v9 }
 0x502   :  { %4374 = vst [vmem:[#allocation11 + $0x40] sm:$0xff] %v4358_v38  ;;  %4375 = vst [vmem:[#allocation11 + $0x48] sm:$0xff] %v4359_v53 }
 0x503   :  { %4376 = vst [vmem:[#allocation11 + $0x50] sm:$0xff] %v4360_v19  ;;  %4377 = vst [vmem:[#allocation11 + $0x58] sm:$0xff] %v4361_v30 }
 0x504   :  { %4378 = vst [vmem:[#allocation11 + $0x60] sm:$0xff] %v4362_v47  ;;  %4379 = vst [vmem:[#allocation11 + $0x68] sm:$0xff] %v4363_v33 }
 0x505   :  { %4380 = vst [vmem:[#allocation11 + $0x70] sm:$0xff] %v4364_v46  ;;  %4381 = vst [vmem:[#allocation11 + $0x78] sm:$0xff] %v4365_v6 }
 0x506   :  { %5408 = shalt.err (!%p5405_p10)
}
 0x507   :  { %4393 = dma.vmem_to_hbm [thread:$0]  %s4388_s9, 2048, %s7085_s10, [#allocation5], %s5429_s23, %s5429_s23, %s5430_s24  }
 0x508   :  { %5423 = dma.done.wait [#allocation5], 2048  }
 0x509   :  { %5424 = vsyncadd [#allocation5], 4294965248 }
 0x50a   :  { %4397 = vsyncpa [#allocation4], 1 }
 0x50b   :  { %4398 = vsyncpa [#allocation7], 1 }
 0x50c   :  { %4399 = vsyncpa [#allocation10], 1 }
 0x50d   :  { %4400 = vsyncpa [#allocation5], 1 }

</bundles_post_ra>
